<compile_context>
chip_gen: v5e
topology: v5e:2x2
jax: 0.10.0
libtpu: 0.0.40
codegen_flags: <defaults>
</compile_context>

<pallas_src>
import jax
import jax.numpy as jnp
from jax import lax
from jax.experimental import pallas as pl
from jax.experimental.pallas import tpu as pltpu


# ---------------------------------------------------------------------------
# helpers
# ---------------------------------------------------------------------------
def _round_up(x, m):
    return ((x + m - 1) // m) * m


def _pick_block_b(batch):
    """Batch tile: multiple of 8 sublanes, capped so VMEM stays small."""
    return min(_round_up(batch, 8), 32)


def _gate_pad_weight_t(w, H, H_pad, in_dim, in_pad):
    """(3H, in_dim) PyTorch weight -> (in_pad, 3*H_pad) transposed, each gate
    block lane-aligned at g*H_pad, zero padded."""
    blocks = []
    for g in range(3):
        wg = w[g * H:(g + 1) * H, :].T                       # (in_dim, H)
        wg = jnp.pad(wg, ((0, in_pad - in_dim), (0, H_pad - H)))
        blocks.append(wg)
    return jnp.concatenate(blocks, axis=1)                   # (in_pad, 3*H_pad)


def _gate_pad_bias(b, H, H_pad):
    """(3H,) -> (1, 3*H_pad) with each gate block lane-aligned."""
    blocks = [jnp.pad(b[g * H:(g + 1) * H], (0, H_pad - H)) for g in range(3)]
    return jnp.concatenate(blocks)[None, :]


# ---------------------------------------------------------------------------
# fused Pallas kernel (all GRU layers + fc head)
# ---------------------------------------------------------------------------
def _make_fused_gru_kernel(num_layers, seq_len, block_b, h_pad, proj_len, unroll):
    H3 = 3 * h_pad
    rows = seq_len * block_b

    def kernel(*refs):
        x_ref = refs[0]
        layer_refs = refs[1:1 + 4 * num_layers]
        w_fc_ref = refs[1 + 4 * num_layers]
        b_fc_ref = refs[2 + 4 * num_layers]
        out_ref = refs[3 + 4 * num_layers]
        gx_ref = refs[4 + 4 * num_layers]                    # (T*TB, 3*H_pad)
        hseq_refs = (refs[5 + 4 * num_layers], refs[6 + 4 * num_layers])

        # Layer-0 input flattened to (T*TB, I_pad) for one big MXU GEMM.
        cur_in = x_ref[...].reshape(rows, x_ref.shape[-1])

        for layer in range(num_layers):
            w_ih_ref = layer_refs[4 * layer + 0]
            w_hh_ref = layer_refs[4 * layer + 1]
            bgx_ref = layer_refs[4 * layer + 2]
            bhn_ref = layer_refs[4 * layer + 3]

            # (1) Whole-sequence input projection, off the serial critical path.
            #     r/z biases (b_ih + b_hh) and b_in are folded in here.
            gx_ref[...] = (
                jnp.dot(cur_in, w_ih_ref[...], preferred_element_type=jnp.float32)
                + bgx_ref[...]
            )

            hseq_ref = hseq_refs[layer % 2]
            w_hh = w_hh_ref[...]                              # hoisted loads
            bhn = bhn_ref[...]

            # (2) Serial recurrence: one small matmul + gate math per step.
            def step(t, h, hseq_ref=hseq_ref, w_hh=w_hh, bhn=bhn):
                row = pl.multiple_of(t * block_b, block_b)
                gx_t = gx_ref[pl.ds(row, block_b), :]         # (TB, 3*H_pad)
                gh = jnp.dot(h, w_hh, preferred_element_type=jnp.float32)
                r = jax.nn.sigmoid(gx_t[:, 0:h_pad] + gh[:, 0:h_pad])
                z = jax.nn.sigmoid(gx_t[:, h_pad:2 * h_pad] + gh[:, h_pad:2 * h_pad])
                n = jnp.tanh(gx_t[:, 2 * h_pad:H3] + r * (gh[:, 2 * h_pad:H3] + bhn))
                h_new = (1.0 - z) * n + z * h
                hseq_ref[pl.ds(row, block_b), :] = h_new      # VMEM, lane-dense
                return h_new

            h0 = jnp.zeros((block_b, h_pad), jnp.float32)
            lax.fori_loop(0, seq_len, step, h0, unroll=unroll)

            cur_in = hseq_refs[layer % 2][...]                # input to next layer

        # (3) fc epilogue: only the last proj_len timesteps ever reach HBM.
        tail_start = (seq_len - proj_len) * block_b
        tail = hseq_refs[(num_layers - 1) % 2][pl.ds(tail_start, proj_len * block_b), :]
        y = (jnp.dot(tail, w_fc_ref[...], preferred_element_type=jnp.float32)
             + b_fc_ref[...])
        out_ref[...] = y.reshape(proj_len, block_b, -1)

    return kernel


# ---------------------------------------------------------------------------
# parameters
# ---------------------------------------------------------------------------
def init_grunet_params(key, input_size, output_size, hidden_size, gru_layers):
    """Raw params in PyTorch layout, U(-1/sqrt(H), 1/sqrt(H)) init."""
    params = {"gru": [], "fc": {}}
    bound = 1.0 / float(jnp.sqrt(jnp.float32(hidden_size)))
    keys = jax.random.split(key, gru_layers * 4 + 2)
    ki = 0
    for layer in range(gru_layers):
        in_sz = input_size if layer == 0 else hidden_size
        w_ih = jax.random.uniform(keys[ki], (3 * hidden_size, in_sz),
                                  jnp.float32, -bound, bound); ki += 1
        w_hh = jax.random.uniform(keys[ki], (3 * hidden_size, hidden_size),
                                  jnp.float32, -bound, bound); ki += 1
        b_ih = jax.random.uniform(keys[ki], (3 * hidden_size,),
                                  jnp.float32, -bound, bound); ki += 1
        b_hh = jax.random.uniform(keys[ki], (3 * hidden_size,),
                                  jnp.float32, -bound, bound); ki += 1
        params["gru"].append({"w_ih": w_ih, "w_hh": w_hh,
                              "b_ih": b_ih, "b_hh": b_hh})
    params["fc"]["w"] = jax.random.uniform(keys[ki], (output_size, hidden_size),
                                           jnp.float32, -bound, bound); ki += 1
    params["fc"]["b"] = jax.random.uniform(keys[ki], (output_size,),
                                           jnp.float32, -bound, bound)
    return params


def prepare_grunet_params(raw, input_size, output_size, hidden_size, gru_layers):
    """One-time weight padding / transposition into the kernel layout."""
    H = hidden_size
    H_pad = _round_up(H, 128)
    I_pad = _round_up(input_size, 128)
    O_pad = _round_up(output_size, 128)

    layers = []
    for layer, lp in enumerate(raw["gru"]):
        in_dim = input_size if layer == 0 else H
        in_pad = I_pad if layer == 0 else H_pad
        w_ih_t = _gate_pad_weight_t(lp["w_ih"], H, H_pad, in_dim, in_pad)
        w_hh_t = _gate_pad_weight_t(lp["w_hh"], H, H_pad, H, H_pad)
        # fold b_ih + b_hh for r/z, b_in for n into the precomputed gx bias
        b_comb = jnp.concatenate([lp["b_ih"][:2 * H] + lp["b_hh"][:2 * H],
                                  lp["b_ih"][2 * H:3 * H]])
        bgx = _gate_pad_bias(b_comb, H, H_pad)
        bhn = jnp.pad(lp["b_hh"][2 * H:3 * H], (0, H_pad - H))[None, :]
        layers.append({"w_ih": w_ih_t, "w_hh": w_hh_t, "bgx": bgx, "bhn": bhn})

    fc_w = jnp.pad(raw["fc"]["w"].T,
                   ((0, H_pad - H), (0, O_pad - output_size)))
    fc_b = jnp.pad(raw["fc"]["b"], (0, O_pad - output_size))[None, :]

    return {
        "layers": layers, "fc_w": fc_w, "fc_b": fc_b,
        "config": {"h_pad": H_pad, "i_pad": I_pad, "o_pad": O_pad,
                   "num_layers": gru_layers, "hidden_size": H,
                   "input_size": input_size, "output_size": output_size},
    }


# ---------------------------------------------------------------------------
# forward
# ---------------------------------------------------------------------------
def grunet_forward(prepared, x, proj_len):
    """x: (B, T, input_size) batch-first, as in the PyTorch module."""
    B, T, I = x.shape
    cfg = prepared["config"]
    H_pad, I_pad, O_pad = cfg["h_pad"], cfg["i_pad"], cfg["o_pad"]
    L, O = cfg["num_layers"], cfg["output_size"]
    assert proj_len <= T

    TB = _pick_block_b(B)
    B_pad = _round_up(B, TB)

    # time-major, padded to (T, B_pad, I_pad); padded rows/cols are zero
    x_tm = jnp.transpose(x.astype(jnp.float32), (1, 0, 2))
    x_tm = jnp.pad(x_tm, ((0, 0), (0, B_pad - B), (0, I_pad - I)))

    unroll = True if T <= 32 else 4
    kernel = _make_fused_gru_kernel(L, T, TB, H_pad, proj_len, unroll)

    inputs = [x_tm]
    in_specs = [pl.BlockSpec((T, TB, I_pad), lambda b: (0, b, 0))]
    for lp in prepared["layers"]:
        for name in ("w_ih", "w_hh", "bgx", "bhn"):
            a = lp[name]
            inputs.append(a)
            in_specs.append(pl.BlockSpec(a.shape, lambda b: (0, 0)))
    for a in (prepared["fc_w"], prepared["fc_b"]):
        inputs.append(a)
        in_specs.append(pl.BlockSpec(a.shape, lambda b: (0, 0)))

    out_spec = pl.BlockSpec((proj_len, TB, O_pad), lambda b: (0, b, 0))
    out_shape = jax.ShapeDtypeStruct((proj_len, B_pad, O_pad), jnp.float32)

    scratch = [
        pltpu.VMEM((T * TB, 3 * H_pad), jnp.float32),   # precomputed gx
        pltpu.VMEM((T * TB, H_pad), jnp.float32),       # hidden seq ping
        pltpu.VMEM((T * TB, H_pad), jnp.float32),       # hidden seq pong
    ]

    # VMEM budget estimate (double-buffered I/O + weights + scratch)
    est = 2 * (T * TB * I_pad + proj_len * TB * O_pad) * 4
    for lp in prepared["layers"]:
        est += 2 * sum(int(lp[n].size) for n in ("w_ih", "w_hh", "bgx", "bhn")) * 4
    est += 2 * (int(prepared["fc_w"].size) + int(prepared["fc_b"].size)) * 4
    est += (T * TB * 3 * H_pad + 2 * T * TB * H_pad) * 4
    vmem_limit = int(min(max(2 * est, 32 * 2**20), 48 * 2**20))

    y = pl.pallas_call(
        kernel,
        grid=(B_pad // TB,),
        in_specs=in_specs,
        out_specs=out_spec,
        out_shape=out_shape,
        scratch_shapes=scratch,
        compiler_params=pltpu.CompilerParams(
            dimension_semantics=("parallel",),
            vmem_limit_bytes=vmem_limit,
        ),
    )(*inputs)

    y = y[:, :B, :O]                                   # drop padding
    return jnp.transpose(y, (1, 0, 2))                 # (B, proj_len, O)


# ---------------------------------------------------------------------------
# pure-JAX reference (for self-check)
# ---------------------------------------------------------------------------
def grunet_reference(raw, x, proj_len):
    B, T, _ = x.shape
    h_seq = x.astype(jnp.float32)
    for lp in raw["gru"]:
        H = lp["w_hh"].shape[1]
        h = jnp.zeros((B, H), jnp.float32)
        outs = []
        for t in range(T):
            x_t = h_seq[:, t, :]
            gx = x_t @ lp["w_ih"].T + lp["b_ih"]
            gh = h @ lp["w_hh"].T + lp["b_hh"]
            r = jax.nn.sigmoid(gx[:, :H] + gh[:, :H])
            z = jax.nn.sigmoid(gx[:, H:2 * H] + gh[:, H:2 * H])
            n = jnp.tanh(gx[:, 2 * H:] + r * gh[:, 2 * H:])
            h = (1.0 - z) * n + z * h
            outs.append(h)
        h_seq = jnp.stack(outs, axis=1)
    out = h_seq[:, -proj_len:, :]
    return out @ raw["fc"]["w"].T + raw["fc"]["b"]


# ---------------------------------------------------------------------------
if __name__ == "__main__":
    batch = 2
    seq = 8
    input_size = 4
    hidden_size = 32
    output_size = 3
    gru_layers = 2
    proj_len = 4

    key = jax.random.PRNGKey(0)
    k_param, k_x = jax.random.split(key)
    raw = init_grunet_params(k_param, input_size, output_size,
                             hidden_size, gru_layers)
    prepared = prepare_grunet_params(raw, input_size, output_size,
                                     hidden_size, gru_layers)
    x = jax.random.normal(k_x, (batch, seq, input_size), jnp.float32)

    y = grunet_forward(prepared, x, proj_len)
    y = jax.block_until_ready(y)
    assert y.shape == (batch, proj_len, output_size)

    # loose tolerance: MXU bf16-pass precision differs from the XLA reference
    y_ref = grunet_reference(raw, x, proj_len)
    max_err = float(jnp.max(jnp.abs(y - y_ref)))
    assert max_err < 5e-2, f"mismatch vs reference: max abs err {max_err}"

    print("KERNEL_OK")
</pallas_src>

<mosaic_0001>
module attributes {stable_mosaic.version = 11 : i64} {
  func.func @kernel(%arg0: i32, %arg1: memref<8x8x128xf32, #tpu.memory_space<vmem>>, %arg2: memref<128x384xf32, #tpu.memory_space<vmem>>, %arg3: memref<128x384xf32, #tpu.memory_space<vmem>>, %arg4: memref<1x384xf32, #tpu.memory_space<vmem>>, %arg5: memref<1x128xf32, #tpu.memory_space<vmem>>, %arg6: memref<128x384xf32, #tpu.memory_space<vmem>>, %arg7: memref<128x384xf32, #tpu.memory_space<vmem>>, %arg8: memref<1x384xf32, #tpu.memory_space<vmem>>, %arg9: memref<1x128xf32, #tpu.memory_space<vmem>>, %arg10: memref<128x128xf32, #tpu.memory_space<vmem>>, %arg11: memref<1x128xf32, #tpu.memory_space<vmem>>, %arg12: memref<4x8x128xf32, #tpu.memory_space<vmem>>, %arg13: memref<64x384xf32, #tpu.memory_space<vmem>>, %arg14: memref<64x128xf32, #tpu.memory_space<vmem>>, %arg15: memref<64x128xf32, #tpu.memory_space<vmem>>) attributes {dimension_semantics = [#tpu.dimension_semantics<parallel>], iteration_bounds = array<i64: 1>, scalar_prefetch = 0 : i64, scratch_operands = 3 : i64, tpu.core_type = #tpu.core_type<tc>, window_params = [{transform_indices = @transform_0, window_bounds = array<i64: 8, 8, 128>}, {pipeline_mode = #tpu.pipeline_mode<synchronous>, transform_indices = @transform_1, window_bounds = array<i64: 128, 384>}, {pipeline_mode = #tpu.pipeline_mode<synchronous>, transform_indices = @transform_2, window_bounds = array<i64: 128, 384>}, {pipeline_mode = #tpu.pipeline_mode<synchronous>, transform_indices = @transform_3, window_bounds = array<i64: 1, 384>}, {pipeline_mode = #tpu.pipeline_mode<synchronous>, transform_indices = @transform_4, window_bounds = array<i64: 1, 128>}, {pipeline_mode = #tpu.pipeline_mode<synchronous>, transform_indices = @transform_5, window_bounds = array<i64: 128, 384>}, {pipeline_mode = #tpu.pipeline_mode<synchronous>, transform_indices = @transform_6, window_bounds = array<i64: 128, 384>}, {pipeline_mode = #tpu.pipeline_mode<synchronous>, transform_indices = @transform_7, window_bounds = array<i64: 1, 384>}, {pipeline_mode = #tpu.pipeline_mode<synchronous>, transform_indices = @transform_8, window_bounds = array<i64: 1, 128>}, {pipeline_mode = #tpu.pipeline_mode<synchronous>, transform_indices = @transform_9, window_bounds = array<i64: 128, 128>}, {pipeline_mode = #tpu.pipeline_mode<synchronous>, transform_indices = @transform_10, window_bounds = array<i64: 1, 128>}, {transform_indices = @transform_11, window_bounds = array<i64: 4, 8, 128>}]} {
    %c0 = arith.constant 0 : index
    %c0_0 = arith.constant 0 : index
    %c0_1 = arith.constant 0 : index
    %0 = vector.load %arg1[%c0, %c0_0, %c0_1] : memref<8x8x128xf32, #tpu.memory_space<vmem>>, vector<8x8x128xf32>
    %1 = vector.shape_cast %0 : vector<8x8x128xf32> to vector<64x128xf32>
    %c0_2 = arith.constant 0 : index
    %c0_3 = arith.constant 0 : index
    %2 = vector.load %arg2[%c0_2, %c0_3] : memref<128x384xf32, #tpu.memory_space<vmem>>, vector<128x384xf32>
    %cst = arith.constant dense<0.000000e+00> : vector<64x384xf32>
    %3 = tpu.matmul %1, %2, %cst {dimension_numbers = #tpu.dot_dimension_numbers<[1], [0], [0], [1], [0, 0, 1, 1], [], []>} : vector<64x128xf32>, vector<128x384xf32>, vector<64x384xf32> -> vector<64x384xf32>
    %c0_4 = arith.constant 0 : index
    %c0_5 = arith.constant 0 : index
    %4 = vector.load %arg4[%c0_4, %c0_5] : memref<1x384xf32, #tpu.memory_space<vmem>>, vector<1x384xf32>
    %5 = vector.broadcast %4 : vector<1x384xf32> to vector<64x384xf32>
    %6 = arith.addf %3, %5 : vector<64x384xf32>
    %c0_6 = arith.constant 0 : index
    %c0_7 = arith.constant 0 : index
    %7 = vector.load %arg13[%c0_6, %c0_7] : memref<64x384xf32, #tpu.memory_space<vmem>>, vector<64x384xf32>
    tpu.vector_store %arg13[%c0_6, %c0_7], %6 {strides = array<i32>} : memref<64x384xf32, #tpu.memory_space<vmem>>, vector<64x384xf32>,
    %c0_8 = arith.constant 0 : index
    %c0_9 = arith.constant 0 : index
    %8 = vector.load %arg3[%c0_8, %c0_9] : memref<128x384xf32, #tpu.memory_space<vmem>>, vector<128x384xf32>
    %c0_10 = arith.constant 0 : index
    %c0_11 = arith.constant 0 : index
    %9 = vector.load %arg5[%c0_10, %c0_11] : memref<1x128xf32, #tpu.memory_space<vmem>>, vector<1x128xf32>
    %cst_12 = arith.constant 0.000000e+00 : f32
    %10 = vector.broadcast %cst_12 : f32 to vector<8x128xf32>
    %c0_i32 = arith.constant 0 : i32
    %c8_i32 = arith.constant 8 : i32
    %11 = arith.muli %c0_i32, %c8_i32 : i32
    %12 = tpu.assume_multiple %11, 8 : i32
    %13 = arith.index_cast %12 : i32 to index
    %c0_13 = arith.constant 0 : index
    %14 = vector.load %arg13[%13, %c0_13] : memref<64x384xf32, #tpu.memory_space<vmem>>, vector<8x384xf32>
    %cst_14 = arith.constant dense<0.000000e+00> : vector<8x384xf32>
    %15 = tpu.matmul %10, %8, %cst_14 {dimension_numbers = #tpu.dot_dimension_numbers<[1], [0], [0], [1], [0, 0, 1, 1], [], []>} : vector<8x128xf32>, vector<128x384xf32>, vector<8x384xf32> -> vector<8x384xf32>
    %16 = vector.extract_strided_slice %14 {offsets = [0, 0], sizes = [8, 128], strides = [1, 1]} : vector<8x384xf32> to vector<8x128xf32>
    %17 = vector.extract_strided_slice %15 {offsets = [0, 0], sizes = [8, 128], strides = [1, 1]} : vector<8x384xf32> to vector<8x128xf32>
    %18 = arith.addf %16, %17 : vector<8x128xf32>
    %19 = arith.negf %18 : vector<8x128xf32>
    %20 = math.exp %19 : vector<8x128xf32>
    %cst_15 = arith.constant 1.000000e+00 : f32
    %21 = vector.broadcast %cst_15 : f32 to vector<8x128xf32>
    %22 = arith.addf %21, %20 : vector<8x128xf32>
    %23 = arith.divf %21, %22 : vector<8x128xf32>
    %24 = vector.extract_strided_slice %14 {offsets = [0, 128], sizes = [8, 128], strides = [1, 1]} : vector<8x384xf32> to vector<8x128xf32>
    %25 = vector.extract_strided_slice %15 {offsets = [0, 128], sizes = [8, 128], strides = [1, 1]} : vector<8x384xf32> to vector<8x128xf32>
    %26 = arith.addf %24, %25 : vector<8x128xf32>
    %27 = arith.negf %26 : vector<8x128xf32>
    %28 = math.exp %27 : vector<8x128xf32>
    %cst_16 = arith.constant 1.000000e+00 : f32
    %29 = vector.broadcast %cst_16 : f32 to vector<8x128xf32>
    %30 = arith.addf %29, %28 : vector<8x128xf32>
    %31 = arith.divf %29, %30 : vector<8x128xf32>
    %32 = vector.extract_strided_slice %14 {offsets = [0, 256], sizes = [8, 128], strides = [1, 1]} : vector<8x384xf32> to vector<8x128xf32>
    %33 = vector.extract_strided_slice %15 {offsets = [0, 256], sizes = [8, 128], strides = [1, 1]} : vector<8x384xf32> to vector<8x128xf32>
    %34 = vector.broadcast %9 : vector<1x128xf32> to vector<8x128xf32>
    %35 = arith.addf %33, %34 : vector<8x128xf32>
    %36 = arith.mulf %23, %35 : vector<8x128xf32>
    %37 = arith.addf %32, %36 : vector<8x128xf32>
    %38 = math.tanh %37 : vector<8x128xf32>
    %cst_17 = arith.constant 1.000000e+00 : f32
    %39 = vector.broadcast %cst_17 : f32 to vector<8x128xf32>
    %40 = arith.subf %39, %31 : vector<8x128xf32>
    %41 = arith.mulf %40, %38 : vector<8x128xf32>
    %42 = arith.mulf %31, %10 : vector<8x128xf32>
    %43 = arith.addf %41, %42 : vector<8x128xf32>
    %44 = arith.index_cast %12 : i32 to index
    %c0_18 = arith.constant 0 : index
    %45 = vector.load %arg14[%44, %c0_18] : memref<64x128xf32, #tpu.memory_space<vmem>>, vector<8x128xf32>
    tpu.vector_store %arg14[%44, %c0_18], %43 {strides = array<i32>} : memref<64x128xf32, #tpu.memory_space<vmem>>, vector<8x128xf32>,
    %c1_i32 = arith.constant 1 : i32
    %c8_i32_19 = arith.constant 8 : i32
    %46 = arith.muli %c1_i32, %c8_i32_19 : i32
    %47 = tpu.assume_multiple %46, 8 : i32
    %48 = arith.index_cast %47 : i32 to index
    %c0_20 = arith.constant 0 : index
    %49 = vector.load %arg13[%48, %c0_20] : memref<64x384xf32, #tpu.memory_space<vmem>>, vector<8x384xf32>
    %cst_21 = arith.constant dense<0.000000e+00> : vector<8x384xf32>
    %50 = tpu.matmul %43, %8, %cst_21 {dimension_numbers = #tpu.dot_dimension_numbers<[1], [0], [0], [1], [0, 0, 1, 1], [], []>} : vector<8x128xf32>, vector<128x384xf32>, vector<8x384xf32> -> vector<8x384xf32>
    %51 = vector.extract_strided_slice %49 {offsets = [0, 0], sizes = [8, 128], strides = [1, 1]} : vector<8x384xf32> to vector<8x128xf32>
    %52 = vector.extract_strided_slice %50 {offsets = [0, 0], sizes = [8, 128], strides = [1, 1]} : vector<8x384xf32> to vector<8x128xf32>
    %53 = arith.addf %51, %52 : vector<8x128xf32>
    %54 = arith.negf %53 : vector<8x128xf32>
    %55 = math.exp %54 : vector<8x128xf32>
    %cst_22 = arith.constant 1.000000e+00 : f32
    %56 = vector.broadcast %cst_22 : f32 to vector<8x128xf32>
    %57 = arith.addf %56, %55 : vector<8x128xf32>
    %58 = arith.divf %56, %57 : vector<8x128xf32>
    %59 = vector.extract_strided_slice %49 {offsets = [0, 128], sizes = [8, 128], strides = [1, 1]} : vector<8x384xf32> to vector<8x128xf32>
    %60 = vector.extract_strided_slice %50 {offsets = [0, 128], sizes = [8, 128], strides = [1, 1]} : vector<8x384xf32> to vector<8x128xf32>
    %61 = arith.addf %59, %60 : vector<8x128xf32>
    %62 = arith.negf %61 : vector<8x128xf32>
    %63 = math.exp %62 : vector<8x128xf32>
    %cst_23 = arith.constant 1.000000e+00 : f32
    %64 = vector.broadcast %cst_23 : f32 to vector<8x128xf32>
    %65 = arith.addf %64, %63 : vector<8x128xf32>
    %66 = arith.divf %64, %65 : vector<8x128xf32>
    %67 = vector.extract_strided_slice %49 {offsets = [0, 256], sizes = [8, 128], strides = [1, 1]} : vector<8x384xf32> to vector<8x128xf32>
    %68 = vector.extract_strided_slice %50 {offsets = [0, 256], sizes = [8, 128], strides = [1, 1]} : vector<8x384xf32> to vector<8x128xf32>
    %69 = vector.broadcast %9 : vector<1x128xf32> to vector<8x128xf32>
    %70 = arith.addf %68, %69 : vector<8x128xf32>
    %71 = arith.mulf %58, %70 : vector<8x128xf32>
    %72 = arith.addf %67, %71 : vector<8x128xf32>
    %73 = math.tanh %72 : vector<8x128xf32>
    %cst_24 = arith.constant 1.000000e+00 : f32
    %74 = vector.broadcast %cst_24 : f32 to vector<8x128xf32>
    %75 = arith.subf %74, %66 : vector<8x128xf32>
    %76 = arith.mulf %75, %73 : vector<8x128xf32>
    %77 = arith.mulf %66, %43 : vector<8x128xf32>
    %78 = arith.addf %76, %77 : vector<8x128xf32>
    %79 = arith.index_cast %47 : i32 to index
    %c0_25 = arith.constant 0 : index
    %80 = vector.load %arg14[%79, %c0_25] : memref<64x128xf32, #tpu.memory_space<vmem>>, vector<8x128xf32>
    tpu.vector_store %arg14[%79, %c0_25], %78 {strides = array<i32>} : memref<64x128xf32, #tpu.memory_space<vmem>>, vector<8x128xf32>,
    %c2_i32 = arith.constant 2 : i32
    %c8_i32_26 = arith.constant 8 : i32
    %81 = arith.muli %c2_i32, %c8_i32_26 : i32
    %82 = tpu.assume_multiple %81, 8 : i32
    %83 = arith.index_cast %82 : i32 to index
    %c0_27 = arith.constant 0 : index
    %84 = vector.load %arg13[%83, %c0_27] : memref<64x384xf32, #tpu.memory_space<vmem>>, vector<8x384xf32>
    %cst_28 = arith.constant dense<0.000000e+00> : vector<8x384xf32>
    %85 = tpu.matmul %78, %8, %cst_28 {dimension_numbers = #tpu.dot_dimension_numbers<[1], [0], [0], [1], [0, 0, 1, 1], [], []>} : vector<8x128xf32>, vector<128x384xf32>, vector<8x384xf32> -> vector<8x384xf32>
    %86 = vector.extract_strided_slice %84 {offsets = [0, 0], sizes = [8, 128], strides = [1, 1]} : vector<8x384xf32> to vector<8x128xf32>
    %87 = vector.extract_strided_slice %85 {offsets = [0, 0], sizes = [8, 128], strides = [1, 1]} : vector<8x384xf32> to vector<8x128xf32>
    %88 = arith.addf %86, %87 : vector<8x128xf32>
    %89 = arith.negf %88 : vector<8x128xf32>
    %90 = math.exp %89 : vector<8x128xf32>
    %cst_29 = arith.constant 1.000000e+00 : f32
    %91 = vector.broadcast %cst_29 : f32 to vector<8x128xf32>
    %92 = arith.addf %91, %90 : vector<8x128xf32>
    %93 = arith.divf %91, %92 : vector<8x128xf32>
    %94 = vector.extract_strided_slice %84 {offsets = [0, 128], sizes = [8, 128], strides = [1, 1]} : vector<8x384xf32> to vector<8x128xf32>
    %95 = vector.extract_strided_slice %85 {offsets = [0, 128], sizes = [8, 128], strides = [1, 1]} : vector<8x384xf32> to vector<8x128xf32>
    %96 = arith.addf %94, %95 : vector<8x128xf32>
    %97 = arith.negf %96 : vector<8x128xf32>
    %98 = math.exp %97 : vector<8x128xf32>
    %cst_30 = arith.constant 1.000000e+00 : f32
    %99 = vector.broadcast %cst_30 : f32 to vector<8x128xf32>
    %100 = arith.addf %99, %98 : vector<8x128xf32>
    %101 = arith.divf %99, %100 : vector<8x128xf32>
    %102 = vector.extract_strided_slice %84 {offsets = [0, 256], sizes = [8, 128], strides = [1, 1]} : vector<8x384xf32> to vector<8x128xf32>
    %103 = vector.extract_strided_slice %85 {offsets = [0, 256], sizes = [8, 128], strides = [1, 1]} : vector<8x384xf32> to vector<8x128xf32>
    %104 = vector.broadcast %9 : vector<1x128xf32> to vector<8x128xf32>
    %105 = arith.addf %103, %104 : vector<8x128xf32>
    %106 = arith.mulf %93, %105 : vector<8x128xf32>
    %107 = arith.addf %102, %106 : vector<8x128xf32>
    %108 = math.tanh %107 : vector<8x128xf32>
    %cst_31 = arith.constant 1.000000e+00 : f32
    %109 = vector.broadcast %cst_31 : f32 to vector<8x128xf32>
    %110 = arith.subf %109, %101 : vector<8x128xf32>
    %111 = arith.mulf %110, %108 : vector<8x128xf32>
    %112 = arith.mulf %101, %78 : vector<8x128xf32>
    %113 = arith.addf %111, %112 : vector<8x128xf32>
    %114 = arith.index_cast %82 : i32 to index
    %c0_32 = arith.constant 0 : index
    %115 = vector.load %arg14[%114, %c0_32] : memref<64x128xf32, #tpu.memory_space<vmem>>, vector<8x128xf32>
    tpu.vector_store %arg14[%114, %c0_32], %113 {strides = array<i32>} : memref<64x128xf32, #tpu.memory_space<vmem>>, vector<8x128xf32>,
    %c3_i32 = arith.constant 3 : i32
    %c8_i32_33 = arith.constant 8 : i32
    %116 = arith.muli %c3_i32, %c8_i32_33 : i32
    %117 = tpu.assume_multiple %116, 8 : i32
    %118 = arith.index_cast %117 : i32 to index
    %c0_34 = arith.constant 0 : index
    %119 = vector.load %arg13[%118, %c0_34] : memref<64x384xf32, #tpu.memory_space<vmem>>, vector<8x384xf32>
    %cst_35 = arith.constant dense<0.000000e+00> : vector<8x384xf32>
    %120 = tpu.matmul %113, %8, %cst_35 {dimension_numbers = #tpu.dot_dimension_numbers<[1], [0], [0], [1], [0, 0, 1, 1], [], []>} : vector<8x128xf32>, vector<128x384xf32>, vector<8x384xf32> -> vector<8x384xf32>
    %121 = vector.extract_strided_slice %119 {offsets = [0, 0], sizes = [8, 128], strides = [1, 1]} : vector<8x384xf32> to vector<8x128xf32>
    %122 = vector.extract_strided_slice %120 {offsets = [0, 0], sizes = [8, 128], strides = [1, 1]} : vector<8x384xf32> to vector<8x128xf32>
    %123 = arith.addf %121, %122 : vector<8x128xf32>
    %124 = arith.negf %123 : vector<8x128xf32>
    %125 = math.exp %124 : vector<8x128xf32>
    %cst_36 = arith.constant 1.000000e+00 : f32
    %126 = vector.broadcast %cst_36 : f32 to vector<8x128xf32>
    %127 = arith.addf %126, %125 : vector<8x128xf32>
    %128 = arith.divf %126, %127 : vector<8x128xf32>
    %129 = vector.extract_strided_slice %119 {offsets = [0, 128], sizes = [8, 128], strides = [1, 1]} : vector<8x384xf32> to vector<8x128xf32>
    %130 = vector.extract_strided_slice %120 {offsets = [0, 128], sizes = [8, 128], strides = [1, 1]} : vector<8x384xf32> to vector<8x128xf32>
    %131 = arith.addf %129, %130 : vector<8x128xf32>
    %132 = arith.negf %131 : vector<8x128xf32>
    %133 = math.exp %132 : vector<8x128xf32>
    %cst_37 = arith.constant 1.000000e+00 : f32
    %134 = vector.broadcast %cst_37 : f32 to vector<8x128xf32>
    %135 = arith.addf %134, %133 : vector<8x128xf32>
    %136 = arith.divf %134, %135 : vector<8x128xf32>
    %137 = vector.extract_strided_slice %119 {offsets = [0, 256], sizes = [8, 128], strides = [1, 1]} : vector<8x384xf32> to vector<8x128xf32>
    %138 = vector.extract_strided_slice %120 {offsets = [0, 256], sizes = [8, 128], strides = [1, 1]} : vector<8x384xf32> to vector<8x128xf32>
    %139 = vector.broadcast %9 : vector<1x128xf32> to vector<8x128xf32>
    %140 = arith.addf %138, %139 : vector<8x128xf32>
    %141 = arith.mulf %128, %140 : vector<8x128xf32>
    %142 = arith.addf %137, %141 : vector<8x128xf32>
    %143 = math.tanh %142 : vector<8x128xf32>
    %cst_38 = arith.constant 1.000000e+00 : f32
    %144 = vector.broadcast %cst_38 : f32 to vector<8x128xf32>
    %145 = arith.subf %144, %136 : vector<8x128xf32>
    %146 = arith.mulf %145, %143 : vector<8x128xf32>
    %147 = arith.mulf %136, %113 : vector<8x128xf32>
    %148 = arith.addf %146, %147 : vector<8x128xf32>
    %149 = arith.index_cast %117 : i32 to index
    %c0_39 = arith.constant 0 : index
    %150 = vector.load %arg14[%149, %c0_39] : memref<64x128xf32, #tpu.memory_space<vmem>>, vector<8x128xf32>
    tpu.vector_store %arg14[%149, %c0_39], %148 {strides = array<i32>} : memref<64x128xf32, #tpu.memory_space<vmem>>, vector<8x128xf32>,
    %c4_i32 = arith.constant 4 : i32
    %c8_i32_40 = arith.constant 8 : i32
    %151 = arith.muli %c4_i32, %c8_i32_40 : i32
    %152 = tpu.assume_multiple %151, 8 : i32
    %153 = arith.index_cast %152 : i32 to index
    %c0_41 = arith.constant 0 : index
    %154 = vector.load %arg13[%153, %c0_41] : memref<64x384xf32, #tpu.memory_space<vmem>>, vector<8x384xf32>
    %cst_42 = arith.constant dense<0.000000e+00> : vector<8x384xf32>
    %155 = tpu.matmul %148, %8, %cst_42 {dimension_numbers = #tpu.dot_dimension_numbers<[1], [0], [0], [1], [0, 0, 1, 1], [], []>} : vector<8x128xf32>, vector<128x384xf32>, vector<8x384xf32> -> vector<8x384xf32>
    %156 = vector.extract_strided_slice %154 {offsets = [0, 0], sizes = [8, 128], strides = [1, 1]} : vector<8x384xf32> to vector<8x128xf32>
    %157 = vector.extract_strided_slice %155 {offsets = [0, 0], sizes = [8, 128], strides = [1, 1]} : vector<8x384xf32> to vector<8x128xf32>
    %158 = arith.addf %156, %157 : vector<8x128xf32>
    %159 = arith.negf %158 : vector<8x128xf32>
    %160 = math.exp %159 : vector<8x128xf32>
    %cst_43 = arith.constant 1.000000e+00 : f32
    %161 = vector.broadcast %cst_43 : f32 to vector<8x128xf32>
    %162 = arith.addf %161, %160 : vector<8x128xf32>
    %163 = arith.divf %161, %162 : vector<8x128xf32>
    %164 = vector.extract_strided_slice %154 {offsets = [0, 128], sizes = [8, 128], strides = [1, 1]} : vector<8x384xf32> to vector<8x128xf32>
    %165 = vector.extract_strided_slice %155 {offsets = [0, 128], sizes = [8, 128], strides = [1, 1]} : vector<8x384xf32> to vector<8x128xf32>
    %166 = arith.addf %164, %165 : vector<8x128xf32>
    %167 = arith.negf %166 : vector<8x128xf32>
    %168 = math.exp %167 : vector<8x128xf32>
    %cst_44 = arith.constant 1.000000e+00 : f32
    %169 = vector.broadcast %cst_44 : f32 to vector<8x128xf32>
    %170 = arith.addf %169, %168 : vector<8x128xf32>
    %171 = arith.divf %169, %170 : vector<8x128xf32>
    %172 = vector.extract_strided_slice %154 {offsets = [0, 256], sizes = [8, 128], strides = [1, 1]} : vector<8x384xf32> to vector<8x128xf32>
    %173 = vector.extract_strided_slice %155 {offsets = [0, 256], sizes = [8, 128], strides = [1, 1]} : vector<8x384xf32> to vector<8x128xf32>
    %174 = vector.broadcast %9 : vector<1x128xf32> to vector<8x128xf32>
    %175 = arith.addf %173, %174 : vector<8x128xf32>
    %176 = arith.mulf %163, %175 : vector<8x128xf32>
    %177 = arith.addf %172, %176 : vector<8x128xf32>
    %178 = math.tanh %177 : vector<8x128xf32>
    %cst_45 = arith.constant 1.000000e+00 : f32
    %179 = vector.broadcast %cst_45 : f32 to vector<8x128xf32>
    %180 = arith.subf %179, %171 : vector<8x128xf32>
    %181 = arith.mulf %180, %178 : vector<8x128xf32>
    %182 = arith.mulf %171, %148 : vector<8x128xf32>
    %183 = arith.addf %181, %182 : vector<8x128xf32>
    %184 = arith.index_cast %152 : i32 to index
    %c0_46 = arith.constant 0 : index
    %185 = vector.load %arg14[%184, %c0_46] : memref<64x128xf32, #tpu.memory_space<vmem>>, vector<8x128xf32>
    tpu.vector_store %arg14[%184, %c0_46], %183 {strides = array<i32>} : memref<64x128xf32, #tpu.memory_space<vmem>>, vector<8x128xf32>,
    %c5_i32 = arith.constant 5 : i32
    %c8_i32_47 = arith.constant 8 : i32
    %186 = arith.muli %c5_i32, %c8_i32_47 : i32
    %187 = tpu.assume_multiple %186, 8 : i32
    %188 = arith.index_cast %187 : i32 to index
    %c0_48 = arith.constant 0 : index
    %189 = vector.load %arg13[%188, %c0_48] : memref<64x384xf32, #tpu.memory_space<vmem>>, vector<8x384xf32>
    %cst_49 = arith.constant dense<0.000000e+00> : vector<8x384xf32>
    %190 = tpu.matmul %183, %8, %cst_49 {dimension_numbers = #tpu.dot_dimension_numbers<[1], [0], [0], [1], [0, 0, 1, 1], [], []>} : vector<8x128xf32>, vector<128x384xf32>, vector<8x384xf32> -> vector<8x384xf32>
    %191 = vector.extract_strided_slice %189 {offsets = [0, 0], sizes = [8, 128], strides = [1, 1]} : vector<8x384xf32> to vector<8x128xf32>
    %192 = vector.extract_strided_slice %190 {offsets = [0, 0], sizes = [8, 128], strides = [1, 1]} : vector<8x384xf32> to vector<8x128xf32>
    %193 = arith.addf %191, %192 : vector<8x128xf32>
    %194 = arith.negf %193 : vector<8x128xf32>
    %195 = math.exp %194 : vector<8x128xf32>
    %cst_50 = arith.constant 1.000000e+00 : f32
    %196 = vector.broadcast %cst_50 : f32 to vector<8x128xf32>
    %197 = arith.addf %196, %195 : vector<8x128xf32>
    %198 = arith.divf %196, %197 : vector<8x128xf32>
    %199 = vector.extract_strided_slice %189 {offsets = [0, 128], sizes = [8, 128], strides = [1, 1]} : vector<8x384xf32> to vector<8x128xf32>
    %200 = vector.extract_strided_slice %190 {offsets = [0, 128], sizes = [8, 128], strides = [1, 1]} : vector<8x384xf32> to vector<8x128xf32>
    %201 = arith.addf %199, %200 : vector<8x128xf32>
    %202 = arith.negf %201 : vector<8x128xf32>
    %203 = math.exp %202 : vector<8x128xf32>
    %cst_51 = arith.constant 1.000000e+00 : f32
    %204 = vector.broadcast %cst_51 : f32 to vector<8x128xf32>
    %205 = arith.addf %204, %203 : vector<8x128xf32>
    %206 = arith.divf %204, %205 : vector<8x128xf32>
    %207 = vector.extract_strided_slice %189 {offsets = [0, 256], sizes = [8, 128], strides = [1, 1]} : vector<8x384xf32> to vector<8x128xf32>
    %208 = vector.extract_strided_slice %190 {offsets = [0, 256], sizes = [8, 128], strides = [1, 1]} : vector<8x384xf32> to vector<8x128xf32>
    %209 = vector.broadcast %9 : vector<1x128xf32> to vector<8x128xf32>
    %210 = arith.addf %208, %209 : vector<8x128xf32>
    %211 = arith.mulf %198, %210 : vector<8x128xf32>
    %212 = arith.addf %207, %211 : vector<8x128xf32>
    %213 = math.tanh %212 : vector<8x128xf32>
    %cst_52 = arith.constant 1.000000e+00 : f32
    %214 = vector.broadcast %cst_52 : f32 to vector<8x128xf32>
    %215 = arith.subf %214, %206 : vector<8x128xf32>
    %216 = arith.mulf %215, %213 : vector<8x128xf32>
    %217 = arith.mulf %206, %183 : vector<8x128xf32>
    %218 = arith.addf %216, %217 : vector<8x128xf32>
    %219 = arith.index_cast %187 : i32 to index
    %c0_53 = arith.constant 0 : index
    %220 = vector.load %arg14[%219, %c0_53] : memref<64x128xf32, #tpu.memory_space<vmem>>, vector<8x128xf32>
    tpu.vector_store %arg14[%219, %c0_53], %218 {strides = array<i32>} : memref<64x128xf32, #tpu.memory_space<vmem>>, vector<8x128xf32>,
    %c6_i32 = arith.constant 6 : i32
    %c8_i32_54 = arith.constant 8 : i32
    %221 = arith.muli %c6_i32, %c8_i32_54 : i32
    %222 = tpu.assume_multiple %221, 8 : i32
    %223 = arith.index_cast %222 : i32 to index
    %c0_55 = arith.constant 0 : index
    %224 = vector.load %arg13[%223, %c0_55] : memref<64x384xf32, #tpu.memory_space<vmem>>, vector<8x384xf32>
    %cst_56 = arith.constant dense<0.000000e+00> : vector<8x384xf32>
    %225 = tpu.matmul %218, %8, %cst_56 {dimension_numbers = #tpu.dot_dimension_numbers<[1], [0], [0], [1], [0, 0, 1, 1], [], []>} : vector<8x128xf32>, vector<128x384xf32>, vector<8x384xf32> -> vector<8x384xf32>
    %226 = vector.extract_strided_slice %224 {offsets = [0, 0], sizes = [8, 128], strides = [1, 1]} : vector<8x384xf32> to vector<8x128xf32>
    %227 = vector.extract_strided_slice %225 {offsets = [0, 0], sizes = [8, 128], strides = [1, 1]} : vector<8x384xf32> to vector<8x128xf32>
    %228 = arith.addf %226, %227 : vector<8x128xf32>
    %229 = arith.negf %228 : vector<8x128xf32>
    %230 = math.exp %229 : vector<8x128xf32>
    %cst_57 = arith.constant 1.000000e+00 : f32
    %231 = vector.broadcast %cst_57 : f32 to vector<8x128xf32>
    %232 = arith.addf %231, %230 : vector<8x128xf32>
    %233 = arith.divf %231, %232 : vector<8x128xf32>
    %234 = vector.extract_strided_slice %224 {offsets = [0, 128], sizes = [8, 128], strides = [1, 1]} : vector<8x384xf32> to vector<8x128xf32>
    %235 = vector.extract_strided_slice %225 {offsets = [0, 128], sizes = [8, 128], strides = [1, 1]} : vector<8x384xf32> to vector<8x128xf32>
    %236 = arith.addf %234, %235 : vector<8x128xf32>
    %237 = arith.negf %236 : vector<8x128xf32>
    %238 = math.exp %237 : vector<8x128xf32>
    %cst_58 = arith.constant 1.000000e+00 : f32
    %239 = vector.broadcast %cst_58 : f32 to vector<8x128xf32>
    %240 = arith.addf %239, %238 : vector<8x128xf32>
    %241 = arith.divf %239, %240 : vector<8x128xf32>
    %242 = vector.extract_strided_slice %224 {offsets = [0, 256], sizes = [8, 128], strides = [1, 1]} : vector<8x384xf32> to vector<8x128xf32>
    %243 = vector.extract_strided_slice %225 {offsets = [0, 256], sizes = [8, 128], strides = [1, 1]} : vector<8x384xf32> to vector<8x128xf32>
    %244 = vector.broadcast %9 : vector<1x128xf32> to vector<8x128xf32>
    %245 = arith.addf %243, %244 : vector<8x128xf32>
    %246 = arith.mulf %233, %245 : vector<8x128xf32>
    %247 = arith.addf %242, %246 : vector<8x128xf32>
    %248 = math.tanh %247 : vector<8x128xf32>
    %cst_59 = arith.constant 1.000000e+00 : f32
    %249 = vector.broadcast %cst_59 : f32 to vector<8x128xf32>
    %250 = arith.subf %249, %241 : vector<8x128xf32>
    %251 = arith.mulf %250, %248 : vector<8x128xf32>
    %252 = arith.mulf %241, %218 : vector<8x128xf32>
    %253 = arith.addf %251, %252 : vector<8x128xf32>
    %254 = arith.index_cast %222 : i32 to index
    %c0_60 = arith.constant 0 : index
    %255 = vector.load %arg14[%254, %c0_60] : memref<64x128xf32, #tpu.memory_space<vmem>>, vector<8x128xf32>
    tpu.vector_store %arg14[%254, %c0_60], %253 {strides = array<i32>} : memref<64x128xf32, #tpu.memory_space<vmem>>, vector<8x128xf32>,
    %c7_i32 = arith.constant 7 : i32
    %c8_i32_61 = arith.constant 8 : i32
    %256 = arith.muli %c7_i32, %c8_i32_61 : i32
    %257 = tpu.assume_multiple %256, 8 : i32
    %258 = arith.index_cast %257 : i32 to index
    %c0_62 = arith.constant 0 : index
    %259 = vector.load %arg13[%258, %c0_62] : memref<64x384xf32, #tpu.memory_space<vmem>>, vector<8x384xf32>
    %cst_63 = arith.constant dense<0.000000e+00> : vector<8x384xf32>
    %260 = tpu.matmul %253, %8, %cst_63 {dimension_numbers = #tpu.dot_dimension_numbers<[1], [0], [0], [1], [0, 0, 1, 1], [], []>} : vector<8x128xf32>, vector<128x384xf32>, vector<8x384xf32> -> vector<8x384xf32>
    %261 = vector.extract_strided_slice %259 {offsets = [0, 0], sizes = [8, 128], strides = [1, 1]} : vector<8x384xf32> to vector<8x128xf32>
    %262 = vector.extract_strided_slice %260 {offsets = [0, 0], sizes = [8, 128], strides = [1, 1]} : vector<8x384xf32> to vector<8x128xf32>
    %263 = arith.addf %261, %262 : vector<8x128xf32>
    %264 = arith.negf %263 : vector<8x128xf32>
    %265 = math.exp %264 : vector<8x128xf32>
    %cst_64 = arith.constant 1.000000e+00 : f32
    %266 = vector.broadcast %cst_64 : f32 to vector<8x128xf32>
    %267 = arith.addf %266, %265 : vector<8x128xf32>
    %268 = arith.divf %266, %267 : vector<8x128xf32>
    %269 = vector.extract_strided_slice %259 {offsets = [0, 128], sizes = [8, 128], strides = [1, 1]} : vector<8x384xf32> to vector<8x128xf32>
    %270 = vector.extract_strided_slice %260 {offsets = [0, 128], sizes = [8, 128], strides = [1, 1]} : vector<8x384xf32> to vector<8x128xf32>
    %271 = arith.addf %269, %270 : vector<8x128xf32>
    %272 = arith.negf %271 : vector<8x128xf32>
    %273 = math.exp %272 : vector<8x128xf32>
    %cst_65 = arith.constant 1.000000e+00 : f32
    %274 = vector.broadcast %cst_65 : f32 to vector<8x128xf32>
    %275 = arith.addf %274, %273 : vector<8x128xf32>
    %276 = arith.divf %274, %275 : vector<8x128xf32>
    %277 = vector.extract_strided_slice %259 {offsets = [0, 256], sizes = [8, 128], strides = [1, 1]} : vector<8x384xf32> to vector<8x128xf32>
    %278 = vector.extract_strided_slice %260 {offsets = [0, 256], sizes = [8, 128], strides = [1, 1]} : vector<8x384xf32> to vector<8x128xf32>
    %279 = vector.broadcast %9 : vector<1x128xf32> to vector<8x128xf32>
    %280 = arith.addf %278, %279 : vector<8x128xf32>
    %281 = arith.mulf %268, %280 : vector<8x128xf32>
    %282 = arith.addf %277, %281 : vector<8x128xf32>
    %283 = math.tanh %282 : vector<8x128xf32>
    %cst_66 = arith.constant 1.000000e+00 : f32
    %284 = vector.broadcast %cst_66 : f32 to vector<8x128xf32>
    %285 = arith.subf %284, %276 : vector<8x128xf32>
    %286 = arith.mulf %285, %283 : vector<8x128xf32>
    %287 = arith.mulf %276, %253 : vector<8x128xf32>
    %288 = arith.addf %286, %287 : vector<8x128xf32>
    %289 = arith.index_cast %257 : i32 to index
    %c0_67 = arith.constant 0 : index
    %290 = vector.load %arg14[%289, %c0_67] : memref<64x128xf32, #tpu.memory_space<vmem>>, vector<8x128xf32>
    tpu.vector_store %arg14[%289, %c0_67], %288 {strides = array<i32>} : memref<64x128xf32, #tpu.memory_space<vmem>>, vector<8x128xf32>,
    %c8_i32_68 = arith.constant 8 : i32
    %c0_69 = arith.constant 0 : index
    %c0_70 = arith.constant 0 : index
    %291 = vector.load %arg14[%c0_69, %c0_70] : memref<64x128xf32, #tpu.memory_space<vmem>>, vector<64x128xf32>
    %c0_71 = arith.constant 0 : index
    %c0_72 = arith.constant 0 : index
    %292 = vector.load %arg6[%c0_71, %c0_72] : memref<128x384xf32, #tpu.memory_space<vmem>>, vector<128x384xf32>
    %cst_73 = arith.constant dense<0.000000e+00> : vector<64x384xf32>
    %293 = tpu.matmul %291, %292, %cst_73 {dimension_numbers = #tpu.dot_dimension_numbers<[1], [0], [0], [1], [0, 0, 1, 1], [], []>} : vector<64x128xf32>, vector<128x384xf32>, vector<64x384xf32> -> vector<64x384xf32>
    %c0_74 = arith.constant 0 : index
    %c0_75 = arith.constant 0 : index
    %294 = vector.load %arg8[%c0_74, %c0_75] : memref<1x384xf32, #tpu.memory_space<vmem>>, vector<1x384xf32>
    %295 = vector.broadcast %294 : vector<1x384xf32> to vector<64x384xf32>
    %296 = arith.addf %293, %295 : vector<64x384xf32>
    %c0_76 = arith.constant 0 : index
    %c0_77 = arith.constant 0 : index
    %297 = vector.load %arg13[%c0_76, %c0_77] : memref<64x384xf32, #tpu.memory_space<vmem>>, vector<64x384xf32>
    tpu.vector_store %arg13[%c0_76, %c0_77], %296 {strides = array<i32>} : memref<64x384xf32, #tpu.memory_space<vmem>>, vector<64x384xf32>,
    %c0_78 = arith.constant 0 : index
    %c0_79 = arith.constant 0 : index
    %298 = vector.load %arg7[%c0_78, %c0_79] : memref<128x384xf32, #tpu.memory_space<vmem>>, vector<128x384xf32>
    %c0_80 = arith.constant 0 : index
    %c0_81 = arith.constant 0 : index
    %299 = vector.load %arg9[%c0_80, %c0_81] : memref<1x128xf32, #tpu.memory_space<vmem>>, vector<1x128xf32>
    %cst_82 = arith.constant 0.000000e+00 : f32
    %300 = vector.broadcast %cst_82 : f32 to vector<8x128xf32>
    %c0_i32_83 = arith.constant 0 : i32
    %c8_i32_84 = arith.constant 8 : i32
    %301 = arith.muli %c0_i32_83, %c8_i32_84 : i32
    %302 = tpu.assume_multiple %301, 8 : i32
    %303 = arith.index_cast %302 : i32 to index
    %c0_85 = arith.constant 0 : index
    %304 = vector.load %arg13[%303, %c0_85] : memref<64x384xf32, #tpu.memory_space<vmem>>, vector<8x384xf32>
    %cst_86 = arith.constant dense<0.000000e+00> : vector<8x384xf32>
    %305 = tpu.matmul %300, %298, %cst_86 {dimension_numbers = #tpu.dot_dimension_numbers<[1], [0], [0], [1], [0, 0, 1, 1], [], []>} : vector<8x128xf32>, vector<128x384xf32>, vector<8x384xf32> -> vector<8x384xf32>
    %306 = vector.extract_strided_slice %304 {offsets = [0, 0], sizes = [8, 128], strides = [1, 1]} : vector<8x384xf32> to vector<8x128xf32>
    %307 = vector.extract_strided_slice %305 {offsets = [0, 0], sizes = [8, 128], strides = [1, 1]} : vector<8x384xf32> to vector<8x128xf32>
    %308 = arith.addf %306, %307 : vector<8x128xf32>
    %309 = arith.negf %308 : vector<8x128xf32>
    %310 = math.exp %309 : vector<8x128xf32>
    %cst_87 = arith.constant 1.000000e+00 : f32
    %311 = vector.broadcast %cst_87 : f32 to vector<8x128xf32>
    %312 = arith.addf %311, %310 : vector<8x128xf32>
    %313 = arith.divf %311, %312 : vector<8x128xf32>
    %314 = vector.extract_strided_slice %304 {offsets = [0, 128], sizes = [8, 128], strides = [1, 1]} : vector<8x384xf32> to vector<8x128xf32>
    %315 = vector.extract_strided_slice %305 {offsets = [0, 128], sizes = [8, 128], strides = [1, 1]} : vector<8x384xf32> to vector<8x128xf32>
    %316 = arith.addf %314, %315 : vector<8x128xf32>
    %317 = arith.negf %316 : vector<8x128xf32>
    %318 = math.exp %317 : vector<8x128xf32>
    %cst_88 = arith.constant 1.000000e+00 : f32
    %319 = vector.broadcast %cst_88 : f32 to vector<8x128xf32>
    %320 = arith.addf %319, %318 : vector<8x128xf32>
    %321 = arith.divf %319, %320 : vector<8x128xf32>
    %322 = vector.extract_strided_slice %304 {offsets = [0, 256], sizes = [8, 128], strides = [1, 1]} : vector<8x384xf32> to vector<8x128xf32>
    %323 = vector.extract_strided_slice %305 {offsets = [0, 256], sizes = [8, 128], strides = [1, 1]} : vector<8x384xf32> to vector<8x128xf32>
    %324 = vector.broadcast %299 : vector<1x128xf32> to vector<8x128xf32>
    %325 = arith.addf %323, %324 : vector<8x128xf32>
    %326 = arith.mulf %313, %325 : vector<8x128xf32>
    %327 = arith.addf %322, %326 : vector<8x128xf32>
    %328 = math.tanh %327 : vector<8x128xf32>
    %cst_89 = arith.constant 1.000000e+00 : f32
    %329 = vector.broadcast %cst_89 : f32 to vector<8x128xf32>
    %330 = arith.subf %329, %321 : vector<8x128xf32>
    %331 = arith.mulf %330, %328 : vector<8x128xf32>
    %332 = arith.mulf %321, %300 : vector<8x128xf32>
    %333 = arith.addf %331, %332 : vector<8x128xf32>
    %334 = arith.index_cast %302 : i32 to index
    %c0_90 = arith.constant 0 : index
    %335 = vector.load %arg15[%334, %c0_90] : memref<64x128xf32, #tpu.memory_space<vmem>>, vector<8x128xf32>
    tpu.vector_store %arg15[%334, %c0_90], %333 {strides = array<i32>} : memref<64x128xf32, #tpu.memory_space<vmem>>, vector<8x128xf32>,
    %c1_i32_91 = arith.constant 1 : i32
    %c8_i32_92 = arith.constant 8 : i32
    %336 = arith.muli %c1_i32_91, %c8_i32_92 : i32
    %337 = tpu.assume_multiple %336, 8 : i32
    %338 = arith.index_cast %337 : i32 to index
    %c0_93 = arith.constant 0 : index
    %339 = vector.load %arg13[%338, %c0_93] : memref<64x384xf32, #tpu.memory_space<vmem>>, vector<8x384xf32>
    %cst_94 = arith.constant dense<0.000000e+00> : vector<8x384xf32>
    %340 = tpu.matmul %333, %298, %cst_94 {dimension_numbers = #tpu.dot_dimension_numbers<[1], [0], [0], [1], [0, 0, 1, 1], [], []>} : vector<8x128xf32>, vector<128x384xf32>, vector<8x384xf32> -> vector<8x384xf32>
    %341 = vector.extract_strided_slice %339 {offsets = [0, 0], sizes = [8, 128], strides = [1, 1]} : vector<8x384xf32> to vector<8x128xf32>
    %342 = vector.extract_strided_slice %340 {offsets = [0, 0], sizes = [8, 128], strides = [1, 1]} : vector<8x384xf32> to vector<8x128xf32>
    %343 = arith.addf %341, %342 : vector<8x128xf32>
    %344 = arith.negf %343 : vector<8x128xf32>
    %345 = math.exp %344 : vector<8x128xf32>
    %cst_95 = arith.constant 1.000000e+00 : f32
    %346 = vector.broadcast %cst_95 : f32 to vector<8x128xf32>
    %347 = arith.addf %346, %345 : vector<8x128xf32>
    %348 = arith.divf %346, %347 : vector<8x128xf32>
    %349 = vector.extract_strided_slice %339 {offsets = [0, 128], sizes = [8, 128], strides = [1, 1]} : vector<8x384xf32> to vector<8x128xf32>
    %350 = vector.extract_strided_slice %340 {offsets = [0, 128], sizes = [8, 128], strides = [1, 1]} : vector<8x384xf32> to vector<8x128xf32>
    %351 = arith.addf %349, %350 : vector<8x128xf32>
    %352 = arith.negf %351 : vector<8x128xf32>
    %353 = math.exp %352 : vector<8x128xf32>
    %cst_96 = arith.constant 1.000000e+00 : f32
    %354 = vector.broadcast %cst_96 : f32 to vector<8x128xf32>
    %355 = arith.addf %354, %353 : vector<8x128xf32>
    %356 = arith.divf %354, %355 : vector<8x128xf32>
    %357 = vector.extract_strided_slice %339 {offsets = [0, 256], sizes = [8, 128], strides = [1, 1]} : vector<8x384xf32> to vector<8x128xf32>
    %358 = vector.extract_strided_slice %340 {offsets = [0, 256], sizes = [8, 128], strides = [1, 1]} : vector<8x384xf32> to vector<8x128xf32>
    %359 = vector.broadcast %299 : vector<1x128xf32> to vector<8x128xf32>
    %360 = arith.addf %358, %359 : vector<8x128xf32>
    %361 = arith.mulf %348, %360 : vector<8x128xf32>
    %362 = arith.addf %357, %361 : vector<8x128xf32>
    %363 = math.tanh %362 : vector<8x128xf32>
    %cst_97 = arith.constant 1.000000e+00 : f32
    %364 = vector.broadcast %cst_97 : f32 to vector<8x128xf32>
    %365 = arith.subf %364, %356 : vector<8x128xf32>
    %366 = arith.mulf %365, %363 : vector<8x128xf32>
    %367 = arith.mulf %356, %333 : vector<8x128xf32>
    %368 = arith.addf %366, %367 : vector<8x128xf32>
    %369 = arith.index_cast %337 : i32 to index
    %c0_98 = arith.constant 0 : index
    %370 = vector.load %arg15[%369, %c0_98] : memref<64x128xf32, #tpu.memory_space<vmem>>, vector<8x128xf32>
    tpu.vector_store %arg15[%369, %c0_98], %368 {strides = array<i32>} : memref<64x128xf32, #tpu.memory_space<vmem>>, vector<8x128xf32>,
    %c2_i32_99 = arith.constant 2 : i32
    %c8_i32_100 = arith.constant 8 : i32
    %371 = arith.muli %c2_i32_99, %c8_i32_100 : i32
    %372 = tpu.assume_multiple %371, 8 : i32
    %373 = arith.index_cast %372 : i32 to index
    %c0_101 = arith.constant 0 : index
    %374 = vector.load %arg13[%373, %c0_101] : memref<64x384xf32, #tpu.memory_space<vmem>>, vector<8x384xf32>
    %cst_102 = arith.constant dense<0.000000e+00> : vector<8x384xf32>
    %375 = tpu.matmul %368, %298, %cst_102 {dimension_numbers = #tpu.dot_dimension_numbers<[1], [0], [0], [1], [0, 0, 1, 1], [], []>} : vector<8x128xf32>, vector<128x384xf32>, vector<8x384xf32> -> vector<8x384xf32>
    %376 = vector.extract_strided_slice %374 {offsets = [0, 0], sizes = [8, 128], strides = [1, 1]} : vector<8x384xf32> to vector<8x128xf32>
    %377 = vector.extract_strided_slice %375 {offsets = [0, 0], sizes = [8, 128], strides = [1, 1]} : vector<8x384xf32> to vector<8x128xf32>
    %378 = arith.addf %376, %377 : vector<8x128xf32>
    %379 = arith.negf %378 : vector<8x128xf32>
    %380 = math.exp %379 : vector<8x128xf32>
    %cst_103 = arith.constant 1.000000e+00 : f32
    %381 = vector.broadcast %cst_103 : f32 to vector<8x128xf32>
    %382 = arith.addf %381, %380 : vector<8x128xf32>
    %383 = arith.divf %381, %382 : vector<8x128xf32>
    %384 = vector.extract_strided_slice %374 {offsets = [0, 128], sizes = [8, 128], strides = [1, 1]} : vector<8x384xf32> to vector<8x128xf32>
    %385 = vector.extract_strided_slice %375 {offsets = [0, 128], sizes = [8, 128], strides = [1, 1]} : vector<8x384xf32> to vector<8x128xf32>
    %386 = arith.addf %384, %385 : vector<8x128xf32>
    %387 = arith.negf %386 : vector<8x128xf32>
    %388 = math.exp %387 : vector<8x128xf32>
    %cst_104 = arith.constant 1.000000e+00 : f32
    %389 = vector.broadcast %cst_104 : f32 to vector<8x128xf32>
    %390 = arith.addf %389, %388 : vector<8x128xf32>
    %391 = arith.divf %389, %390 : vector<8x128xf32>
    %392 = vector.extract_strided_slice %374 {offsets = [0, 256], sizes = [8, 128], strides = [1, 1]} : vector<8x384xf32> to vector<8x128xf32>
    %393 = vector.extract_strided_slice %375 {offsets = [0, 256], sizes = [8, 128], strides = [1, 1]} : vector<8x384xf32> to vector<8x128xf32>
    %394 = vector.broadcast %299 : vector<1x128xf32> to vector<8x128xf32>
    %395 = arith.addf %393, %394 : vector<8x128xf32>
    %396 = arith.mulf %383, %395 : vector<8x128xf32>
    %397 = arith.addf %392, %396 : vector<8x128xf32>
    %398 = math.tanh %397 : vector<8x128xf32>
    %cst_105 = arith.constant 1.000000e+00 : f32
    %399 = vector.broadcast %cst_105 : f32 to vector<8x128xf32>
    %400 = arith.subf %399, %391 : vector<8x128xf32>
    %401 = arith.mulf %400, %398 : vector<8x128xf32>
    %402 = arith.mulf %391, %368 : vector<8x128xf32>
    %403 = arith.addf %401, %402 : vector<8x128xf32>
    %404 = arith.index_cast %372 : i32 to index
    %c0_106 = arith.constant 0 : index
    %405 = vector.load %arg15[%404, %c0_106] : memref<64x128xf32, #tpu.memory_space<vmem>>, vector<8x128xf32>
    tpu.vector_store %arg15[%404, %c0_106], %403 {strides = array<i32>} : memref<64x128xf32, #tpu.memory_space<vmem>>, vector<8x128xf32>,
    %c3_i32_107 = arith.constant 3 : i32
    %c8_i32_108 = arith.constant 8 : i32
    %406 = arith.muli %c3_i32_107, %c8_i32_108 : i32
    %407 = tpu.assume_multiple %406, 8 : i32
    %408 = arith.index_cast %407 : i32 to index
    %c0_109 = arith.constant 0 : index
    %409 = vector.load %arg13[%408, %c0_109] : memref<64x384xf32, #tpu.memory_space<vmem>>, vector<8x384xf32>
    %cst_110 = arith.constant dense<0.000000e+00> : vector<8x384xf32>
    %410 = tpu.matmul %403, %298, %cst_110 {dimension_numbers = #tpu.dot_dimension_numbers<[1], [0], [0], [1], [0, 0, 1, 1], [], []>} : vector<8x128xf32>, vector<128x384xf32>, vector<8x384xf32> -> vector<8x384xf32>
    %411 = vector.extract_strided_slice %409 {offsets = [0, 0], sizes = [8, 128], strides = [1, 1]} : vector<8x384xf32> to vector<8x128xf32>
    %412 = vector.extract_strided_slice %410 {offsets = [0, 0], sizes = [8, 128], strides = [1, 1]} : vector<8x384xf32> to vector<8x128xf32>
    %413 = arith.addf %411, %412 : vector<8x128xf32>
    %414 = arith.negf %413 : vector<8x128xf32>
    %415 = math.exp %414 : vector<8x128xf32>
    %cst_111 = arith.constant 1.000000e+00 : f32
    %416 = vector.broadcast %cst_111 : f32 to vector<8x128xf32>
    %417 = arith.addf %416, %415 : vector<8x128xf32>
    %418 = arith.divf %416, %417 : vector<8x128xf32>
    %419 = vector.extract_strided_slice %409 {offsets = [0, 128], sizes = [8, 128], strides = [1, 1]} : vector<8x384xf32> to vector<8x128xf32>
    %420 = vector.extract_strided_slice %410 {offsets = [0, 128], sizes = [8, 128], strides = [1, 1]} : vector<8x384xf32> to vector<8x128xf32>
    %421 = arith.addf %419, %420 : vector<8x128xf32>
    %422 = arith.negf %421 : vector<8x128xf32>
    %423 = math.exp %422 : vector<8x128xf32>
    %cst_112 = arith.constant 1.000000e+00 : f32
    %424 = vector.broadcast %cst_112 : f32 to vector<8x128xf32>
    %425 = arith.addf %424, %423 : vector<8x128xf32>
    %426 = arith.divf %424, %425 : vector<8x128xf32>
    %427 = vector.extract_strided_slice %409 {offsets = [0, 256], sizes = [8, 128], strides = [1, 1]} : vector<8x384xf32> to vector<8x128xf32>
    %428 = vector.extract_strided_slice %410 {offsets = [0, 256], sizes = [8, 128], strides = [1, 1]} : vector<8x384xf32> to vector<8x128xf32>
    %429 = vector.broadcast %299 : vector<1x128xf32> to vector<8x128xf32>
    %430 = arith.addf %428, %429 : vector<8x128xf32>
    %431 = arith.mulf %418, %430 : vector<8x128xf32>
    %432 = arith.addf %427, %431 : vector<8x128xf32>
    %433 = math.tanh %432 : vector<8x128xf32>
    %cst_113 = arith.constant 1.000000e+00 : f32
    %434 = vector.broadcast %cst_113 : f32 to vector<8x128xf32>
    %435 = arith.subf %434, %426 : vector<8x128xf32>
    %436 = arith.mulf %435, %433 : vector<8x128xf32>
    %437 = arith.mulf %426, %403 : vector<8x128xf32>
    %438 = arith.addf %436, %437 : vector<8x128xf32>
    %439 = arith.index_cast %407 : i32 to index
    %c0_114 = arith.constant 0 : index
    %440 = vector.load %arg15[%439, %c0_114] : memref<64x128xf32, #tpu.memory_space<vmem>>, vector<8x128xf32>
    tpu.vector_store %arg15[%439, %c0_114], %438 {strides = array<i32>} : memref<64x128xf32, #tpu.memory_space<vmem>>, vector<8x128xf32>,
    %c4_i32_115 = arith.constant 4 : i32
    %c8_i32_116 = arith.constant 8 : i32
    %441 = arith.muli %c4_i32_115, %c8_i32_116 : i32
    %442 = tpu.assume_multiple %441, 8 : i32
    %443 = arith.index_cast %442 : i32 to index
    %c0_117 = arith.constant 0 : index
    %444 = vector.load %arg13[%443, %c0_117] : memref<64x384xf32, #tpu.memory_space<vmem>>, vector<8x384xf32>
    %cst_118 = arith.constant dense<0.000000e+00> : vector<8x384xf32>
    %445 = tpu.matmul %438, %298, %cst_118 {dimension_numbers = #tpu.dot_dimension_numbers<[1], [0], [0], [1], [0, 0, 1, 1], [], []>} : vector<8x128xf32>, vector<128x384xf32>, vector<8x384xf32> -> vector<8x384xf32>
    %446 = vector.extract_strided_slice %444 {offsets = [0, 0], sizes = [8, 128], strides = [1, 1]} : vector<8x384xf32> to vector<8x128xf32>
    %447 = vector.extract_strided_slice %445 {offsets = [0, 0], sizes = [8, 128], strides = [1, 1]} : vector<8x384xf32> to vector<8x128xf32>
    %448 = arith.addf %446, %447 : vector<8x128xf32>
    %449 = arith.negf %448 : vector<8x128xf32>
    %450 = math.exp %449 : vector<8x128xf32>
    %cst_119 = arith.constant 1.000000e+00 : f32
    %451 = vector.broadcast %cst_119 : f32 to vector<8x128xf32>
    %452 = arith.addf %451, %450 : vector<8x128xf32>
    %453 = arith.divf %451, %452 : vector<8x128xf32>
    %454 = vector.extract_strided_slice %444 {offsets = [0, 128], sizes = [8, 128], strides = [1, 1]} : vector<8x384xf32> to vector<8x128xf32>
    %455 = vector.extract_strided_slice %445 {offsets = [0, 128], sizes = [8, 128], strides = [1, 1]} : vector<8x384xf32> to vector<8x128xf32>
    %456 = arith.addf %454, %455 : vector<8x128xf32>
    %457 = arith.negf %456 : vector<8x128xf32>
    %458 = math.exp %457 : vector<8x128xf32>
    %cst_120 = arith.constant 1.000000e+00 : f32
    %459 = vector.broadcast %cst_120 : f32 to vector<8x128xf32>
    %460 = arith.addf %459, %458 : vector<8x128xf32>
    %461 = arith.divf %459, %460 : vector<8x128xf32>
    %462 = vector.extract_strided_slice %444 {offsets = [0, 256], sizes = [8, 128], strides = [1, 1]} : vector<8x384xf32> to vector<8x128xf32>
    %463 = vector.extract_strided_slice %445 {offsets = [0, 256], sizes = [8, 128], strides = [1, 1]} : vector<8x384xf32> to vector<8x128xf32>
    %464 = vector.broadcast %299 : vector<1x128xf32> to vector<8x128xf32>
    %465 = arith.addf %463, %464 : vector<8x128xf32>
    %466 = arith.mulf %453, %465 : vector<8x128xf32>
    %467 = arith.addf %462, %466 : vector<8x128xf32>
    %468 = math.tanh %467 : vector<8x128xf32>
    %cst_121 = arith.constant 1.000000e+00 : f32
    %469 = vector.broadcast %cst_121 : f32 to vector<8x128xf32>
    %470 = arith.subf %469, %461 : vector<8x128xf32>
    %471 = arith.mulf %470, %468 : vector<8x128xf32>
    %472 = arith.mulf %461, %438 : vector<8x128xf32>
    %473 = arith.addf %471, %472 : vector<8x128xf32>
    %474 = arith.index_cast %442 : i32 to index
    %c0_122 = arith.constant 0 : index
    %475 = vector.load %arg15[%474, %c0_122] : memref<64x128xf32, #tpu.memory_space<vmem>>, vector<8x128xf32>
    tpu.vector_store %arg15[%474, %c0_122], %473 {strides = array<i32>} : memref<64x128xf32, #tpu.memory_space<vmem>>, vector<8x128xf32>,
    %c5_i32_123 = arith.constant 5 : i32
    %c8_i32_124 = arith.constant 8 : i32
    %476 = arith.muli %c5_i32_123, %c8_i32_124 : i32
    %477 = tpu.assume_multiple %476, 8 : i32
    %478 = arith.index_cast %477 : i32 to index
    %c0_125 = arith.constant 0 : index
    %479 = vector.load %arg13[%478, %c0_125] : memref<64x384xf32, #tpu.memory_space<vmem>>, vector<8x384xf32>
    %cst_126 = arith.constant dense<0.000000e+00> : vector<8x384xf32>
    %480 = tpu.matmul %473, %298, %cst_126 {dimension_numbers = #tpu.dot_dimension_numbers<[1], [0], [0], [1], [0, 0, 1, 1], [], []>} : vector<8x128xf32>, vector<128x384xf32>, vector<8x384xf32> -> vector<8x384xf32>
    %481 = vector.extract_strided_slice %479 {offsets = [0, 0], sizes = [8, 128], strides = [1, 1]} : vector<8x384xf32> to vector<8x128xf32>
    %482 = vector.extract_strided_slice %480 {offsets = [0, 0], sizes = [8, 128], strides = [1, 1]} : vector<8x384xf32> to vector<8x128xf32>
    %483 = arith.addf %481, %482 : vector<8x128xf32>
    %484 = arith.negf %483 : vector<8x128xf32>
    %485 = math.exp %484 : vector<8x128xf32>
    %cst_127 = arith.constant 1.000000e+00 : f32
    %486 = vector.broadcast %cst_127 : f32 to vector<8x128xf32>
    %487 = arith.addf %486, %485 : vector<8x128xf32>
    %488 = arith.divf %486, %487 : vector<8x128xf32>
    %489 = vector.extract_strided_slice %479 {offsets = [0, 128], sizes = [8, 128], strides = [1, 1]} : vector<8x384xf32> to vector<8x128xf32>
    %490 = vector.extract_strided_slice %480 {offsets = [0, 128], sizes = [8, 128], strides = [1, 1]} : vector<8x384xf32> to vector<8x128xf32>
    %491 = arith.addf %489, %490 : vector<8x128xf32>
    %492 = arith.negf %491 : vector<8x128xf32>
    %493 = math.exp %492 : vector<8x128xf32>
    %cst_128 = arith.constant 1.000000e+00 : f32
    %494 = vector.broadcast %cst_128 : f32 to vector<8x128xf32>
    %495 = arith.addf %494, %493 : vector<8x128xf32>
    %496 = arith.divf %494, %495 : vector<8x128xf32>
    %497 = vector.extract_strided_slice %479 {offsets = [0, 256], sizes = [8, 128], strides = [1, 1]} : vector<8x384xf32> to vector<8x128xf32>
    %498 = vector.extract_strided_slice %480 {offsets = [0, 256], sizes = [8, 128], strides = [1, 1]} : vector<8x384xf32> to vector<8x128xf32>
    %499 = vector.broadcast %299 : vector<1x128xf32> to vector<8x128xf32>
    %500 = arith.addf %498, %499 : vector<8x128xf32>
    %501 = arith.mulf %488, %500 : vector<8x128xf32>
    %502 = arith.addf %497, %501 : vector<8x128xf32>
    %503 = math.tanh %502 : vector<8x128xf32>
    %cst_129 = arith.constant 1.000000e+00 : f32
    %504 = vector.broadcast %cst_129 : f32 to vector<8x128xf32>
    %505 = arith.subf %504, %496 : vector<8x128xf32>
    %506 = arith.mulf %505, %503 : vector<8x128xf32>
    %507 = arith.mulf %496, %473 : vector<8x128xf32>
    %508 = arith.addf %506, %507 : vector<8x128xf32>
    %509 = arith.index_cast %477 : i32 to index
    %c0_130 = arith.constant 0 : index
    %510 = vector.load %arg15[%509, %c0_130] : memref<64x128xf32, #tpu.memory_space<vmem>>, vector<8x128xf32>
    tpu.vector_store %arg15[%509, %c0_130], %508 {strides = array<i32>} : memref<64x128xf32, #tpu.memory_space<vmem>>, vector<8x128xf32>,
    %c6_i32_131 = arith.constant 6 : i32
    %c8_i32_132 = arith.constant 8 : i32
    %511 = arith.muli %c6_i32_131, %c8_i32_132 : i32
    %512 = tpu.assume_multiple %511, 8 : i32
    %513 = arith.index_cast %512 : i32 to index
    %c0_133 = arith.constant 0 : index
    %514 = vector.load %arg13[%513, %c0_133] : memref<64x384xf32, #tpu.memory_space<vmem>>, vector<8x384xf32>
    %cst_134 = arith.constant dense<0.000000e+00> : vector<8x384xf32>
    %515 = tpu.matmul %508, %298, %cst_134 {dimension_numbers = #tpu.dot_dimension_numbers<[1], [0], [0], [1], [0, 0, 1, 1], [], []>} : vector<8x128xf32>, vector<128x384xf32>, vector<8x384xf32> -> vector<8x384xf32>
    %516 = vector.extract_strided_slice %514 {offsets = [0, 0], sizes = [8, 128], strides = [1, 1]} : vector<8x384xf32> to vector<8x128xf32>
    %517 = vector.extract_strided_slice %515 {offsets = [0, 0], sizes = [8, 128], strides = [1, 1]} : vector<8x384xf32> to vector<8x128xf32>
    %518 = arith.addf %516, %517 : vector<8x128xf32>
    %519 = arith.negf %518 : vector<8x128xf32>
    %520 = math.exp %519 : vector<8x128xf32>
    %cst_135 = arith.constant 1.000000e+00 : f32
    %521 = vector.broadcast %cst_135 : f32 to vector<8x128xf32>
    %522 = arith.addf %521, %520 : vector<8x128xf32>
    %523 = arith.divf %521, %522 : vector<8x128xf32>
    %524 = vector.extract_strided_slice %514 {offsets = [0, 128], sizes = [8, 128], strides = [1, 1]} : vector<8x384xf32> to vector<8x128xf32>
    %525 = vector.extract_strided_slice %515 {offsets = [0, 128], sizes = [8, 128], strides = [1, 1]} : vector<8x384xf32> to vector<8x128xf32>
    %526 = arith.addf %524, %525 : vector<8x128xf32>
    %527 = arith.negf %526 : vector<8x128xf32>
    %528 = math.exp %527 : vector<8x128xf32>
    %cst_136 = arith.constant 1.000000e+00 : f32
    %529 = vector.broadcast %cst_136 : f32 to vector<8x128xf32>
    %530 = arith.addf %529, %528 : vector<8x128xf32>
    %531 = arith.divf %529, %530 : vector<8x128xf32>
    %532 = vector.extract_strided_slice %514 {offsets = [0, 256], sizes = [8, 128], strides = [1, 1]} : vector<8x384xf32> to vector<8x128xf32>
    %533 = vector.extract_strided_slice %515 {offsets = [0, 256], sizes = [8, 128], strides = [1, 1]} : vector<8x384xf32> to vector<8x128xf32>
    %534 = vector.broadcast %299 : vector<1x128xf32> to vector<8x128xf32>
    %535 = arith.addf %533, %534 : vector<8x128xf32>
    %536 = arith.mulf %523, %535 : vector<8x128xf32>
    %537 = arith.addf %532, %536 : vector<8x128xf32>
    %538 = math.tanh %537 : vector<8x128xf32>
    %cst_137 = arith.constant 1.000000e+00 : f32
    %539 = vector.broadcast %cst_137 : f32 to vector<8x128xf32>
    %540 = arith.subf %539, %531 : vector<8x128xf32>
    %541 = arith.mulf %540, %538 : vector<8x128xf32>
    %542 = arith.mulf %531, %508 : vector<8x128xf32>
    %543 = arith.addf %541, %542 : vector<8x128xf32>
    %544 = arith.index_cast %512 : i32 to index
    %c0_138 = arith.constant 0 : index
    %545 = vector.load %arg15[%544, %c0_138] : memref<64x128xf32, #tpu.memory_space<vmem>>, vector<8x128xf32>
    tpu.vector_store %arg15[%544, %c0_138], %543 {strides = array<i32>} : memref<64x128xf32, #tpu.memory_space<vmem>>, vector<8x128xf32>,
    %c7_i32_139 = arith.constant 7 : i32
    %c8_i32_140 = arith.constant 8 : i32
    %546 = arith.muli %c7_i32_139, %c8_i32_140 : i32
    %547 = tpu.assume_multiple %546, 8 : i32
    %548 = arith.index_cast %547 : i32 to index
    %c0_141 = arith.constant 0 : index
    %549 = vector.load %arg13[%548, %c0_141] : memref<64x384xf32, #tpu.memory_space<vmem>>, vector<8x384xf32>
    %cst_142 = arith.constant dense<0.000000e+00> : vector<8x384xf32>
    %550 = tpu.matmul %543, %298, %cst_142 {dimension_numbers = #tpu.dot_dimension_numbers<[1], [0], [0], [1], [0, 0, 1, 1], [], []>} : vector<8x128xf32>, vector<128x384xf32>, vector<8x384xf32> -> vector<8x384xf32>
    %551 = vector.extract_strided_slice %549 {offsets = [0, 0], sizes = [8, 128], strides = [1, 1]} : vector<8x384xf32> to vector<8x128xf32>
    %552 = vector.extract_strided_slice %550 {offsets = [0, 0], sizes = [8, 128], strides = [1, 1]} : vector<8x384xf32> to vector<8x128xf32>
    %553 = arith.addf %551, %552 : vector<8x128xf32>
    %554 = arith.negf %553 : vector<8x128xf32>
    %555 = math.exp %554 : vector<8x128xf32>
    %cst_143 = arith.constant 1.000000e+00 : f32
    %556 = vector.broadcast %cst_143 : f32 to vector<8x128xf32>
    %557 = arith.addf %556, %555 : vector<8x128xf32>
    %558 = arith.divf %556, %557 : vector<8x128xf32>
    %559 = vector.extract_strided_slice %549 {offsets = [0, 128], sizes = [8, 128], strides = [1, 1]} : vector<8x384xf32> to vector<8x128xf32>
    %560 = vector.extract_strided_slice %550 {offsets = [0, 128], sizes = [8, 128], strides = [1, 1]} : vector<8x384xf32> to vector<8x128xf32>
    %561 = arith.addf %559, %560 : vector<8x128xf32>
    %562 = arith.negf %561 : vector<8x128xf32>
    %563 = math.exp %562 : vector<8x128xf32>
    %cst_144 = arith.constant 1.000000e+00 : f32
    %564 = vector.broadcast %cst_144 : f32 to vector<8x128xf32>
    %565 = arith.addf %564, %563 : vector<8x128xf32>
    %566 = arith.divf %564, %565 : vector<8x128xf32>
    %567 = vector.extract_strided_slice %549 {offsets = [0, 256], sizes = [8, 128], strides = [1, 1]} : vector<8x384xf32> to vector<8x128xf32>
    %568 = vector.extract_strided_slice %550 {offsets = [0, 256], sizes = [8, 128], strides = [1, 1]} : vector<8x384xf32> to vector<8x128xf32>
    %569 = vector.broadcast %299 : vector<1x128xf32> to vector<8x128xf32>
    %570 = arith.addf %568, %569 : vector<8x128xf32>
    %571 = arith.mulf %558, %570 : vector<8x128xf32>
    %572 = arith.addf %567, %571 : vector<8x128xf32>
    %573 = math.tanh %572 : vector<8x128xf32>
    %cst_145 = arith.constant 1.000000e+00 : f32
    %574 = vector.broadcast %cst_145 : f32 to vector<8x128xf32>
    %575 = arith.subf %574, %566 : vector<8x128xf32>
    %576 = arith.mulf %575, %573 : vector<8x128xf32>
    %577 = arith.mulf %566, %543 : vector<8x128xf32>
    %578 = arith.addf %576, %577 : vector<8x128xf32>
    %579 = arith.index_cast %547 : i32 to index
    %c0_146 = arith.constant 0 : index
    %580 = vector.load %arg15[%579, %c0_146] : memref<64x128xf32, #tpu.memory_space<vmem>>, vector<8x128xf32>
    tpu.vector_store %arg15[%579, %c0_146], %578 {strides = array<i32>} : memref<64x128xf32, #tpu.memory_space<vmem>>, vector<8x128xf32>,
    %c8_i32_147 = arith.constant 8 : i32
    %c32 = arith.constant 32 : index
    %c0_148 = arith.constant 0 : index
    %581 = vector.load %arg15[%c32, %c0_148] : memref<64x128xf32, #tpu.memory_space<vmem>>, vector<32x128xf32>
    %c0_149 = arith.constant 0 : index
    %c0_150 = arith.constant 0 : index
    %582 = vector.load %arg10[%c0_149, %c0_150] : memref<128x128xf32, #tpu.memory_space<vmem>>, vector<128x128xf32>
    %cst_151 = arith.constant dense<0.000000e+00> : vector<32x128xf32>
    %583 = tpu.matmul %581, %582, %cst_151 {dimension_numbers = #tpu.dot_dimension_numbers<[1], [0], [0], [1], [0, 0, 1, 1], [], []>} : vector<32x128xf32>, vector<128x128xf32>, vector<32x128xf32> -> vector<32x128xf32>
    %c0_152 = arith.constant 0 : index
    %c0_153 = arith.constant 0 : index
    %584 = vector.load %arg11[%c0_152, %c0_153] : memref<1x128xf32, #tpu.memory_space<vmem>>, vector<1x128xf32>
    %585 = vector.broadcast %584 : vector<1x128xf32> to vector<32x128xf32>
    %586 = arith.addf %583, %585 : vector<32x128xf32>
    %587 = vector.shape_cast %586 : vector<32x128xf32> to vector<4x8x128xf32>
    %c0_154 = arith.constant 0 : index
    %c0_155 = arith.constant 0 : index
    %c0_156 = arith.constant 0 : index
    %588 = vector.load %arg12[%c0_154, %c0_155, %c0_156] : memref<4x8x128xf32, #tpu.memory_space<vmem>>, vector<4x8x128xf32>
    tpu.vector_store %arg12[%c0_154, %c0_155, %c0_156], %587 {strides = array<i32>} : memref<4x8x128xf32, #tpu.memory_space<vmem>>, vector<4x8x128xf32>,
    return
  }
  func.func @transform_0(%arg0: i32) -> (i32, i32, i32) {
    %c0_i32 = arith.constant 0 : i32
    %c0_i32_0 = arith.constant 0 : i32
    %c0_i32_1 = arith.constant 0 : i32
    return %c0_i32, %arg0, %c0_i32_0 : i32, i32, i32
  }
  func.func @transform_1(%arg0: i32) -> (i32, i32) {
    %c0_i32 = arith.constant 0 : i32
    %c0_i32_0 = arith.constant 0 : i32
    %c0_i32_1 = arith.constant 0 : i32
    return %c0_i32, %c0_i32_0 : i32, i32
  }
  func.func @transform_2(%arg0: i32) -> (i32, i32) {
    %c0_i32 = arith.constant 0 : i32
    %c0_i32_0 = arith.constant 0 : i32
    %c0_i32_1 = arith.constant 0 : i32
    return %c0_i32, %c0_i32_0 : i32, i32
  }
  func.func @transform_3(%arg0: i32) -> (i32, i32) {
    %c0_i32 = arith.constant 0 : i32
    %c0_i32_0 = arith.constant 0 : i32
    %c0_i32_1 = arith.constant 0 : i32
    return %c0_i32, %c0_i32_0 : i32, i32
  }
  func.func @transform_4(%arg0: i32) -> (i32, i32) {
    %c0_i32 = arith.constant 0 : i32
    %c0_i32_0 = arith.constant 0 : i32
    %c0_i32_1 = arith.constant 0 : i32
    return %c0_i32, %c0_i32_0 : i32, i32
  }
  func.func @transform_5(%arg0: i32) -> (i32, i32) {
    %c0_i32 = arith.constant 0 : i32
    %c0_i32_0 = arith.constant 0 : i32
    %c0_i32_1 = arith.constant 0 : i32
    return %c0_i32, %c0_i32_0 : i32, i32
  }
  func.func @transform_6(%arg0: i32) -> (i32, i32) {
    %c0_i32 = arith.constant 0 : i32
    %c0_i32_0 = arith.constant 0 : i32
    %c0_i32_1 = arith.constant 0 : i32
    return %c0_i32, %c0_i32_0 : i32, i32
  }
  func.func @transform_7(%arg0: i32) -> (i32, i32) {
    %c0_i32 = arith.constant 0 : i32
    %c0_i32_0 = arith.constant 0 : i32
    %c0_i32_1 = arith.constant 0 : i32
    return %c0_i32, %c0_i32_0 : i32, i32
  }
  func.func @transform_8(%arg0: i32) -> (i32, i32) {
    %c0_i32 = arith.constant 0 : i32
    %c0_i32_0 = arith.constant 0 : i32
    %c0_i32_1 = arith.constant 0 : i32
    return %c0_i32, %c0_i32_0 : i32, i32
  }
  func.func @transform_9(%arg0: i32) -> (i32, i32) {
    %c0_i32 = arith.constant 0 : i32
    %c0_i32_0 = arith.constant 0 : i32
    %c0_i32_1 = arith.constant 0 : i32
    return %c0_i32, %c0_i32_0 : i32, i32
  }
  func.func @transform_10(%arg0: i32) -> (i32, i32) {
    %c0_i32 = arith.constant 0 : i32
    %c0_i32_0 = arith.constant 0 : i32
    %c0_i32_1 = arith.constant 0 : i32
    return %c0_i32, %c0_i32_0 : i32, i32
  }
  func.func @transform_11(%arg0: i32) -> (i32, i32, i32) {
    %c0_i32 = arith.constant 0 : i32
    %c0_i32_0 = arith.constant 0 : i32
    %c0_i32_1 = arith.constant 0 : i32
    return %c0_i32, %arg0, %c0_i32_0 : i32, i32, i32
  }
}

</mosaic_0001>

<bundles_post_ra>
// kernel: tpu_custom_call.1
= control target key start
LH: loop header
LB: loop body
LE: loop exit
PB: predicated region body
PF: predicated region fallthrough
CT: control target
= control target key end

     0   :  { %16 = vsyncpa [#allocation6], 0  ;;  %s4771_s0 = inlined_call_operand.hbm [shape: f32[8,8,128], index: 0, kind: input, shape index: {}]   ;;  %s4772_s1 = inlined_call_operand.hbm [shape: f32[128,384], index: 1, kind: input, shape index: {}]   ;;  %s4773_s2 = inlined_call_operand.hbm [shape: f32[128,384], index: 2, kind: input, shape index: {}]   ;;  %s4774_s3 = inlined_call_operand.hbm [shape: f32[1,384], index: 3, kind: input, shape index: {}]   ;;  %s4775_s4 = inlined_call_operand.vmem [shape: f32[1,128], index: 4, kind: input, shape index: {}]   ;;  %s4776_s5 = inlined_call_operand.hbm [shape: f32[128,384], index: 5, kind: input, shape index: {}]   ;;  %s4777_s6 = inlined_call_operand.hbm [shape: f32[128,384], index: 6, kind: input, shape index: {}]   ;;  %s4778_s7 = inlined_call_operand.vmem [shape: f32[1,384], index: 7, kind: input, shape index: {}]   ;;  %s4779_s8 = inlined_call_operand.vmem [shape: f32[1,128], index: 8, kind: input, shape index: {}]   ;;  %s4780_s9 = inlined_call_operand.hbm [shape: f32[128,128], index: 9, kind: input, shape index: {}]   ;;  %s4781_s10 = inlined_call_operand.vmem [shape: f32[1,128], index: 10, kind: input, shape index: {}]   ;;  %s4782_s11 = inlined_call_operand.hbm [shape: f32[4,8,128], index: 11, kind: output, shape index: {}]  }
   0x1   :  { %17 = vsyncpa [#allocation9], 0 }
   0x2   :  { %18 = vsyncpa [#allocation12], 0 }
   0x3   :  { %19 = vsyncpa [#allocation15], 0  ;;  %s38_s19 = sshll.u32 %s4772_s1, 4  ;;  %s39_s19 = int_to_ptr.hbm [resolvable:$true] %s38_s19 }
   0x4   :  { %20 = vsyncpa [#allocation7], 0  ;;  %s3112_s20 = smov [#allocation8]   ;;  %s65_s24 = sshll.u32 %s4774_s3, 4  ;;  %s66_s24 = int_to_ptr.hbm [resolvable:$true] %s65_s24 }
   0x5   :  { %s40_s21 = sshll.u32 %s3112_s20, 4  ;;  %s3113_s25 = smov 384   ;;  %s41_s21 = int_to_ptr.vmem [resolvable:$true] %s40_s21 }
   0x6   :  { %s3114_s26 = smov 24   ;;  %s3115_s27 = smov [#allocation11]  }
   0x7   :  { %46 = dma.hbm_to_vmem [thread:$0]  %s39_s19, 6144, %s41_s21, [#allocation9], %s3113_s25, %s3113_s25, %s3114_s26  }
   0x8   :  { %s67_s28 = sshll.u32 %s3115_s27, 4  ;;  %s90_s30 = sshll.u32 %s4777_s6, 4  ;;  %s68_s28 = int_to_ptr.vmem [resolvable:$true] %s67_s28  ;;  %s91_s30 = int_to_ptr.hbm [resolvable:$true] %s90_s30 }
   0x9   :  { %70 = dma.hbm_to_vmem [thread:$0]  %s66_s24, 48, %s68_s28, [#allocation12]  }
   0xa   :  { %s25_s3 = sshll.u32 %s4771_s0, 4  ;;  %s3116_s14 = smov [#allocation14]   ;;  %s26_s3 = int_to_ptr.hbm [resolvable:$true] %s25_s3 }
   0xb   :  { %s92_s15 = sshll.u32 %s3116_s14, 4  ;;  %s3117_s16 = smov [#allocation5]   ;;  %s93_s15 = int_to_ptr.vmem [resolvable:$true] %s92_s15 }
   0xc   :  { %98 = dma.hbm_to_vmem [thread:$0]  %s91_s30, 6144, %s93_s15, [#allocation15], %s3113_s25, %s3113_s25, %s3114_s26  }
   0xd   :  { %s27_s17 = sshll.u32 %s3117_s16, 4  ;;  %s3118_s18 = smov 128   ;;  %s28_s17 = int_to_ptr.vmem [resolvable:$true] %s27_s17 }
   0xe   :  { %s3119_s6 = smov 8   ;;  %s51_s0 = sshll.u32 %s4773_s2, 4  ;;  %s52_s0 = int_to_ptr.hbm [resolvable:$true] %s51_s0 }
   0xf   :  { %33 = dma.hbm_to_vmem [thread:$0]  %s26_s3, 1024, %s28_s17, [#allocation6], %s3118_s18, %s3118_s18, %s3119_s6  }
  0x10   :  { %s3120_s21 = smov [#allocation10]   ;;  %s77_s27 = sshll.u32 %s4776_s5, 4  ;;  %s78_s27 = int_to_ptr.hbm [resolvable:$true] %s77_s27 }
  0x11   :  { %s53_s22 = sshll.u32 %s3120_s21, 4  ;;  %s3121_s28 = smov [#allocation13]   ;;  %s54_s22 = int_to_ptr.vmem [resolvable:$true] %s53_s22 }
  0x12   :  { %59 = dma.hbm_to_vmem [thread:$0]  %s52_s0, 6144, %s54_s22, [#allocation9], %s3113_s25, %s3113_s25, %s3114_s26  }
  0x13   :  { %s79_s29 = sshll.u32 %s3121_s28, 4  ;;  %s107_s12 = sshll.u32 %s4780_s9, 4  ;;  %s80_s29 = int_to_ptr.vmem [resolvable:$true] %s79_s29  ;;  %s108_s12 = int_to_ptr.hbm [resolvable:$true] %s107_s12 }
  0x14   :  { %85 = dma.hbm_to_vmem [thread:$0]  %s78_s27, 6144, %s80_s29, [#allocation12], %s3113_s25, %s3113_s25, %s3114_s26  }
  0x15   :  { %s3122_s2 = smov [#allocation16]  }
  0x16   :  { %s109_s13 = sshll.u32 %s3122_s2, 4  ;;  %s110_s13 = int_to_ptr.vmem [resolvable:$true] %s109_s13 }
  0x17   :  { %115 = dma.hbm_to_vmem [thread:$0]  %s108_s12, 2048, %s110_s13, [#allocation15], %s3118_s18, %s3118_s18, %s3119_s6  }
  0x18   :  { %3102 = dma.done.wait [#allocation6], 1024  }
  0x19   :  { %3103 = vsyncadd [#allocation6], 4294966272 }
  0x1a   :  { %3104 = dma.done.wait [#allocation9], 12288  }
  0x1b   :  { %3105 = vsyncadd [#allocation9], 4294955008 }
  0x1c   :  { %3106 = dma.done.wait [#allocation12], 6192  }
  0x1d   :  { %3107 = vsyncadd [#allocation12], 4294961104 }
  0x1e   :  { %3108 = dma.done.wait [#allocation15], 8192  }
  0x1f   :  { %3109 = vsyncadd [#allocation15], 4294959104  ;;  %v3224_v0 = vld [vmem:[#allocation10 + $0x168] sm:$0xff]  ;;  %v3226_v1 = vld [vmem:[#allocation10 + $0x150] sm:$0xff]  ;;  %v4783_v49 = vmov 0.0   ;;  %s2565_s21 = sshll.u32 %s4782_s11, 4  ;;  %s2566_s21 = int_to_ptr.hbm [resolvable:$true] %s2565_s21 }
  0x20   :  { %v199_v2 = vld [vmem:[#allocation8 + $0x168] sm:$0xff]  ;;  %412 = vmatpush.msra.mxu3 %v3224_v0  ;;  %v196_v3 = vld [vmem:[#allocation8 + $0x150] sm:$0xff]  ;;  %v3229_v4 = vld [vmem:[#allocation10 + $0x138] sm:$0xff] }
  0x21   :  { %2620 = vmatpush.msra.mxu1 %v199_v2  ;;  %v193_v5 = vld [vmem:[#allocation8 + $0x138] sm:$0xff]  ;;  %210 = vmatpush.msra.mxu0 %v199_v2  ;;  %v3232_v6 = vld [vmem:[#allocation10 + $0x120] sm:$0xff]  ;;  %v3235_v8 = vld [vmem:[#allocation10 + $0x108] sm:$0xff] }
  0x22   :  { %413 = vmatpush.msra.mxu3 %v3226_v1  ;;  %v190_v7 = vld [vmem:[#allocation8 + $0x120] sm:$0xff]  ;;  %v187_v9 = vld [vmem:[#allocation8 + $0x108] sm:$0xff]  ;;  %v3238_v10 = vld [vmem:[#allocation10 + $0xf0] sm:$0xff] }
  0x23   :  { %2621 = vmatpush.msra.mxu1 %v196_v3  ;;  %211 = vmatpush.msra.mxu0 %v196_v3  ;;  %v184_v11 = vld [vmem:[#allocation8 + $0xf0] sm:$0xff]  ;;  %v3241_v12 = vld [vmem:[#allocation10 + $0xd8] sm:$0xff]  ;;  %v3244_v14 = vld [vmem:[#allocation10 + $0xc0] sm:$0xff] }
  0x24   :  { %414 = vmatpush.msra.mxu3 %v3229_v4  ;;  %v181_v13 = vld [vmem:[#allocation8 + $0xd8] sm:$0xff]  ;;  %v178_v15 = vld [vmem:[#allocation8 + $0xc0] sm:$0xff]  ;;  %v3247_v18 = vld [vmem:[#allocation10 + $0xa8] sm:$0xff] }
  0x25   :  { %2622 = vmatpush.msra.mxu1 %v193_v5  ;;  %212 = vmatpush.msra.mxu0 %v193_v5  ;;  %v201_v16 = vld [vmem:[#allocation8 + $0x178] sm:$0xff]  ;;  %v198_v17 = vld [vmem:[#allocation8 + $0x160] sm:$0xff]  ;;  %v175_v19 = vld [vmem:[#allocation8 + $0xa8] sm:$0xff] }
  0x26   :  { %415 = vmatpush.msra.mxu3 %v3232_v6  ;;  %292 = vmatpush.msra.mxu2 %v201_v16  ;;  %v195_v20 = vld [vmem:[#allocation8 + $0x148] sm:$0xff]  ;;  %v3250_v21 = vld [vmem:[#allocation10 + $0x90] sm:$0xff]  ;;  %v3253_v24 = vld [vmem:[#allocation10 + $0x78] sm:$0xff] }
  0x27   :  { %2623 = vmatpush.msra.mxu1 %v190_v7  ;;  %213 = vmatpush.msra.mxu0 %v190_v7  ;;  %v172_v22 = vld [vmem:[#allocation8 + $0x90] sm:$0xff]  ;;  %v169_v25 = vld [vmem:[#allocation8 + $0x78] sm:$0xff]  ;;  %v3256_v27 = vld [vmem:[#allocation10 + $0x60] sm:$0xff] }
  0x28   :  { %416 = vmatpush.msra.mxu3 %v3235_v8  ;;  %293 = vmatpush.msra.mxu2 %v198_v17  ;;  %v192_v23 = vld [vmem:[#allocation8 + $0x130] sm:$0xff]  ;;  %v189_v26 = vld [vmem:[#allocation8 + $0x118] sm:$0xff]  ;;  %v166_v28 = vld [vmem:[#allocation8 + $0x60] sm:$0xff] }
  0x29   :  { %2624 = vmatpush.msra.mxu1 %v187_v9  ;;  %214 = vmatpush.msra.mxu0 %v187_v9  ;;  %v186_v29 = vld [vmem:[#allocation8 + $0x100] sm:$0xff]  ;;  %v3259_v30 = vld [vmem:[#allocation10 + $0x48] sm:$0xff]  ;;  %v3262_v33 = vld [vmem:[#allocation10 + $0x30] sm:$0xff] }
  0x2a   :  { %417 = vmatpush.msra.mxu3 %v3238_v10  ;;  %294 = vmatpush.msra.mxu2 %v195_v20  ;;  %v163_v31 = vld [vmem:[#allocation8 + $0x48] sm:$0xff]  ;;  %v160_v34 = vld [vmem:[#allocation8 + $0x30] sm:$0xff]  ;;  %v3265_v36 = vld [vmem:[#allocation10 + $0x18] sm:$0xff] }
  0x2b   :  { %2625 = vmatpush.msra.mxu1 %v184_v11  ;;  %215 = vmatpush.msra.mxu0 %v184_v11  ;;  %v183_v32 = vld [vmem:[#allocation8 + $0xe8] sm:$0xff]  ;;  %v180_v35 = vld [vmem:[#allocation8 + $0xd0] sm:$0xff]  ;;  %4825 = vst [vmem:[#allocation23_spill] sm:$0xff] %v3265_v36  ;;  %v157_v37 = vld [vmem:[#allocation8 + $0x18] sm:$0xff] }
  0x2c   :  { %418 = vmatpush.msra.mxu3 %v3241_v12  ;;  %295 = vmatpush.msra.mxu2 %v192_v23  ;;  %v177_v38 = vld [vmem:[#allocation8 + $0xb8] sm:$0xff]  ;;  %v3268_v39 = vld [vmem:[#allocation10] sm:$0xff]  ;;  %v3271_v41 = vld [vmem:[#allocation10 + $0x170] sm:$0xff] }
  0x2d   :  { %2626 = vmatpush.msra.mxu1 %v181_v13  ;;  %216 = vmatpush.msra.mxu0 %v181_v13  ;;  %4826 = vst [vmem:[#allocation24_spill] sm:$0xff] %v3268_v39  ;;  %v154_v40 = vld [vmem:[#allocation8] sm:$0xff]  ;;  %v200_v43 = vld [vmem:[#allocation8 + $0x170] sm:$0xff]  ;;  %v3276_v44 = vld [vmem:[#allocation10 + $0x158] sm:$0xff] }
  0x2e   :  { %419 = vmatpush.msra.mxu3 %v3244_v14  ;;  %296 = vmatpush.msra.mxu2 %v189_v26  ;;  %v3273_v42 = vld [vmem:[#allocation5 + $0x20] sm:$0xff]  ;;  %v197_v45 = vld [vmem:[#allocation8 + $0x158] sm:$0xff]  ;;  %v3284_v48 = vld [vmem:[#allocation10 + $0x128] sm:$0xff] }
  0x2f   :  { %2627 = vmatpush.msra.mxu1 %v178_v15  ;;  %217 = vmatpush.msra.mxu0 %v178_v15  ;;  %v3280_v46 = vld [vmem:[#allocation5] sm:$0xff]  ;;  %v3287_v50 = vld [vmem:[#allocation10 + $0x178] sm:$0xff]  ;;  %v191_v54 = vld [vmem:[#allocation8 + $0x128] sm:$0xff] }
  0x30   :  { %420 = vmatpush.msra.mxu3 %v3247_v18  ;;  %297 = vmatpush.msra.mxu2 %v186_v29  ;;  %v3282_v47 = vld [vmem:[#allocation10 + $0x140] sm:$0xff]  ;;  %v171_v55 = vld [vmem:[#allocation8 + $0x88] sm:$0xff]  ;;  %v3295_v56 = vld [vmem:[#allocation10 + $0x110] sm:$0xff] }
  0x31   :  { %2628 = vmatpush.msra.mxu1 %v175_v19  ;;  %218 = vmatpush.msra.mxu0 %v175_v19  ;;  %v194_v51 = vld [vmem:[#allocation8 + $0x140] sm:$0xff]  ;;  %v3297_v57 = vld [vmem:[#allocation5 + $0x28] sm:$0xff]  ;;  %v188_v58 = vld [vmem:[#allocation8 + $0x110] sm:$0xff] }
  0x32   :  { %421 = vmatpush.msra.mxu3 %v3250_v21  ;;  %298 = vmatpush.msra.mxu2 %v183_v32  ;;  %v174_v52 = vld [vmem:[#allocation8 + $0xa0] sm:$0xff]  ;;  %v3301_v59 = vld [vmem:[#allocation10 + $0x148] sm:$0xff]  ;;  %v3303_v60 = vld [vmem:[#allocation10 + $0xf8] sm:$0xff] }
  0x33   :  { %2629 = vmatpush.msra.mxu1 %v172_v22  ;;  %219 = vmatpush.msra.mxu0 %v172_v22  ;;  %v3291_v53 = vld [vmem:[#allocation10 + $0x160] sm:$0xff]  ;;  %v168_v61 = vld [vmem:[#allocation8 + $0x70] sm:$0xff]  ;;  %v185_v62 = vld [vmem:[#allocation8 + $0xf8] sm:$0xff] }
  0x34   :  { %422 = vmatpush.msra.mxu3 %v3253_v24  ;;  %299 = vmatpush.msra.mxu2 %v180_v35  ;;  %v3307_v63 = vld [vmem:[#allocation10 + $0x130] sm:$0xff]  ;;  %v3309_v2 = vld [vmem:[#allocation10 + $0xe0] sm:$0xff]  ;;  %v3312_v3 = vld [vmem:[#allocation5 + $0x8] sm:$0xff] }
  0x35   :  { %2630 = vmatpush.msra.mxu1 %v169_v25  ;;  %220 = vmatpush.msra.mxu0 %v169_v25  ;;  %v182_v5 = vld [vmem:[#allocation8 + $0xe0] sm:$0xff]  ;;  %v3315_v7 = vld [vmem:[#allocation10 + $0x118] sm:$0xff]  ;;  %v3317_v9 = vld [vmem:[#allocation10 + $0xc8] sm:$0xff] }
  0x36   :  { %423 = vmatpush.msra.mxu3 %v3256_v27  ;;  %300 = vmatpush.msra.mxu2 %v177_v38  ;;  %v165_v11 = vld [vmem:[#allocation8 + $0x58] sm:$0xff]  ;;  %v179_v13 = vld [vmem:[#allocation8 + $0xc8] sm:$0xff]  ;;  %v3322_v15 = vld [vmem:[#allocation10 + $0x100] sm:$0xff] }
  0x37   :  { %2631 = vmatpush.msra.mxu1 %v166_v28  ;;  %221 = vmatpush.msra.mxu0 %v166_v28  ;;  %v3324_v16 = vld [vmem:[#allocation10 + $0xb0] sm:$0xff]  ;;  %v3330_v20 = vld [vmem:[#allocation10 + $0xe8] sm:$0xff]  ;;  %v3332_v22 = vld [vmem:[#allocation10 + $0x98] sm:$0xff] }
  0x38   :  { %424 = vmatpush.msra.mxu3 %v3259_v30  ;;  %301 = vmatpush.msra.mxu2 %v174_v52  ;;  %v3327_v17 = vld [vmem:[#allocation5 + $0x30] sm:$0xff]  ;;  %v162_v23 = vld [vmem:[#allocation8 + $0x40] sm:$0xff]  ;;  %v173_v25 = vld [vmem:[#allocation8 + $0x98] sm:$0xff] }
  0x39   :  { %2632 = vmatpush.msra.mxu1 %v163_v31  ;;  %222 = vmatpush.msra.mxu0 %v163_v31  ;;  %v176_v19 = vld [vmem:[#allocation8 + $0xb0] sm:$0xff]  ;;  %v3339_v28 = vld [vmem:[#allocation10 + $0x80] sm:$0xff]  ;;  %v3345_v32 = vld [vmem:[#allocation10 + $0xb8] sm:$0xff] }
  0x3a   :  { %425 = vmatpush.msra.mxu3 %v3262_v33  ;;  %302 = vmatpush.msra.mxu2 %v171_v55  ;;  %v3337_v26 = vld [vmem:[#allocation10 + $0xd0] sm:$0xff]  ;;  %v170_v31 = vld [vmem:[#allocation8 + $0x80] sm:$0xff]  ;;  %v159_v35 = vld [vmem:[#allocation8 + $0x28] sm:$0xff] }
  0x3b   :  { %2633 = vmatpush.msra.mxu1 %v160_v34  ;;  %223 = vmatpush.msra.mxu0 %v160_v34  ;;  %v3342_v29 = vld [vmem:[#allocation5 + $0x10] sm:$0xff]  ;;  %v3347_v34 = vld [vmem:[#allocation10 + $0x68] sm:$0xff]  ;;  %v3352_v38 = vld [vmem:[#allocation10 + $0xa0] sm:$0xff] }
  0x3c   :  { %426 = vmatpush.msra.mxu3 %v3265_v36  ;;  %303 = vmatpush.msra.mxu2 %v168_v61  ;;  %v3362_v52 = vld [vmem:[#allocation10 + $0x38] sm:$0xff]  ;;  %v3369_v61 = vld [vmem:[#allocation10 + $0x20] sm:$0xff] }
  0x3d   :  { %2634 = vmatpush.msra.mxu1 %v157_v37  ;;  %224 = vmatpush.msra.mxu0 %v157_v37  ;;  %v167_v37 = vld [vmem:[#allocation8 + $0x68] sm:$0xff]  ;;  %v161_v55 = vld [vmem:[#allocation8 + $0x38] sm:$0xff]  ;;  %4827 = vst [vmem:[#allocation25_spill] sm:$0xff] %v3369_v61 }
  0x3e   :  { %427 = vmatpush.msra.mxu3 %v3268_v39  ;;  %304 = vmatpush.msra.mxu2 %v165_v11  ;;  %v3375_v11 = vld [vmem:[#allocation10 + $0x58] sm:$0xff] }
  0x3f   :  { %2635 = vmatpush.msra.mxu1 %v154_v40  ;;  %428 = vmatmul.f32.vlgmr.msra.gmra.mxu3 %v4783_v49 }
  0x40   :  { %432 = vmatpush.msrb.mxu3 %v3271_v41  ;;  %238 = vmatmul.f32.vlgmr.msra.gmra.mxu1 %v3273_v42 }
  0x41   :  { %251 = vmatpush.msrb.mxu1 %v200_v43  ;;  %225 = vmatpush.msra.mxu0 %v154_v40  ;;  %v3354_v40 = vld [vmem:[#allocation10 + $0x50] sm:$0xff]  ;;  %v3357_v43 = vld [vmem:[#allocation5 + $0x38] sm:$0xff] }
  0x42   :  { %433 = vmatpush.msrb.mxu3 %v3276_v44  ;;  %226 = vmatmul.f32.vlgmr.msra.gmra.mxu0 %v3280_v46 }
  0x43   :  { %252 = vmatpush.msrb.mxu1 %v197_v45  ;;  %452 = vmatpush.msrb.mxu0 %v3287_v50  ;;  %v164_v45 = vld [vmem:[#allocation8 + $0x50] sm:$0xff] }
  0x44   :  { %434 = vmatpush.msrb.mxu3 %v3282_v47  ;;  %305 = vmatpush.msra.mxu2 %v162_v23  ;;  %v3383_v23 = vld [vmem:[#allocation10 + $0x40] sm:$0xff] }
  0x45   :  { %253 = vmatpush.msrb.mxu1 %v194_v51  ;;  %453 = vmatpush.msrb.mxu0 %v3291_v53  ;;  %v3360_v51 = vld [vmem:[#allocation10 + $0x88] sm:$0xff] }
  0x46   :  { %435 = vmatpush.msrb.mxu3 %v3284_v48  ;;  %306 = vmatpush.msra.mxu2 %v159_v35 }
  0x47   :  { %254 = vmatpush.msrb.mxu1 %v191_v54  ;;  %454 = vmatpush.msrb.mxu0 %v3301_v59  ;;  %v156_v54 = vld [vmem:[#allocation8 + $0x10] sm:$0xff] }
  0x48   :  { %436 = vmatpush.msrb.mxu3 %v3295_v56  ;;  %241 = vmatmul.f32.gmra.mxu1 %v3297_v57 }
  0x49   :  { %255 = vmatpush.msrb.mxu1 %v188_v58  ;;  %455 = vmatpush.msrb.mxu0 %v3307_v63  ;;  %v3367_v58 = vld [vmem:[#allocation10 + $0x70] sm:$0xff] }
  0x4a   :  { %437 = vmatpush.msrb.mxu3 %v3303_v60  ;;  %229 = vmatmul.f32.gmra.mxu0 %v3312_v3 }
  0x4b   :  { %256 = vmatpush.msrb.mxu1 %v185_v62  ;;  %456 = vmatpush.msrb.mxu0 %v3315_v7  ;;  %v3372_v62 = vld [vmem:[#allocation5 + $0x18] sm:$0xff] }
  0x4c   :  { %438 = vmatpush.msrb.mxu3 %v3309_v2  ;;  %307 = vmatpush.msra.mxu2 %v156_v54 }
  0x4d   :  { %257 = vmatpush.msrb.mxu1 %v182_v5  ;;  %457 = vmatpush.msrb.mxu0 %v3322_v15  ;;  %v158_v5 = vld [vmem:[#allocation8 + $0x20] sm:$0xff] }
  0x4e   :  { %439 = vmatpush.msrb.mxu3 %v3317_v9  ;;  %308 = vmatmul.f32.vlgmr.msra.gmra.mxu2 %v3280_v46 }
  0x4f   :  { %258 = vmatpush.msrb.mxu1 %v179_v13  ;;  %458 = vmatpush.msrb.mxu0 %v3330_v20  ;;  %v3377_v13 = vld [vmem:[#allocation10 + $0x8] sm:$0xff] }
  0x50   :  { %440 = vmatpush.msrb.mxu3 %v3324_v16  ;;  %244 = vmatmul.f32.gmra.mxu1 %v3327_v17  ;;  %4828 = vst [vmem:[#allocation26_spill] sm:$0xff] %v3377_v13 }
  0x51   :  { %259 = vmatpush.msrb.mxu1 %v176_v19  ;;  %459 = vmatpush.msrb.mxu0 %v3337_v26  ;;  %v155_v19 = vld [vmem:[#allocation8 + $0x8] sm:$0xff] }
  0x52   :  { %441 = vmatpush.msrb.mxu3 %v3332_v22  ;;  %232 = vmatmul.f32.gmra.mxu0 %v3342_v29 }
  0x53   :  { %260 = vmatpush.msrb.mxu1 %v173_v25  ;;  %460 = vmatpush.msrb.mxu0 %v3345_v32  ;;  %v3388_v25 = vld [vmem:[#allocation10 + $0x28] sm:$0xff] }
  0x54   :  { %442 = vmatpush.msrb.mxu3 %v3339_v28  ;;  %4829 = vst [vmem:[#allocation27_spill] sm:$0xff] %v3388_v25  ;;  %550 = vmatpush.msrb.mxu2 %v3271_v41 }
  0x55   :  { %261 = vmatpush.msrb.mxu1 %v170_v31  ;;  %461 = vmatpush.msrb.mxu0 %v3352_v38  ;;  %v3392_v31 = vld [vmem:[#allocation10 + $0x10] sm:$0xff] }
  0x56   :  { %443 = vmatpush.msrb.mxu3 %v3347_v34  ;;  %4830 = vst [vmem:[#allocation28_spill] sm:$0xff] %v3392_v31  ;;  %551 = vmatpush.msrb.mxu2 %v3276_v44 }
  0x57   :  { %262 = vmatpush.msrb.mxu1 %v167_v37  ;;  %462 = vmatpush.msrb.mxu0 %v3360_v51 }
  0x58   :  { %444 = vmatpush.msrb.mxu3 %v3354_v40  ;;  %247 = vmatmul.f32.gmra.mxu1 %v3357_v43 }
  0x59   :  { %263 = vmatpush.msrb.mxu1 %v164_v45  ;;  %463 = vmatpush.msrb.mxu0 %v3367_v58 }
  0x5a   :  { %445 = vmatpush.msrb.mxu3 %v3362_v52  ;;  %235 = vmatmul.f32.gmra.mxu0 %v3372_v62 }
  0x5b   :  { %264 = vmatpush.msrb.mxu1 %v161_v55  ;;  %464 = vmatpush.msrb.mxu0 %v3375_v11 }
  0x5c   :  { %446 = vmatpush.msrb.mxu3 %v3369_v61  ;;  %311 = vmatmul.f32.gmra.mxu2 %v3312_v3 }
  0x5d   :  { %265 = vmatpush.msrb.mxu1 %v158_v5  ;;  %465 = vmatpush.msrb.mxu0 %v3383_v23 }
  0x5e   :  { %447 = vmatpush.msrb.mxu3 %v3377_v13  ;;  %552 = vmatpush.msrb.mxu2 %v3282_v47 }
  0x5f   :  { %448 = vmatmul.f32.vlgmr.msrb.gmra.mxu3 %v4783_v49  ;;  %266 = vmatpush.msrb.mxu1 %v155_v19 }
  0x60   :  { %267 = vmatmul.f32.vlgmr.msrb.gmra.mxu1 %v3280_v46  ;;  %466 = vmatpush.msrb.mxu0 %v3388_v25 }
  0x61   :  { %530 = vmatpush.msra.mxu1 %v3224_v0  ;;  %570 = vmatpush.msra.mxu3 %v3287_v50 }
  0x62   :  { %467 = vmatpush.msrb.mxu0 %v3392_v31  ;;  %553 = vmatpush.msrb.mxu2 %v3284_v48 }
  0x63   :  { %531 = vmatpush.msra.mxu1 %v3226_v1  ;;  %571 = vmatpush.msra.mxu3 %v3291_v53 }
  0x64   :  { %468 = vmatmul.f32.vlgmr.msrb.gmra.mxu0 %v4783_v49  ;;  %554 = vmatpush.msrb.mxu2 %v3295_v56 }
  0x65   :  { %532 = vmatpush.msra.mxu1 %v3229_v4  ;;  %572 = vmatpush.msra.mxu3 %v3301_v59 }
  0x66   :  { %646 = vmatpush.msra.mxu0 %v3224_v0  ;;  %555 = vmatpush.msrb.mxu2 %v3303_v60 }
  0x67   :  { %533 = vmatpush.msra.mxu1 %v3232_v6  ;;  %573 = vmatpush.msra.mxu3 %v3307_v63 }
  0x68   :  { %270 = vmatmul.f32.gmra.mxu1 %v3312_v3  ;;  %647 = vmatpush.msra.mxu0 %v3226_v1 }
  0x69   :  { %534 = vmatpush.msra.mxu1 %v3235_v8  ;;  %574 = vmatpush.msra.mxu3 %v3315_v7 }
  0x6a   :  { %314 = vmatmul.f32.gmra.mxu2 %v3342_v29  ;;  %648 = vmatpush.msra.mxu0 %v3229_v4 }
  0x6b   :  { %535 = vmatpush.msra.mxu1 %v3238_v10  ;;  %575 = vmatpush.msra.mxu3 %v3322_v15 }
  0x6c   :  { %556 = vmatpush.msrb.mxu2 %v3309_v2  ;;  %649 = vmatpush.msra.mxu0 %v3232_v6 }
  0x6d   :  { %536 = vmatpush.msra.mxu1 %v3241_v12  ;;  %576 = vmatpush.msra.mxu3 %v3330_v20 }
  0x6e   :  { %557 = vmatpush.msrb.mxu2 %v3317_v9  ;;  %650 = vmatpush.msra.mxu0 %v3235_v8 }
  0x6f   :  { %537 = vmatpush.msra.mxu1 %v3244_v14  ;;  %577 = vmatpush.msra.mxu3 %v3337_v26 }
  0x70   :  { %273 = vmatmul.f32.gmra.mxu1 %v3342_v29  ;;  %558 = vmatpush.msrb.mxu2 %v3324_v16 }
  0x71   :  { %538 = vmatpush.msra.mxu1 %v3247_v18  ;;  %578 = vmatpush.msra.mxu3 %v3345_v32 }
  0x72   :  { %559 = vmatpush.msrb.mxu2 %v3332_v22  ;;  %651 = vmatpush.msra.mxu0 %v3238_v10 }
  0x73   :  { %539 = vmatpush.msra.mxu1 %v3250_v21  ;;  %579 = vmatpush.msra.mxu3 %v3352_v38 }
  0x74   :  { %317 = vmatmul.f32.gmra.mxu2 %v3372_v62  ;;  %652 = vmatpush.msra.mxu0 %v3241_v12 }
  0x75   :  { %540 = vmatpush.msra.mxu1 %v3253_v24  ;;  %580 = vmatpush.msra.mxu3 %v3360_v51 }
  0x76   :  { %560 = vmatpush.msrb.mxu2 %v3339_v28  ;;  %653 = vmatpush.msra.mxu0 %v3244_v14 }
  0x77   :  { %541 = vmatpush.msra.mxu1 %v3256_v27  ;;  %581 = vmatpush.msra.mxu3 %v3367_v58 }
  0x78   :  { %276 = vmatmul.f32.gmra.mxu1 %v3372_v62  ;;  %561 = vmatpush.msrb.mxu2 %v3347_v34 }
  0x79   :  { %542 = vmatpush.msra.mxu1 %v3259_v30  ;;  %582 = vmatpush.msra.mxu3 %v3375_v11 }
  0x7a   :  { %562 = vmatpush.msrb.mxu2 %v3354_v40  ;;  %654 = vmatpush.msra.mxu0 %v3247_v18 }
  0x7b   :  { %543 = vmatpush.msra.mxu1 %v3262_v33  ;;  %583 = vmatpush.msra.mxu3 %v3383_v23 }
  0x7c   :  { %563 = vmatpush.msrb.mxu2 %v3362_v52  ;;  %655 = vmatpush.msra.mxu0 %v3250_v21 }
  0x7d   :  { %544 = vmatpush.msra.mxu1 %v3265_v36  ;;  %320 = vmatmul.f32.gmra.mxu2 %v3273_v42 }
  0x7e   :  { %584 = vmatpush.msra.mxu3 %v3388_v25  ;;  %564 = vmatpush.msrb.mxu2 %v3369_v61 }
  0x7f   :  { %545 = vmatpush.msra.mxu1 %v3268_v39  ;;  %656 = vmatpush.msra.mxu0 %v3253_v24 }
  0x80   :  { %279 = vmatmul.f32.gmra.mxu1 %v3273_v42  ;;  %585 = vmatpush.msra.mxu3 %v3392_v31  ;;  %v202_v42 = vld [vmem:[#allocation11] sm:$0x7] }
  0x81   :  { %565 = vmatpush.msrb.mxu2 %v3377_v13  ;;  %666 = vmatpush.msrb.mxu1 %v3271_v41 }
  0x82   :  { %762 = vmatpush.msrb.mxu3 %v3224_v0  ;;  %657 = vmatpush.msra.mxu0 %v3256_v27 }
  0x83   :  { %686 = vmatpush.msra.mxu2 %v3287_v50  ;;  %667 = vmatpush.msrb.mxu1 %v3276_v44 }
  0x84   :  { %763 = vmatpush.msrb.mxu3 %v3226_v1  ;;  %658 = vmatpush.msra.mxu0 %v3259_v30 }
  0x85   :  { %687 = vmatpush.msra.mxu2 %v3291_v53  ;;  %668 = vmatpush.msrb.mxu1 %v3282_v47 }
  0x86   :  { %323 = vmatmul.f32.gmra.mxu2 %v3297_v57  ;;  %764 = vmatpush.msrb.mxu3 %v3229_v4 }
  0x87   :  { %688 = vmatpush.msra.mxu2 %v3301_v59  ;;  %669 = vmatpush.msrb.mxu1 %v3284_v48 }
  0x88   :  { %282 = vmatmul.f32.gmra.mxu1 %v3297_v57  ;;  %765 = vmatpush.msrb.mxu3 %v3232_v6  ;;  %v3541_v57 = vperm.slane %v202_v42, 0 }
  0x89   :  { %689 = vmatpush.msra.mxu2 %v3307_v63  ;;  %670 = vmatpush.msrb.mxu1 %v3295_v56 }
  0x8a   :  { %659 = vmatpush.msra.mxu0 %v3262_v33  ;;  %766 = vmatpush.msrb.mxu3 %v3235_v8  ;;  %4832 = vst [vmem:[#allocation30_spill] sm:$0xff] %v3541_v57 }
  0x8b   :  { %690 = vmatpush.msra.mxu2 %v3315_v7  ;;  %671 = vmatpush.msrb.mxu1 %v3303_v60 }
  0x8c   :  { %660 = vmatpush.msra.mxu0 %v3265_v36  ;;  %767 = vmatpush.msrb.mxu3 %v3238_v10 }
  0x8d   :  { %691 = vmatpush.msra.mxu2 %v3322_v15  ;;  %672 = vmatpush.msrb.mxu1 %v3309_v2 }
  0x8e   :  { %326 = vmatmul.f32.gmra.mxu2 %v3327_v17  ;;  %661 = vmatpush.msra.mxu0 %v3268_v39 }
  0x8f   :  { %692 = vmatpush.msra.mxu2 %v3330_v20  ;;  %673 = vmatpush.msrb.mxu1 %v3317_v9 }
  0x90   :  { %285 = vmatmul.f32.gmra.mxu1 %v3327_v17  ;;  %782 = vmatpush.msrb.mxu0 %v3271_v41 }
  0x91   :  { %693 = vmatpush.msra.mxu2 %v3337_v26  ;;  %674 = vmatpush.msrb.mxu1 %v3324_v16 }
  0x92   :  { %783 = vmatpush.msrb.mxu0 %v3276_v44  ;;  %768 = vmatpush.msrb.mxu3 %v3241_v12 }
  0x93   :  { %694 = vmatpush.msra.mxu2 %v3345_v32  ;;  %675 = vmatpush.msrb.mxu1 %v3332_v22 }
  0x94   :  { %784 = vmatpush.msrb.mxu0 %v3282_v47  ;;  %769 = vmatpush.msrb.mxu3 %v3244_v14 }
  0x95   :  { %695 = vmatpush.msra.mxu2 %v3352_v38  ;;  %676 = vmatpush.msrb.mxu1 %v3339_v28 }
  0x96   :  { %329 = vmatmul.f32.gmra.mxu2 %v3357_v43  ;;  %785 = vmatpush.msrb.mxu0 %v3284_v48 }
  0x97   :  { %696 = vmatpush.msra.mxu2 %v3360_v51  ;;  %677 = vmatpush.msrb.mxu1 %v3347_v34 }
  0x98   :  { %288 = vmatmul.f32.gmra.mxu1 %v3357_v43  ;;  %786 = vmatpush.msrb.mxu0 %v3295_v56 }
  0x99   :  { %697 = vmatpush.msra.mxu2 %v3367_v58  ;;  %678 = vmatpush.msrb.mxu1 %v3354_v40 }
  0x9a   :  { %770 = vmatpush.msrb.mxu3 %v3247_v18  ;;  %787 = vmatpush.msrb.mxu0 %v3303_v60 }
  0x9b   :  { %698 = vmatpush.msra.mxu2 %v3375_v11  ;;  %679 = vmatpush.msrb.mxu1 %v3362_v52 }
  0x9c   :  { %771 = vmatpush.msrb.mxu3 %v3250_v21  ;;  %788 = vmatpush.msrb.mxu0 %v3309_v2 }
  0x9d   :  { %699 = vmatpush.msra.mxu2 %v3383_v23  ;;  %680 = vmatpush.msrb.mxu1 %v3369_v61 }
  0x9e   :  { %772 = vmatpush.msrb.mxu3 %v3253_v24  ;;  %789 = vmatpush.msrb.mxu0 %v3317_v9 }
  0x9f   :  { %700 = vmatpush.msra.mxu2 %v3388_v25  ;;  %681 = vmatpush.msrb.mxu1 %v3377_v13 }
  0xa0   :  { %773 = vmatpush.msrb.mxu3 %v3256_v27  ;;  %790 = vmatpush.msrb.mxu0 %v3324_v16 }
  0xa1   :  { %701 = vmatpush.msra.mxu2 %v3392_v31 }
  0xa2   :  { %774 = vmatpush.msrb.mxu3 %v3259_v30  ;;  %791 = vmatpush.msrb.mxu0 %v3332_v22 }
  0xa4   :  { %775 = vmatpush.msrb.mxu3 %v3262_v33  ;;  %792 = vmatpush.msrb.mxu0 %v3339_v28 }
  0xa6   :  { %776 = vmatpush.msrb.mxu3 %v3265_v36  ;;  %793 = vmatpush.msrb.mxu0 %v3347_v34 }
  0xa8   :  { %777 = vmatpush.msrb.mxu3 %v3268_v39  ;;  %794 = vmatpush.msrb.mxu0 %v3354_v40 }
  0xaa   :  { %795 = vmatpush.msrb.mxu0 %v3362_v52 }
  0xac   :  { %796 = vmatpush.msrb.mxu0 %v3369_v61 }
  0xae   :  { %797 = vmatpush.msrb.mxu0 %v3377_v13 }
  0xbd   :  { %v3539_v46 = vpop.f32.mrf.mxu1 }
  0xbe   :  { %4831 = vst [vmem:[#allocation29_spill] sm:$0xff] %v3539_v46 }
  0xbf   :  { %v227_v3 = vpop.f32.mrf.mxu0 }
  0xc0   :  { %v228_v17 = vadd.f32 %v227_v3, %v3541_v57 }
  0xc2   :  { %v429_v29 = vpop.f32.mrf.mxu3 }
  0xc3   :  { %v472_v37 = vadd.f32 %v429_v29, %v228_v17 }
  0xc5   :  { %v242_v35 = vpop.f32.mrf.mxu1  ;;  %v2588_v45 = vmul.f32 -1.442695, %v472_v37  ;;  %v3560_v37 = vperm.slane %v202_v42, 1 }
  0xc6   :  { %v3545_v43 = vadd.f32 %v242_v35, %v3541_v57 }
  0xc7   :  { %2652 = vpow2.f32 %v2588_v45  ;;  %v3547_v54 = vpop.f32.mrf.mxu0  ;;  %4839 = vst [vmem:[#allocation37_spill] sm:$0xff] %v3560_v37 }
  0xc8   :  { %4833 = vst [vmem:[#allocation31_spill] sm:$0xff] %v3545_v43 }
  0xc9   :  { %4834 = vst [vmem:[#allocation32_spill] sm:$0xff] %v3547_v54 }
  0xcd   :  { %v245_v55 = vpop.f32.mrf.mxu1  ;;  %v2653_v5 = vpop.eup %2652 }
  0xce   :  { %v3550_v62 = vadd.f32 %v245_v55, %v3541_v57  ;;  %v476_v19 = vadd.f32 1.0, %v2653_v5 }
  0xcf   :  { %v3552_v49 = vpop.f32.mrf.mxu0 }
  0xd0   :  { %4835 = vst [vmem:[#allocation33_spill] sm:$0xff] %v3550_v62  ;;  %2654 = vrcp.f32 %v476_v19  ;;  %vm482_vm0 = vweird.f32 %v476_v19 }
  0xd1   :  { %4836 = vst [vmem:[#allocation34_spill] sm:$0xff] %v3552_v49  ;;  %v309_v62 = vpop.f32.mrf.mxu2 }
  0xd5   :  { %v248_v3 = vpop.f32.mrf.mxu1 }
  0xd6   :  { %v3555_v46 = vadd.f32 %v248_v3, %v3541_v57  ;;  %v2655_v35 = vpop.eup %2654 }
  0xd7   :  { %v236_v17 = vpop.f32.mrf.mxu0  ;;  %v478_v43 = vmul.f32 %v2655_v35, %v476_v19  ;;  %vm483_vm1 = vweird.f32 %v2655_v35 }
  0xd8   :  { %4837 = vst [vmem:[#allocation35_spill] sm:$0xff] %v3555_v46  ;;  %v3558_v29 = vadd.f32 %v236_v17, %v3541_v57  ;;  %v488_v17 = vand.u32 2147483648, %v476_v19  ;;  %v486_v57 = vand.u32 2147483647, %v476_v19  ;;  %vm484_vm2 = vmor %vm482_vm0, %vm483_vm1 }
  0xd9   :  { %v479_v54 = vsub.f32 1.0, %v478_v43 }
  0xda   :  { %4838 = vst [vmem:[#allocation36_spill] sm:$0xff] %v3558_v29  ;;  %vm487_vm3 = vcmp.eq.f32.partialorder %v486_v57, 8.507059e+37 }
  0xdb   :  { %v480_v39 = vmul.f32 %v2655_v35, %v479_v54 }
  0xdd   :  { %v268_v45 = vpop.f32.mrf.mxu1  ;;  %v481_v29 = vadd.f32 %v2655_v35, %v480_v39 }
  0xde   :  { %v269_v55 = vadd.f32 %v268_v45, %v3560_v37  ;;  %v3570_v45 = vld [vmem:[%s4775_s4] ss:$0 sm:$0xff] }
  0xdf   :  { %v3565_v46 = vpop.f32.mrf.mxu2 }
  0xe0   :  { %4841 = vst [vmem:[#allocation39_spill] sm:$0xff] %v3565_v46 }
  0xe2   :  { %v449_v5 = vpop.f32.mrf.mxu3 }
  0xe3   :  { %v492_v49 = vadd.f32 %v449_v5, %v269_v55  ;;  %v469_v55 = vpop.f32.mrf.mxu0 }
  0xe4   :  { %v515_v5 = vadd.f32 %v3570_v45, %v469_v55 }
  0xe5   :  { %v2589_v13 = vmul.f32 -1.442695, %v492_v49  ;;  %v3563_v3 = vpop.f32.mrf.mxu1  ;;  %v489_v49 = vor.u32 1.1754944e-38, %v488_v17 }
  0xe6   :  { %4840 = vst [vmem:[#allocation38_spill] sm:$0xff] %v3563_v3  ;;  %v3573_v3 = vperm.slane %v202_v42, 2 }
  0xe7   :  { %2656 = vpow2.f32 %v2589_v13  ;;  %v485_v13 = vsel %vm484_vm2, %v2655_v35, %v481_v29 }
  0xe8   :  { %4842 = vst [vmem:[#allocation40_spill] sm:$0xff] %v3573_v3  ;;  %v490_v39 = vsel %vm487_vm3, %v489_v49, %v485_v13  ;;  %v310_v36 = vadd.f32 %v309_v62, %v3573_v3 }
  0xe9   :  { %v516_v61 = vmul.f32 %v515_v5, %v490_v39 }
  0xed   :  { %v2657_v43 = vpop.eup %2656  ;;  %v274_v46 = vpop.f32.mrf.mxu1 }
  0xee   :  { %v496_v54 = vadd.f32 1.0, %v2657_v43  ;;  %v3576_v19 = vadd.f32 %v274_v46, %v3560_v37  ;;  %v3578_v31 = vpop.f32.mrf.mxu2  ;;  %v517_v43 = vadd.f32 %v516_v61, %v310_v36 }
  0xef   :  { %4843 = vst [vmem:[#allocation41_spill] sm:$0xff] %v3578_v31 }
  0xf0   :  { %2658 = vrcp.f32 %v496_v54  ;;  %v508_v55 = vand.u32 2147483648, %v496_v54  ;;  %v506_v13 = vand.u32 2147483647, %v496_v54  ;;  %vm502_vm5 = vweird.f32 %v496_v54 }
  0xf1   :  { %2660 = vtanh.f32 %v517_v43 }
  0xf2   :  { %v509_v62 = vor.u32 1.1754944e-38, %v508_v55  ;;  %vm507_vm7 = vcmp.eq.f32.partialorder %v506_v13, 8.507059e+37 }
  0xf5   :  { %v277_v29 = vpop.f32.mrf.mxu1 }
  0xf6   :  { %v2659_v25 = vpop.eup %2658  ;;  %v3582_v35 = vadd.f32 %v277_v29, %v3560_v37 }
  0xf7   :  { %v498_v17 = vmul.f32 %v2659_v25, %v496_v54  ;;  %v318_v42 = vpop.f32.mrf.mxu2  ;;  %vm503_vm4 = vweird.f32 %v2659_v25  ;;  %v2661_v31 = vpop.eup %2660 }
  0xf8   :  { %4844 = vst [vmem:[#allocation42_spill] sm:$0xff] %v3582_v35  ;;  %v3585_v49 = vadd.f32 %v318_v42, %v3573_v3  ;;  %vm504_vm6 = vmor %vm502_vm5, %vm503_vm4 }
  0xf9   :  { %v499_v57 = vsub.f32 1.0, %v498_v17 }
  0xfa   :  { %4845 = vst [vmem:[#allocation43_spill] sm:$0xff] %v3585_v49 }
  0xfb   :  { %v500_v46 = vmul.f32 %v2659_v25, %v499_v57 }
  0xfd   :  { %v501_v5 = vadd.f32 %v2659_v25, %v500_v46  ;;  %v280_v39 = vpop.f32.mrf.mxu1 }
  0xfe   :  { %v3588_v29 = vadd.f32 %v280_v39, %v3560_v37 }
  0xff   :  { %v505_v36 = vsel %vm504_vm6, %v2659_v25, %v501_v5  ;;  %v4863_v5 = vld [vmem:[#allocation38_spill] sm:$0xff] }
 0x100   :  { %v510_v61 = vsel %vm507_vm7, %v509_v62, %v505_v36  ;;  %4846 = vst [vmem:[#allocation44_spill] sm:$0xff] %v3588_v29  ;;  %v321_v35 = vpop.f32.mrf.mxu2  ;;  %v272_v62 = vadd.f32 %v4863_v5, %v3560_v37 }
 0x101   :  { %v519_v17 = vsub.f32 1.0, %v510_v61  ;;  %v3591_v42 = vadd.f32 %v321_v35, %v3573_v3  ;;  %v521_v49 = vmul.f32 0.0, %v510_v61 }
 0x103   :  { %4847 = vst [vmem:[#allocation45_spill] sm:$0xff] %v3591_v42  ;;  %v520_v57 = vmul.f32 %v2661_v31, %v519_v17 }
 0x105   :  { %v3593_v43 = vadd.f32 %v521_v49, %v520_v57  ;;  %v283_v25 = vpop.f32.mrf.mxu1 }
 0x106   :  { %v3600_v54 = vadd.f32 %v283_v25, %v3560_v37 }
 0x107   :  { %4848 = vst [vmem:[#allocation46_spill] sm:$0xff] %v3593_v43  ;;  %546 = vmatmul.f32.vlgmr.msra.gmra.mxu1 %v3593_v43  ;;  %566 = vmatmul.f32.vlgmr.msrb.gmra.mxu2 %v3593_v43 }
 0x108   :  { %586 = vmatmul.f32.vlgmr.msra.gmra.mxu3 %v3593_v43  ;;  %802 = vmatpush.msra.mxu1 %v3287_v50  ;;  %4849 = vst [vmem:[#allocation47_spill] sm:$0xff] %v3600_v54 }
 0x109   :  { %v324_v55 = vpop.f32.mrf.mxu2  ;;  %878 = vmatpush.msrb.mxu2 %v3224_v0  ;;  %898 = vmatpush.msra.mxu3 %v3271_v41 }
 0x10a   :  { %v3605_v31 = vadd.f32 %v324_v55, %v3573_v3  ;;  %803 = vmatpush.msra.mxu1 %v3291_v53 }
 0x10b   :  { %879 = vmatpush.msrb.mxu2 %v3226_v1  ;;  %899 = vmatpush.msra.mxu3 %v3276_v44 }
 0x10c   :  { %4850 = vst [vmem:[#allocation48_spill] sm:$0xff] %v3605_v31  ;;  %804 = vmatpush.msra.mxu1 %v3301_v59 }
 0x10d   :  { %880 = vmatpush.msrb.mxu2 %v3229_v4  ;;  %900 = vmatpush.msra.mxu3 %v3282_v47  ;;  %v286_v0 = vpop.f32.mrf.mxu1 }
 0x10e   :  { %805 = vmatpush.msra.mxu1 %v3307_v63  ;;  %v3618_v35 = vadd.f32 %v286_v0, %v3560_v37 }
 0x10f   :  { %881 = vmatpush.msrb.mxu2 %v3232_v6  ;;  %901 = vmatpush.msra.mxu3 %v3284_v48  ;;  %v4853_v6 = vld [vmem:[#allocation27_spill] sm:$0xff] }
 0x110   :  { %806 = vmatpush.msra.mxu1 %v3315_v7  ;;  %4851 = vst [vmem:[#allocation49_spill] sm:$0xff] %v3618_v35 }
 0x111   :  { %v327_v1 = vpop.f32.mrf.mxu2  ;;  %882 = vmatpush.msrb.mxu2 %v3235_v8  ;;  %902 = vmatpush.msra.mxu3 %v3295_v56  ;;  %v4854_v8 = vld [vmem:[#allocation23_spill] sm:$0xff] }
 0x112   :  { %v3623_v4 = vadd.f32 %v327_v1, %v3573_v3  ;;  %807 = vmatpush.msra.mxu1 %v3322_v15 }
 0x113   :  { %883 = vmatpush.msrb.mxu2 %v3238_v10  ;;  %903 = vmatpush.msra.mxu3 %v3303_v60  ;;  %v4855_v10 = vld [vmem:[#allocation25_spill] sm:$0xff] }
 0x114   :  { %4852 = vst [vmem:[#allocation50_spill] sm:$0xff] %v3623_v4  ;;  %808 = vmatpush.msra.mxu1 %v3330_v20 }
 0x115   :  { %884 = vmatpush.msrb.mxu2 %v3241_v12  ;;  %904 = vmatpush.msra.mxu3 %v3309_v2  ;;  %v4856_v12 = vld [vmem:[#allocation28_spill] sm:$0xff] }
 0x116   :  { %809 = vmatpush.msra.mxu1 %v3337_v26 }
 0x117   :  { %885 = vmatpush.msrb.mxu2 %v3244_v14  ;;  %905 = vmatpush.msra.mxu3 %v3317_v9  ;;  %v4857_v14 = vld [vmem:[#allocation24_spill] sm:$0xff] }
 0x118   :  { %810 = vmatpush.msra.mxu1 %v3345_v32 }
 0x119   :  { %886 = vmatpush.msrb.mxu2 %v3247_v18  ;;  %906 = vmatpush.msra.mxu3 %v3324_v16  ;;  %v4858_v18 = vld [vmem:[#allocation26_spill] sm:$0xff] }
 0x11a   :  { %811 = vmatpush.msra.mxu1 %v3352_v38 }
 0x11b   :  { %887 = vmatpush.msrb.mxu2 %v3250_v21  ;;  %907 = vmatpush.msra.mxu3 %v3332_v22  ;;  %v3658_v21 = vpop.f32.mrf.mxu1 }
 0x11c   :  { %812 = vmatpush.msra.mxu1 %v3360_v51  ;;  %4859 = vst [vmem:[#allocation27_spill] sm:$0xff] %v3658_v21 }
 0x11d   :  { %888 = vmatpush.msrb.mxu2 %v3253_v24  ;;  %908 = vmatpush.msra.mxu3 %v3339_v28  ;;  %v3660_v24 = vpop.f32.mrf.mxu2 }
 0x11e   :  { %813 = vmatpush.msra.mxu1 %v3367_v58  ;;  %4860 = vst [vmem:[#allocation23_spill] sm:$0xff] %v3660_v24 }
 0x11f   :  { %889 = vmatpush.msrb.mxu2 %v3256_v27  ;;  %909 = vmatpush.msra.mxu3 %v3347_v34  ;;  %v4861_v27 = vld [vmem:[#allocation30_spill] sm:$0xff] }
 0x120   :  { %814 = vmatpush.msra.mxu1 %v3375_v11 }
 0x121   :  { %890 = vmatpush.msrb.mxu2 %v3259_v30  ;;  %910 = vmatpush.msra.mxu3 %v3354_v40  ;;  %v4862_v30 = vld [vmem:[#allocation32_spill] sm:$0xff] }
 0x122   :  { %815 = vmatpush.msra.mxu1 %v3383_v23 }
 0x123   :  { %891 = vmatpush.msrb.mxu2 %v3262_v33  ;;  %911 = vmatpush.msra.mxu3 %v3362_v52  ;;  %v231_v33 = vadd.f32 %v4862_v30, %v4861_v27 }
 0x124   :  { %816 = vmatpush.msra.mxu1 %v4853_v6 }
 0x125   :  { %892 = vmatpush.msrb.mxu2 %v4854_v8  ;;  %912 = vmatpush.msra.mxu3 %v4855_v10 }
 0x126   :  { %817 = vmatpush.msra.mxu1 %v4856_v12 }
 0x127   :  { %893 = vmatpush.msrb.mxu2 %v4857_v14  ;;  %913 = vmatpush.msra.mxu3 %v4858_v18 }
 0x184   :  { %v547_v49 = vpop.f32.mrf.mxu1 }
 0x185   :  { %v590_v46 = vadd.f32 %v547_v49, %v231_v33 }
 0x187   :  { %v2590_v13 = vmul.f32 -1.442695, %v590_v46 }
 0x189   :  { %2662 = vpow2.f32 %v2590_v13 }
 0x18a   :  { %v567_v36 = vpop.f32.mrf.mxu2 }
 0x18b   :  { %v610_v61 = vadd.f32 %v567_v36, %v272_v62  ;;  %v587_v46 = vpop.f32.mrf.mxu3 }
 0x18d   :  { %v2591_v39 = vmul.f32 -1.442695, %v610_v61 }
 0x18f   :  { %v2663_v17 = vpop.eup %2662  ;;  %2664 = vpow2.f32 %v2591_v39  ;;  %v630_v39 = vadd.f32 %v3570_v45, %v587_v46 }
 0x190   :  { %v594_v57 = vadd.f32 1.0, %v2663_v17  ;;  %v4864_v17 = vld [vmem:[#allocation39_spill] sm:$0xff] }
 0x192   :  { %2666 = vrcp.f32 %v594_v57  ;;  %v606_v14 = vand.u32 2147483648, %v594_v57  ;;  %v604_v33 = vand.u32 2147483647, %v594_v57  ;;  %vm600_vm9 = vweird.f32 %v594_v57 }
 0x194   :  { %v607_v62 = vor.u32 1.1754944e-38, %v606_v14  ;;  %vm605_vm11 = vcmp.eq.f32.partialorder %v604_v33, 8.507059e+37 }
 0x195   :  { %v2665_v25 = vpop.eup %2664 }
 0x196   :  { %v614_v55 = vadd.f32 1.0, %v2665_v25  ;;  %v313_v25 = vadd.f32 %v4864_v17, %v3573_v3 }
 0x198   :  { %v2667_v0 = vpop.eup %2666  ;;  %2668 = vrcp.f32 %v614_v55  ;;  %v624_v37 = vand.u32 2147483647, %v614_v55  ;;  %vm620_vm13 = vweird.f32 %v614_v55 }
 0x199   :  { %v596_v1 = vmul.f32 %v2667_v0, %v594_v57  ;;  %vm601_vm8 = vweird.f32 %v2667_v0 }
 0x19a   :  { %vm602_vm10 = vmor %vm600_vm9, %vm601_vm8  ;;  %vm625_vm15 = vcmp.eq.f32.partialorder %v624_v37, 8.507059e+37  ;;  %v3681_v37 = vld [vmem:[#allocation10 + $0x150] sm:$0xff] }
 0x19b   :  { %v597_v8 = vsub.f32 1.0, %v596_v1 }
 0x19d   :  { %v598_v30 = vmul.f32 %v2667_v0, %v597_v8  ;;  %v626_v8 = vand.u32 2147483648, %v614_v55 }
 0x19e   :  { %v2669_v49 = vpop.eup %2668 }
 0x19f   :  { %v616_v13 = vmul.f32 %v2669_v49, %v614_v55  ;;  %v599_v5 = vadd.f32 %v2667_v0, %v598_v30  ;;  %vm621_vm12 = vweird.f32 %v2669_v49  ;;  %v627_v57 = vor.u32 1.1754944e-38, %v626_v8 }
 0x1a0   :  { %vm622_vm14 = vmor %vm620_vm13, %vm621_vm12 }
 0x1a1   :  { %v617_v36 = vsub.f32 1.0, %v616_v13  ;;  %v603_v61 = vsel %vm602_vm10, %v2667_v0, %v599_v5 }
 0x1a2   :  { %v608_v1 = vsel %vm605_vm11, %v607_v62, %v603_v61 }
 0x1a3   :  { %v618_v24 = vmul.f32 %v2669_v49, %v617_v36  ;;  %v631_v21 = vmul.f32 %v630_v39, %v608_v1 }
 0x1a5   :  { %v619_v4 = vadd.f32 %v2669_v49, %v618_v24  ;;  %v632_v30 = vadd.f32 %v631_v21, %v313_v25  ;;  %v3676_v21 = vld [vmem:[#allocation10 + $0x168] sm:$0xff] }
 0x1a7   :  { %v623_v14 = vsel %vm622_vm14, %v2669_v49, %v619_v4  ;;  %2670 = vtanh.f32 %v632_v30  ;;  %v3686_v4 = vld [vmem:[#allocation10 + $0x138] sm:$0xff] }
 0x1a8   :  { %v628_v0 = vsel %vm625_vm15, %v627_v57, %v623_v14 }
 0x1a9   :  { %v634_v33 = vsub.f32 1.0, %v628_v0  ;;  %v636_v5 = vmul.f32 %v628_v0, %v3593_v43  ;;  %v4869_v0 = vld [vmem:[#allocation41_spill] sm:$0xff] }
 0x1ad   :  { %v2671_v46 = vpop.eup %2670 }
 0x1ae   :  { %v635_v13 = vmul.f32 %v2671_v46, %v634_v33  ;;  %v316_v33 = vadd.f32 %v4869_v0, %v3573_v3  ;;  %v3837_v0 = vld [vmem:[#allocation10 + $0x88] sm:$0xff] }
 0x1b0   :  { %v3670_v62 = vadd.f32 %v636_v5, %v635_v13 }
 0x1b2   :  { %4865 = vst [vmem:[#allocation25_spill] sm:$0xff] %v3670_v62  ;;  %662 = vmatmul.f32.vlgmr.msra.gmra.mxu0 %v3670_v62  ;;  %682 = vmatmul.f32.vlgmr.msrb.gmra.mxu1 %v3670_v62 }
 0x1b3   :  { %702 = vmatmul.f32.vlgmr.msra.gmra.mxu2 %v3670_v62  ;;  %918 = vmatpush.msra.mxu0 %v3287_v50  ;;  %v3691_v50 = vld [vmem:[#allocation10 + $0x120] sm:$0xff] }
 0x1b4   :  { %994 = vmatpush.msrb.mxu1 %v3676_v21  ;;  %1014 = vmatpush.msra.mxu2 %v3271_v41  ;;  %v3696_v41 = vld [vmem:[#allocation10 + $0x108] sm:$0xff] }
 0x1b5   :  { %919 = vmatpush.msra.mxu0 %v3291_v53  ;;  %v3716_v53 = vld [vmem:[#allocation10 + $0xa8] sm:$0xff] }
 0x1b6   :  { %995 = vmatpush.msrb.mxu1 %v3681_v37  ;;  %1015 = vmatpush.msra.mxu2 %v3276_v44  ;;  %v3701_v44 = vld [vmem:[#allocation10 + $0xf0] sm:$0xff] }
 0x1b7   :  { %920 = vmatpush.msra.mxu0 %v3301_v59  ;;  %v3726_v59 = vld [vmem:[#allocation10 + $0x78] sm:$0xff] }
 0x1b8   :  { %996 = vmatpush.msrb.mxu1 %v3686_v4  ;;  %1016 = vmatpush.msra.mxu2 %v3282_v47  ;;  %v3706_v47 = vld [vmem:[#allocation10 + $0xd8] sm:$0xff] }
 0x1b9   :  { %921 = vmatpush.msra.mxu0 %v3307_v63  ;;  %v3736_v63 = vld [vmem:[#allocation10 + $0x48] sm:$0xff] }
 0x1ba   :  { %997 = vmatpush.msrb.mxu1 %v3691_v50  ;;  %1017 = vmatpush.msra.mxu2 %v3284_v48  ;;  %v3711_v48 = vld [vmem:[#allocation10 + $0xc0] sm:$0xff] }
 0x1bb   :  { %922 = vmatpush.msra.mxu0 %v3315_v7  ;;  %v3746_v7 = vld [vmem:[#allocation10 + $0x18] sm:$0xff] }
 0x1bc   :  { %998 = vmatpush.msrb.mxu1 %v3696_v41  ;;  %1018 = vmatpush.msra.mxu2 %v3295_v56  ;;  %v3721_v56 = vld [vmem:[#allocation10 + $0x90] sm:$0xff]  ;;  %4866 = vst [vmem:[#allocation28_spill] sm:$0xff] %v3746_v7 }
 0x1bd   :  { %923 = vmatpush.msra.mxu0 %v3322_v15  ;;  %v4868_v15 = vld [vmem:[#allocation34_spill] sm:$0xff] }
 0x1be   :  { %999 = vmatpush.msrb.mxu1 %v3701_v44  ;;  %1019 = vmatpush.msra.mxu2 %v3303_v60  ;;  %v3731_v60 = vld [vmem:[#allocation10 + $0x60] sm:$0xff] }
 0x1bf   :  { %924 = vmatpush.msra.mxu0 %v3330_v20 }
 0x1c0   :  { %1000 = vmatpush.msrb.mxu1 %v3706_v47  ;;  %1020 = vmatpush.msra.mxu2 %v3309_v2  ;;  %v3741_v2 = vld [vmem:[#allocation10 + $0x30] sm:$0xff] }
 0x1c1   :  { %925 = vmatpush.msra.mxu0 %v3337_v26 }
 0x1c2   :  { %1001 = vmatpush.msrb.mxu1 %v3711_v48  ;;  %1021 = vmatpush.msra.mxu2 %v3317_v9  ;;  %v3751_v9 = vld [vmem:[#allocation10] sm:$0xff] }
 0x1c3   :  { %926 = vmatpush.msra.mxu0 %v3345_v32  ;;  %4867 = vst [vmem:[#allocation24_spill] sm:$0xff] %v3751_v9 }
 0x1c4   :  { %1002 = vmatpush.msrb.mxu1 %v3716_v53  ;;  %1022 = vmatpush.msra.mxu2 %v3324_v16  ;;  %v234_v16 = vadd.f32 %v4868_v15, %v4861_v27 }
 0x1c5   :  { %927 = vmatpush.msra.mxu0 %v3352_v38 }
 0x1c6   :  { %1003 = vmatpush.msrb.mxu1 %v3721_v56  ;;  %1023 = vmatpush.msra.mxu2 %v3332_v22 }
 0x1c7   :  { %928 = vmatpush.msra.mxu0 %v3360_v51 }
 0x1c8   :  { %1004 = vmatpush.msrb.mxu1 %v3726_v59  ;;  %1024 = vmatpush.msra.mxu2 %v3339_v28 }
 0x1c9   :  { %929 = vmatpush.msra.mxu0 %v3367_v58 }
 0x1ca   :  { %1005 = vmatpush.msrb.mxu1 %v3731_v60  ;;  %1025 = vmatpush.msra.mxu2 %v3347_v34 }
 0x1cb   :  { %930 = vmatpush.msra.mxu0 %v3375_v11 }
 0x1cc   :  { %1006 = vmatpush.msrb.mxu1 %v3736_v63  ;;  %1026 = vmatpush.msra.mxu2 %v3354_v40 }
 0x1cd   :  { %931 = vmatpush.msra.mxu0 %v3383_v23 }
 0x1ce   :  { %1007 = vmatpush.msrb.mxu1 %v3741_v2  ;;  %1027 = vmatpush.msra.mxu2 %v3362_v52 }
 0x1cf   :  { %932 = vmatpush.msra.mxu0 %v4853_v6 }
 0x1d0   :  { %1008 = vmatpush.msrb.mxu1 %v3746_v7  ;;  %1028 = vmatpush.msra.mxu2 %v4855_v10 }
 0x1d1   :  { %933 = vmatpush.msra.mxu0 %v4856_v12 }
 0x1d2   :  { %1009 = vmatpush.msrb.mxu1 %v3751_v9  ;;  %1029 = vmatpush.msra.mxu2 %v4858_v18 }
 0x22f   :  { %v663_v20 = vpop.f32.mrf.mxu0  ;;  %v683_v22 = vpop.f32.mrf.mxu1 }
 0x230   :  { %v706_v26 = vadd.f32 %v663_v20, %v234_v16  ;;  %v726_v28 = vadd.f32 %v683_v22, %v3576_v19 }
 0x232   :  { %v2592_v32 = vmul.f32 -1.442695, %v706_v26  ;;  %v2593_v34 = vmul.f32 -1.442695, %v726_v28 }
 0x234   :  { %2672 = vpow2.f32 %v2592_v32 }
 0x235   :  { %2674 = vpow2.f32 %v2593_v34 }
 0x236   :  { %v703_v17 = vpop.f32.mrf.mxu2 }
 0x237   :  { %v746_v30 = vadd.f32 %v3570_v45, %v703_v17  ;;  %v3813_v17 = vld [vmem:[#allocation10 + $0xe0] sm:$0xff] }
 0x23a   :  { %v2673_v38 = vpop.eup %2672 }
 0x23b   :  { %v2675_v40 = vpop.eup %2674  ;;  %v710_v51 = vadd.f32 1.0, %v2673_v38 }
 0x23c   :  { %v730_v52 = vadd.f32 1.0, %v2675_v40  ;;  %v3767_v40 = vld [vmem:[#allocation10 + $0x178] sm:$0xff] }
 0x23d   :  { %2676 = vrcp.f32 %v710_v51  ;;  %v722_v36 = vand.u32 2147483648, %v710_v51  ;;  %v720_v19 = vand.u32 2147483647, %v710_v51  ;;  %vm716_vm1 = vweird.f32 %v710_v51 }
 0x23e   :  { %2678 = vrcp.f32 %v730_v52  ;;  %v742_v46 = vand.u32 2147483648, %v730_v52  ;;  %vm736_vm5 = vweird.f32 %v730_v52  ;;  %v740_v5 = vand.u32 2147483647, %v730_v52 }
 0x23f   :  { %v723_v1 = vor.u32 1.1754944e-38, %v722_v36  ;;  %vm721_vm3 = vcmp.eq.f32.partialorder %v720_v19, 8.507059e+37  ;;  %v3799_v36 = vld [vmem:[#allocation10 + $0x110] sm:$0xff]  ;;  %v3806_v19 = vld [vmem:[#allocation10 + $0xf8] sm:$0xff] }
 0x240   :  { %v743_v20 = vor.u32 1.1754944e-38, %v742_v46  ;;  %vm741_vm7 = vcmp.eq.f32.partialorder %v740_v5, 8.507059e+37  ;;  %v3844_v46 = vld [vmem:[#allocation10 + $0x70] sm:$0xff] }
 0x241   :  { %v3853_v5 = vld [vmem:[#allocation10 + $0x50] sm:$0xff] }
 0x243   :  { %v2677_v58 = vpop.eup %2676 }
 0x244   :  { %v2679_v10 = vpop.eup %2678  ;;  %v712_v18 = vmul.f32 %v2677_v58, %v710_v51  ;;  %vm717_vm0 = vweird.f32 %v2677_v58  ;;  %v3771_v51 = vld [vmem:[#allocation10 + $0x170] sm:$0xff] }
 0x245   :  { %v732_v24 = vmul.f32 %v2679_v10, %v730_v52  ;;  %vm718_vm2 = vmor %vm716_vm1, %vm717_vm0  ;;  %vm737_vm4 = vweird.f32 %v2679_v10  ;;  %v3774_v52 = vld [vmem:[#allocation10 + $0x160] sm:$0xff] }
 0x246   :  { %v713_v55 = vsub.f32 1.0, %v712_v18  ;;  %vm738_vm6 = vmor %vm736_vm5, %vm737_vm4  ;;  %v3785_v18 = vld [vmem:[#allocation10 + $0x140] sm:$0xff] }
 0x247   :  { %v733_v49 = vsub.f32 1.0, %v732_v24  ;;  %v3788_v24 = vld [vmem:[#allocation10 + $0x130] sm:$0xff] }
 0x248   :  { %v714_v61 = vmul.f32 %v2677_v58, %v713_v55  ;;  %v3792_v55 = vld [vmem:[#allocation10 + $0x128] sm:$0xff] }
 0x249   :  { %v734_v39 = vmul.f32 %v2679_v10, %v733_v49  ;;  %v3795_v49 = vld [vmem:[#allocation10 + $0x118] sm:$0xff] }
 0x24a   :  { %v715_v25 = vadd.f32 %v2677_v58, %v714_v61  ;;  %v3802_v61 = vld [vmem:[#allocation10 + $0x100] sm:$0xff] }
 0x24b   :  { %v735_v57 = vadd.f32 %v2679_v10, %v734_v39  ;;  %v3809_v39 = vld [vmem:[#allocation10 + $0xe8] sm:$0xff] }
 0x24c   :  { %v719_v8 = vsel %vm718_vm2, %v2677_v58, %v715_v25  ;;  %v3778_v58 = vld [vmem:[#allocation10 + $0x158] sm:$0xff]  ;;  %v3816_v25 = vld [vmem:[#allocation10 + $0xd0] sm:$0xff] }
 0x24d   :  { %v724_v14 = vsel %vm721_vm3, %v723_v1, %v719_v8  ;;  %v739_v16 = vsel %vm738_vm6, %v2679_v10, %v735_v57  ;;  %v3781_v10 = vld [vmem:[#allocation10 + $0x148] sm:$0xff]  ;;  %v3823_v8 = vld [vmem:[#allocation10 + $0xb8] sm:$0xff]  ;;  %v3830_v57 = vld [vmem:[#allocation10 + $0xa0] sm:$0xff] }
 0x24e   :  { %v747_v13 = vmul.f32 %v746_v30, %v724_v14  ;;  %v744_v22 = vsel %vm741_vm7, %v743_v20, %v739_v16  ;;  %v3820_v1 = vld [vmem:[#allocation10 + $0xc8] sm:$0xff]  ;;  %v3827_v30 = vld [vmem:[#allocation10 + $0xb0] sm:$0xff]  ;;  %v3834_v14 = vld [vmem:[#allocation10 + $0x98] sm:$0xff] }
 0x24f   :  { %v750_v26 = vsub.f32 1.0, %v744_v22  ;;  %v752_v34 = vmul.f32 %v744_v22, %v3670_v62  ;;  %v3863_v16 = vld [vmem:[#allocation10 + $0x20] sm:$0xff] }
 0x250   :  { %v748_v15 = vadd.f32 %v747_v13, %v316_v33  ;;  %v3841_v33 = vld [vmem:[#allocation10 + $0x80] sm:$0xff]  ;;  %v3848_v13 = vld [vmem:[#allocation10 + $0x68] sm:$0xff]  ;;  %4870 = vst [vmem:[#allocation26_spill] sm:$0xff] %v3863_v16 }
 0x251   :  { %v4872_v20 = vld [vmem:[#allocation42_spill] sm:$0xff] }
 0x252   :  { %2680 = vtanh.f32 %v748_v15  ;;  %v3858_v15 = vld [vmem:[#allocation10 + $0x38] sm:$0xff] }
 0x258   :  { %v2681_v28 = vpop.eup %2680 }
 0x259   :  { %v751_v32 = vmul.f32 %v2681_v28, %v750_v26  ;;  %v4873_v28 = vld [vmem:[#allocation36_spill] sm:$0xff] }
 0x25b   :  { %v3762_v38 = vadd.f32 %v752_v34, %v751_v32 }
 0x25d   :  { %778 = vmatmul.f32.vlgmr.msrb.gmra.mxu3 %v3762_v38  ;;  %798 = vmatmul.f32.vlgmr.msrb.gmra.mxu0 %v3762_v38 }
 0x25e   :  { %818 = vmatmul.f32.vlgmr.msra.gmra.mxu1 %v3762_v38  ;;  %1034 = vmatpush.msrb.mxu3 %v3767_v40 }
 0x25f   :  { %1110 = vmatpush.msrb.mxu0 %v3676_v21  ;;  %1130 = vmatpush.msra.mxu1 %v3771_v51 }
 0x260   :  { %1035 = vmatpush.msrb.mxu3 %v3774_v52 }
 0x261   :  { %1111 = vmatpush.msrb.mxu0 %v3681_v37  ;;  %1131 = vmatpush.msra.mxu1 %v3778_v58 }
 0x262   :  { %1036 = vmatpush.msrb.mxu3 %v3781_v10 }
 0x263   :  { %1112 = vmatpush.msrb.mxu0 %v3686_v4  ;;  %1132 = vmatpush.msra.mxu1 %v3785_v18 }
 0x264   :  { %1037 = vmatpush.msrb.mxu3 %v3788_v24 }
 0x265   :  { %1113 = vmatpush.msrb.mxu0 %v3691_v50  ;;  %1133 = vmatpush.msra.mxu1 %v3792_v55 }
 0x266   :  { %1038 = vmatpush.msrb.mxu3 %v3795_v49 }
 0x267   :  { %1114 = vmatpush.msrb.mxu0 %v3696_v41  ;;  %1134 = vmatpush.msra.mxu1 %v3799_v36 }
 0x268   :  { %1039 = vmatpush.msrb.mxu3 %v3802_v61 }
 0x269   :  { %1115 = vmatpush.msrb.mxu0 %v3701_v44  ;;  %1135 = vmatpush.msra.mxu1 %v3806_v19 }
 0x26a   :  { %1040 = vmatpush.msrb.mxu3 %v3809_v39 }
 0x26b   :  { %1116 = vmatpush.msrb.mxu0 %v3706_v47  ;;  %1136 = vmatpush.msra.mxu1 %v3813_v17 }
 0x26c   :  { %1041 = vmatpush.msrb.mxu3 %v3816_v25 }
 0x26d   :  { %1117 = vmatpush.msrb.mxu0 %v3711_v48  ;;  %1137 = vmatpush.msra.mxu1 %v3820_v1 }
 0x26e   :  { %1042 = vmatpush.msrb.mxu3 %v3823_v8 }
 0x26f   :  { %1118 = vmatpush.msrb.mxu0 %v3716_v53  ;;  %1138 = vmatpush.msra.mxu1 %v3827_v30 }
 0x270   :  { %1043 = vmatpush.msrb.mxu3 %v3830_v57 }
 0x271   :  { %1119 = vmatpush.msrb.mxu0 %v3721_v56  ;;  %1139 = vmatpush.msra.mxu1 %v3834_v14 }
 0x272   :  { %1044 = vmatpush.msrb.mxu3 %v3837_v0 }
 0x273   :  { %1120 = vmatpush.msrb.mxu0 %v3726_v59  ;;  %1140 = vmatpush.msra.mxu1 %v3841_v33 }
 0x274   :  { %1045 = vmatpush.msrb.mxu3 %v3844_v46 }
 0x275   :  { %1121 = vmatpush.msrb.mxu0 %v3731_v60  ;;  %1141 = vmatpush.msra.mxu1 %v3848_v13 }
 0x276   :  { %1046 = vmatpush.msrb.mxu3 %v3375_v11  ;;  %v3868_v11 = vld [vmem:[#allocation10 + $0x8] sm:$0xff] }
 0x277   :  { %1122 = vmatpush.msrb.mxu0 %v3736_v63  ;;  %1142 = vmatpush.msra.mxu1 %v3853_v5  ;;  %4871 = vst [vmem:[#allocation32_spill] sm:$0xff] %v3868_v11 }
 0x278   :  { %1047 = vmatpush.msrb.mxu3 %v3383_v23 }
 0x279   :  { %1123 = vmatpush.msrb.mxu0 %v3741_v2  ;;  %1143 = vmatpush.msra.mxu1 %v3858_v15 }
 0x27a   :  { %1048 = vmatpush.msrb.mxu3 %v4853_v6 }
 0x27b   :  { %1124 = vmatpush.msrb.mxu0 %v3746_v7  ;;  %1144 = vmatpush.msra.mxu1 %v3863_v16 }
 0x27c   :  { %1049 = vmatpush.msrb.mxu3 %v4856_v12 }
 0x27d   :  { %1125 = vmatpush.msrb.mxu0 %v3751_v9  ;;  %1145 = vmatpush.msra.mxu1 %v3868_v11 }
 0x2da   :  { %v799_v23 = vpop.f32.mrf.mxu0 }
 0x2db   :  { %v842_v22 = vadd.f32 %v799_v23, %v4872_v20 }
 0x2dd   :  { %v2595_v26 = vmul.f32 -1.442695, %v842_v22 }
 0x2df   :  { %2682 = vpow2.f32 %v2595_v26 }
 0x2e0   :  { %v779_v6 = vpop.f32.mrf.mxu3 }
 0x2e1   :  { %v822_v32 = vadd.f32 %v779_v6, %v4873_v28  ;;  %v819_v6 = vpop.f32.mrf.mxu1 }
 0x2e3   :  { %v2594_v34 = vmul.f32 -1.442695, %v822_v32  ;;  %v862_v32 = vadd.f32 %v3570_v45, %v819_v6 }
 0x2e5   :  { %v2683_v3 = vpop.eup %2682  ;;  %2684 = vpow2.f32 %v2594_v34 }
 0x2e6   :  { %v846_v35 = vadd.f32 1.0, %v2683_v3 }
 0x2e8   :  { %2686 = vrcp.f32 %v846_v35  ;;  %v858_v9 = vand.u32 2147483648, %v846_v35  ;;  %vm852_vm13 = vweird.f32 %v846_v35 }
 0x2ea   :  { %v859_v7 = vor.u32 1.1754944e-38, %v858_v9 }
 0x2eb   :  { %v2685_v12 = vpop.eup %2684 }
 0x2ec   :  { %v826_v62 = vadd.f32 1.0, %v2685_v12 }
 0x2ee   :  { %2688 = vrcp.f32 %v826_v62  ;;  %v2687_v43 = vpop.eup %2686  ;;  %v838_v23 = vand.u32 2147483648, %v826_v62  ;;  %v836_v22 = vand.u32 2147483647, %v826_v62  ;;  %vm832_vm9 = vweird.f32 %v826_v62 }
 0x2ef   :  { %v848_v31 = vmul.f32 %v2687_v43, %v846_v35  ;;  %vm853_vm12 = vweird.f32 %v2687_v43 }
 0x2f0   :  { %v839_v3 = vor.u32 1.1754944e-38, %v838_v23  ;;  %vm837_vm11 = vcmp.eq.f32.partialorder %v836_v22, 8.507059e+37  ;;  %vm854_vm14 = vmor %vm852_vm13, %vm853_vm12 }
 0x2f1   :  { %v849_v29 = vsub.f32 1.0, %v848_v31 }
 0x2f3   :  { %v850_v26 = vmul.f32 %v2687_v43, %v849_v29 }
 0x2f4   :  { %v2689_v54 = vpop.eup %2688 }
 0x2f5   :  { %v828_v42 = vmul.f32 %v2689_v54, %v826_v62  ;;  %vm833_vm8 = vweird.f32 %v2689_v54  ;;  %v851_v12 = vadd.f32 %v2687_v43, %v850_v26 }
 0x2f6   :  { %vm834_vm10 = vmor %vm832_vm9, %vm833_vm8 }
 0x2f7   :  { %v829_v27 = vsub.f32 1.0, %v828_v42  ;;  %v856_v42 = vand.u32 2147483647, %v846_v35  ;;  %v855_v29 = vsel %vm854_vm14, %v2687_v43, %v851_v12  ;;  %v3917_v43 = vld [vmem:[#allocation10 + $0x58] sm:$0xff]  ;;  %v3922_v35 = vld [vmem:[#allocation10 + $0x40] sm:$0xff] }
 0x2f9   :  { %v830_v20 = vmul.f32 %v2689_v54, %v829_v27  ;;  %v4874_v27 = vld [vmem:[#allocation43_spill] sm:$0xff]  ;;  %vm857_vm15 = vcmp.eq.f32.partialorder %v856_v42, 8.507059e+37 }
 0x2fa   :  { %v860_v62 = vsel %vm857_vm15, %v859_v7, %v855_v29 }
 0x2fb   :  { %v831_v28 = vadd.f32 %v2689_v54, %v830_v20  ;;  %v866_v23 = vsub.f32 1.0, %v860_v62 }
 0x2fd   :  { %v835_v34 = vsel %vm834_vm10, %v2689_v54, %v831_v28  ;;  %v868_v54 = vmul.f32 %v860_v62, %v3762_v38 }
 0x2fe   :  { %v840_v11 = vsel %vm837_vm11, %v839_v3, %v835_v34 }
 0x2ff   :  { %v863_v31 = vmul.f32 %v862_v32, %v840_v11 }
 0x301   :  { %v864_v16 = vadd.f32 %v863_v31, %v4874_v27  ;;  %v4882_v27 = vld [vmem:[#allocation45_spill] sm:$0xff] }
 0x303   :  { %2690 = vtanh.f32 %v864_v16 }
 0x309   :  { %v2691_v20 = vpop.eup %2690 }
 0x30a   :  { %v867_v22 = vmul.f32 %v2691_v20, %v866_v23 }
 0x30c   :  { %v3876_v26 = vadd.f32 %v868_v54, %v867_v22 }
 0x30e   :  { %894 = vmatmul.f32.vlgmr.msrb.gmra.mxu2 %v3876_v26  ;;  %914 = vmatmul.f32.vlgmr.msra.gmra.mxu3 %v3876_v26 }
 0x30f   :  { %934 = vmatmul.f32.vlgmr.msra.gmra.mxu0 %v3876_v26  ;;  %1150 = vmatpush.msrb.mxu2 %v3767_v40 }
 0x310   :  { %1226 = vmatpush.msra.mxu3 %v3676_v21  ;;  %1246 = vmatpush.msra.mxu0 %v3771_v51  ;;  %v3927_v21 = vld [vmem:[#allocation10 + $0x28] sm:$0xff] }
 0x311   :  { %1151 = vmatpush.msrb.mxu2 %v3774_v52 }
 0x312   :  { %1227 = vmatpush.msra.mxu3 %v3681_v37  ;;  %1247 = vmatpush.msra.mxu0 %v3778_v58  ;;  %v4875_v37 = vld [vmem:[#allocation28_spill] sm:$0xff] }
 0x313   :  { %1152 = vmatpush.msrb.mxu2 %v3781_v10 }
 0x314   :  { %1228 = vmatpush.msra.mxu3 %v3686_v4  ;;  %1248 = vmatpush.msra.mxu0 %v3785_v18  ;;  %v4876_v4 = vld [vmem:[#allocation26_spill] sm:$0xff] }
 0x315   :  { %1153 = vmatpush.msrb.mxu2 %v3788_v24 }
 0x316   :  { %1229 = vmatpush.msra.mxu3 %v3691_v50  ;;  %1249 = vmatpush.msra.mxu0 %v3792_v55  ;;  %v3932_v50 = vld [vmem:[#allocation10 + $0x10] sm:$0xff] }
 0x317   :  { %1154 = vmatpush.msrb.mxu2 %v3795_v49 }
 0x318   :  { %1230 = vmatpush.msra.mxu3 %v3696_v41  ;;  %1250 = vmatpush.msra.mxu0 %v3799_v36  ;;  %v4877_v41 = vld [vmem:[#allocation24_spill] sm:$0xff] }
 0x319   :  { %1155 = vmatpush.msrb.mxu2 %v3802_v61 }
 0x31a   :  { %1231 = vmatpush.msra.mxu3 %v3701_v44  ;;  %1251 = vmatpush.msra.mxu0 %v3806_v19  ;;  %v4878_v44 = vld [vmem:[#allocation32_spill] sm:$0xff] }
 0x31b   :  { %1156 = vmatpush.msrb.mxu2 %v3809_v39 }
 0x31c   :  { %1232 = vmatpush.msra.mxu3 %v3706_v47  ;;  %1252 = vmatpush.msra.mxu0 %v3813_v17  ;;  %v4879_v47 = vld [vmem:[#allocation30_spill] sm:$0xff] }
 0x31d   :  { %1157 = vmatpush.msrb.mxu2 %v3816_v25 }
 0x31e   :  { %1233 = vmatpush.msra.mxu3 %v3711_v48  ;;  %1253 = vmatpush.msra.mxu0 %v3820_v1  ;;  %v4880_v48 = vld [vmem:[#allocation29_spill] sm:$0xff] }
 0x31f   :  { %1158 = vmatpush.msrb.mxu2 %v3823_v8 }
 0x320   :  { %1234 = vmatpush.msra.mxu3 %v3716_v53  ;;  %1254 = vmatpush.msra.mxu0 %v3827_v30  ;;  %v240_v53 = vadd.f32 %v4880_v48, %v4879_v47  ;;  %v1359_v48 = vld [vmem:[#allocation13 + $0x78] sm:$0xff] }
 0x321   :  { %1159 = vmatpush.msrb.mxu2 %v3830_v57 }
 0x322   :  { %1235 = vmatpush.msra.mxu3 %v3721_v56  ;;  %1255 = vmatpush.msra.mxu0 %v3834_v14 }
 0x323   :  { %1160 = vmatpush.msrb.mxu2 %v3837_v0 }
 0x324   :  { %1236 = vmatpush.msra.mxu3 %v3726_v59  ;;  %1256 = vmatpush.msra.mxu0 %v3841_v33 }
 0x325   :  { %1161 = vmatpush.msrb.mxu2 %v3844_v46 }
 0x326   :  { %1237 = vmatpush.msra.mxu3 %v3731_v60  ;;  %1257 = vmatpush.msra.mxu0 %v3848_v13 }
 0x327   :  { %1162 = vmatpush.msrb.mxu2 %v3917_v43 }
 0x328   :  { %1238 = vmatpush.msra.mxu3 %v3736_v63  ;;  %1258 = vmatpush.msra.mxu0 %v3853_v5  ;;  %v4881_v63 = vld [vmem:[#allocation44_spill] sm:$0xff] }
 0x329   :  { %1163 = vmatpush.msrb.mxu2 %v3922_v35 }
 0x32a   :  { %1239 = vmatpush.msra.mxu3 %v3741_v2  ;;  %1259 = vmatpush.msra.mxu0 %v3858_v15 }
 0x32b   :  { %1164 = vmatpush.msrb.mxu2 %v3927_v21 }
 0x32c   :  { %1240 = vmatpush.msra.mxu3 %v4875_v37  ;;  %1260 = vmatpush.msra.mxu0 %v4876_v4 }
 0x32d   :  { %1165 = vmatpush.msrb.mxu2 %v3932_v50 }
 0x32e   :  { %1241 = vmatpush.msra.mxu3 %v4877_v41  ;;  %1261 = vmatpush.msra.mxu0 %v4878_v44  ;;  %v1362_v44 = vld [vmem:[#allocation13 + $0x90] sm:$0xff] }
 0x38c   :  { %v935_v15 = vpop.f32.mrf.mxu0 }
 0x38d   :  { %v978_v28 = vadd.f32 %v3570_v45, %v935_v15  ;;  %v3969_v15 = vld [vmem:[%s4775_s4] ss:$0 sm:$0xff] }
 0x391   :  { %v895_v56 = vpop.f32.mrf.mxu2  ;;  %v915_v59 = vpop.f32.mrf.mxu3 }
 0x392   :  { %v938_v60 = vadd.f32 %v895_v56, %v240_v53  ;;  %v958_v2 = vadd.f32 %v915_v59, %v4881_v63  ;;  %v1356_v56 = vld [vmem:[#allocation13 + $0x60] sm:$0xff]  ;;  %v1353_v59 = vld [vmem:[#allocation13 + $0x48] sm:$0xff] }
 0x394   :  { %v2596_v7 = vmul.f32 -1.442695, %v938_v60  ;;  %v2597_v9 = vmul.f32 -1.442695, %v958_v2  ;;  %v1350_v60 = vld [vmem:[#allocation13 + $0x30] sm:$0xff]  ;;  %v1347_v2 = vld [vmem:[#allocation13 + $0x18] sm:$0xff] }
 0x396   :  { %2692 = vpow2.f32 %v2596_v7 }
 0x397   :  { %2694 = vpow2.f32 %v2597_v9  ;;  %v1344_v9 = vld [vmem:[#allocation13] sm:$0xff] }
 0x39c   :  { %v2693_v51 = vpop.eup %2692 }
 0x39d   :  { %v2695_v58 = vpop.eup %2694  ;;  %v942_v18 = vadd.f32 1.0, %v2693_v51 }
 0x39e   :  { %v962_v55 = vadd.f32 1.0, %v2695_v58 }
 0x39f   :  { %2696 = vrcp.f32 %v942_v18  ;;  %v954_v14 = vand.u32 2147483648, %v942_v18  ;;  %v952_v5 = vand.u32 2147483647, %v942_v18  ;;  %vm948_vm1 = vweird.f32 %v942_v18 }
 0x3a0   :  { %2698 = vrcp.f32 %v962_v55  ;;  %v974_v31 = vand.u32 2147483648, %v962_v55  ;;  %vm968_vm5 = vweird.f32 %v962_v55  ;;  %v972_v42 = vand.u32 2147483647, %v962_v55 }
 0x3a1   :  { %v955_v6 = vor.u32 1.1754944e-38, %v954_v14  ;;  %vm953_vm3 = vcmp.eq.f32.partialorder %v952_v5, 8.507059e+37 }
 0x3a2   :  { %v975_v23 = vor.u32 1.1754944e-38, %v974_v31  ;;  %vm973_vm7 = vcmp.eq.f32.partialorder %v972_v42, 8.507059e+37 }
 0x3a5   :  { %v2697_v36 = vpop.eup %2696 }
 0x3a6   :  { %v2699_v19 = vpop.eup %2698  ;;  %v944_v17 = vmul.f32 %v2697_v36, %v942_v18  ;;  %vm949_vm0 = vweird.f32 %v2697_v36 }
 0x3a7   :  { %v964_v1 = vmul.f32 %v2699_v19, %v962_v55  ;;  %vm950_vm2 = vmor %vm948_vm1, %vm949_vm0  ;;  %vm969_vm4 = vweird.f32 %v2699_v19 }
 0x3a8   :  { %v945_v30 = vsub.f32 1.0, %v944_v17  ;;  %vm970_vm6 = vmor %vm968_vm5, %vm969_vm4 }
 0x3a9   :  { %v965_v33 = vsub.f32 1.0, %v964_v1 }
 0x3aa   :  { %v946_v13 = vmul.f32 %v2697_v36, %v945_v30 }
 0x3ab   :  { %v966_v16 = vmul.f32 %v2699_v19, %v965_v33 }
 0x3ac   :  { %v947_v11 = vadd.f32 %v2697_v36, %v946_v13 }
 0x3ad   :  { %v967_v34 = vadd.f32 %v2699_v19, %v966_v16 }
 0x3ae   :  { %v951_v3 = vsel %vm950_vm2, %v2697_v36, %v947_v11 }
 0x3af   :  { %v956_v32 = vsel %vm953_vm3, %v955_v6, %v951_v3  ;;  %v971_v62 = vsel %vm970_vm6, %v2699_v19, %v967_v34 }
 0x3b0   :  { %v979_v12 = vmul.f32 %v978_v28, %v956_v32  ;;  %v976_v20 = vsel %vm973_vm7, %v975_v23, %v971_v62 }
 0x3b1   :  { %v982_v54 = vsub.f32 1.0, %v976_v20  ;;  %v984_v37 = vmul.f32 %v976_v20, %v3876_v26 }
 0x3b2   :  { %v980_v29 = vadd.f32 %v979_v12, %v4882_v27  ;;  %v4885_v12 = vld [vmem:[#allocation48_spill] sm:$0xff] }
 0x3b4   :  { %2700 = vtanh.f32 %v980_v29 }
 0x3ba   :  { %v2701_v22 = vpop.eup %2700 }
 0x3bb   :  { %v983_v45 = vmul.f32 %v2701_v22, %v982_v54 }
 0x3bd   :  { %v3943_v4 = vadd.f32 %v984_v37, %v983_v45  ;;  %v4886_v45 = vld [vmem:[#allocation46_spill] sm:$0xff]  ;;  %v4887_v37 = vld [vmem:[#allocation25_spill] sm:$0xff] }
 0x3bf   :  { %1010 = vmatmul.f32.vlgmr.msrb.gmra.mxu1 %v3943_v4  ;;  %1030 = vmatmul.f32.vlgmr.msra.gmra.mxu2 %v3943_v4 }
 0x3c0   :  { %1050 = vmatmul.f32.vlgmr.msrb.gmra.mxu3 %v3943_v4  ;;  %1266 = vmatpush.msrb.mxu1 %v3767_v40  ;;  %v1389_v40 = vld [vmem:[#allocation13 + $0x168] sm:$0xff] }
 0x3c1   :  { %1400 = vmatpush.msra.mxu2 %v1389_v40  ;;  %v3985_v40 = vld [vmem:[#allocation14 + $0x168] sm:$0xff] }
 0x3c2   :  { %1267 = vmatpush.msrb.mxu1 %v3774_v52  ;;  %v1386_v52 = vld [vmem:[#allocation13 + $0x150] sm:$0xff] }
 0x3c3   :  { %1401 = vmatpush.msra.mxu2 %v1386_v52  ;;  %v3988_v52 = vld [vmem:[#allocation14 + $0x150] sm:$0xff] }
 0x3c4   :  { %1268 = vmatpush.msrb.mxu1 %v3781_v10  ;;  %v1383_v10 = vld [vmem:[#allocation13 + $0x138] sm:$0xff] }
 0x3c5   :  { %1402 = vmatpush.msra.mxu2 %v1383_v10  ;;  %v3991_v10 = vld [vmem:[#allocation14 + $0x138] sm:$0xff] }
 0x3c6   :  { %1269 = vmatpush.msrb.mxu1 %v3788_v24  ;;  %v1380_v24 = vld [vmem:[#allocation13 + $0x120] sm:$0xff] }
 0x3c7   :  { %1403 = vmatpush.msra.mxu2 %v1380_v24  ;;  %v3994_v24 = vld [vmem:[#allocation14 + $0x120] sm:$0xff] }
 0x3c8   :  { %1270 = vmatpush.msrb.mxu1 %v3795_v49  ;;  %v1377_v49 = vld [vmem:[#allocation13 + $0x108] sm:$0xff] }
 0x3c9   :  { %1404 = vmatpush.msra.mxu2 %v1377_v49  ;;  %v1390_v49 = vld [vmem:[#allocation13 + $0x170] sm:$0xff] }
 0x3ca   :  { %1271 = vmatpush.msrb.mxu1 %v3802_v61  ;;  %1441 = vmatpush.msrb.mxu3 %v1390_v49  ;;  %v1348_v49 = vld [vmem:[#allocation13 + $0x20] sm:$0xff] }
 0x3cc   :  { %1272 = vmatpush.msrb.mxu1 %v3809_v39  ;;  %v4883_v39 = vld [vmem:[#allocation31_spill] sm:$0xff] }
 0x3ce   :  { %1273 = vmatpush.msrb.mxu1 %v3816_v25 }
 0x3d0   :  { %1274 = vmatpush.msrb.mxu1 %v3823_v8  ;;  %v1374_v8 = vld [vmem:[#allocation13 + $0xf0] sm:$0xff] }
 0x3d1   :  { %1405 = vmatpush.msra.mxu2 %v1374_v8  ;;  %v1388_v8 = vld [vmem:[#allocation13 + $0x160] sm:$0xff] }
 0x3d2   :  { %1275 = vmatpush.msrb.mxu1 %v3830_v57 }
 0x3d4   :  { %1276 = vmatpush.msrb.mxu1 %v3837_v0  ;;  %v1371_v0 = vld [vmem:[#allocation13 + $0xd8] sm:$0xff] }
 0x3d5   :  { %1406 = vmatpush.msra.mxu2 %v1371_v0  ;;  %v1384_v0 = vld [vmem:[#allocation13 + $0x140] sm:$0xff] }
 0x3d6   :  { %1277 = vmatpush.msrb.mxu1 %v3844_v46  ;;  %v1368_v46 = vld [vmem:[#allocation13 + $0xc0] sm:$0xff] }
 0x3d7   :  { %1407 = vmatpush.msra.mxu2 %v1368_v46  ;;  %v1385_v46 = vld [vmem:[#allocation13 + $0x148] sm:$0xff] }
 0x3d8   :  { %1278 = vmatpush.msrb.mxu1 %v3917_v43 }
 0x3da   :  { %1279 = vmatpush.msrb.mxu1 %v3922_v35  ;;  %v4884_v35 = vld [vmem:[#allocation47_spill] sm:$0xff] }
 0x3dc   :  { %1280 = vmatpush.msrb.mxu1 %v3927_v21 }
 0x3de   :  { %1281 = vmatpush.msrb.mxu1 %v3932_v50  ;;  %v1365_v50 = vld [vmem:[#allocation13 + $0xa8] sm:$0xff] }
 0x3df   :  { %1408 = vmatpush.msra.mxu2 %v1365_v50  ;;  %v4006_v50 = vld [vmem:[#allocation14 + $0xc0] sm:$0xff] }
 0x3e1   :  { %1409 = vmatpush.msra.mxu2 %v1362_v44  ;;  %v1379_v44 = vld [vmem:[#allocation13 + $0x118] sm:$0xff] }
 0x3e3   :  { %1410 = vmatpush.msra.mxu2 %v1359_v48 }
 0x3e5   :  { %1411 = vmatpush.msra.mxu2 %v1356_v56  ;;  %v4888_v56 = vld [vmem:[#allocation33_spill] sm:$0xff] }
 0x3e7   :  { %1412 = vmatpush.msra.mxu2 %v1353_v59 }
 0x3e9   :  { %1413 = vmatpush.msra.mxu2 %v1350_v60  ;;  %v4889_v60 = vld [vmem:[#allocation49_spill] sm:$0xff] }
 0x3eb   :  { %1414 = vmatpush.msra.mxu2 %v1347_v2  ;;  %v1375_v2 = vld [vmem:[#allocation13 + $0xf8] sm:$0xff] }
 0x3ed   :  { %1415 = vmatpush.msra.mxu2 %v1344_v9  ;;  %v4014_v9 = vld [vmem:[#allocation14 + $0x90] sm:$0xff] }
 0x43c   :  { %v1011_v61 = vpop.f32.mrf.mxu1 }
 0x43d   :  { %v1054_v25 = vadd.f32 %v1011_v61, %v4883_v39  ;;  %v1391_v61 = vld [vmem:[#allocation13 + $0x178] sm:$0xff]  ;;  %v3997_v39 = vld [vmem:[#allocation14 + $0x108] sm:$0xff] }
 0x43f   :  { %v2598_v57 = vmul.f32 -1.442695, %v1054_v25  ;;  %v1387_v25 = vld [vmem:[#allocation13 + $0x158] sm:$0xff] }
 0x440   :  { %1442 = vmatpush.msrb.mxu3 %v1387_v25 }
 0x441   :  { %2702 = vpow2.f32 %v2598_v57  ;;  %v4000_v57 = vld [vmem:[#allocation14 + $0xf0] sm:$0xff] }
 0x442   :  { %v1031_v43 = vpop.f32.mrf.mxu2  ;;  %1443 = vmatpush.msrb.mxu3 %v1384_v0 }
 0x443   :  { %v1074_v21 = vadd.f32 %v1031_v43, %v4884_v35  ;;  %v1051_v1 = vpop.f32.mrf.mxu3  ;;  %v4003_v43 = vld [vmem:[#allocation14 + $0xd8] sm:$0xff]  ;;  %v1381_v35 = vld [vmem:[#allocation13 + $0x128] sm:$0xff] }
 0x444   :  { %v1094_v16 = vadd.f32 %v3969_v15, %v1051_v1  ;;  %1444 = vmatpush.msrb.mxu3 %v1381_v35  ;;  %v4020_v1 = vld [vmem:[#allocation14 + $0x60] sm:$0xff]  ;;  %v1346_v35 = vld [vmem:[#allocation13 + $0x10] sm:$0xff] }
 0x445   :  { %v2599_v41 = vmul.f32 -1.442695, %v1074_v21  ;;  %v1382_v21 = vld [vmem:[#allocation13 + $0x130] sm:$0xff] }
 0x447   :  { %v2703_v47 = vpop.eup %2702  ;;  %2704 = vpow2.f32 %v2599_v41  ;;  %v1378_v41 = vld [vmem:[#allocation13 + $0x110] sm:$0xff] }
 0x448   :  { %v1058_v53 = vadd.f32 1.0, %v2703_v47  ;;  %v4009_v47 = vld [vmem:[#allocation14 + $0xa8] sm:$0xff]  ;;  %1445 = vmatpush.msrb.mxu3 %v1378_v41 }
 0x44a   :  { %2706 = vrcp.f32 %v1058_v53  ;;  %v1070_v55 = vand.u32 2147483648, %v1058_v53  ;;  %v1068_v19 = vand.u32 2147483647, %v1058_v53  ;;  %vm1064_vm9 = vweird.f32 %v1058_v53  ;;  %1446 = vmatpush.msrb.mxu3 %v1375_v2 }
 0x44c   :  { %v1071_v33 = vor.u32 1.1754944e-38, %v1070_v55  ;;  %vm1069_vm11 = vcmp.eq.f32.partialorder %v1068_v19, 8.507059e+37  ;;  %v1373_v55 = vld [vmem:[#allocation13 + $0xe8] sm:$0xff] }
 0x44d   :  { %v2705_v63 = vpop.eup %2704  ;;  %v1369_v19 = vld [vmem:[#allocation13 + $0xc8] sm:$0xff] }
 0x44e   :  { %v1078_v7 = vadd.f32 1.0, %v2705_v63 }
 0x450   :  { %v2707_v51 = vpop.eup %2706  ;;  %2708 = vrcp.f32 %v1078_v7  ;;  %v1090_v28 = vand.u32 2147483648, %v1078_v7  ;;  %v1088_v32 = vand.u32 2147483647, %v1078_v7  ;;  %vm1084_vm13 = vweird.f32 %v1078_v7 }
 0x451   :  { %v1060_v58 = vmul.f32 %v2707_v51, %v1058_v53  ;;  %vm1065_vm8 = vweird.f32 %v2707_v51 }
 0x452   :  { %vm1066_vm10 = vmor %vm1064_vm9, %vm1065_vm8  ;;  %v1091_v42 = vor.u32 1.1754944e-38, %v1090_v28  ;;  %vm1089_vm15 = vcmp.eq.f32.partialorder %v1088_v32, 8.507059e+37  ;;  %v1361_v28 = vld [vmem:[#allocation13 + $0x88] sm:$0xff] }
 0x453   :  { %v1061_v18 = vsub.f32 1.0, %v1060_v58 }
 0x455   :  { %v1062_v36 = vmul.f32 %v2707_v51, %v1061_v18  ;;  %v1372_v18 = vld [vmem:[#allocation13 + $0xe0] sm:$0xff] }
 0x456   :  { %v2709_v17 = vpop.eup %2708  ;;  %1447 = vmatpush.msrb.mxu3 %v1372_v18 }
 0x457   :  { %v1080_v30 = vmul.f32 %v2709_v17, %v1078_v7  ;;  %v1063_v14 = vadd.f32 %v2707_v51, %v1062_v36  ;;  %vm1085_vm12 = vweird.f32 %v2709_v17  ;;  %v1376_v7 = vld [vmem:[#allocation13 + $0x100] sm:$0xff]  ;;  %v4017_v36 = vld [vmem:[#allocation14 + $0x78] sm:$0xff] }
 0x458   :  { %vm1086_vm14 = vmor %vm1084_vm13, %vm1085_vm12  ;;  %1448 = vmatpush.msrb.mxu3 %v1369_v19 }
 0x459   :  { %v1081_v13 = vsub.f32 1.0, %v1080_v30  ;;  %v1067_v5 = vsel %vm1066_vm10, %v2707_v51, %v1063_v14  ;;  %v1366_v30 = vld [vmem:[#allocation13 + $0xb0] sm:$0xff]  ;;  %v1367_v14 = vld [vmem:[#allocation13 + $0xb8] sm:$0xff] }
 0x45a   :  { %v1072_v11 = vsel %vm1069_vm11, %v1071_v33, %v1067_v5  ;;  %v4023_v33 = vld [vmem:[#allocation14 + $0x48] sm:$0xff]  ;;  %1449 = vmatpush.msrb.mxu3 %v1366_v30  ;;  %v1364_v5 = vld [vmem:[#allocation13 + $0xa0] sm:$0xff] }
 0x45b   :  { %v1082_v6 = vmul.f32 %v2709_v17, %v1081_v13  ;;  %v1095_v3 = vmul.f32 %v1094_v16, %v1072_v11  ;;  %v1363_v13 = vld [vmem:[#allocation13 + $0x98] sm:$0xff]  ;;  %v4026_v16 = vld [vmem:[#allocation14 + $0x30] sm:$0xff] }
 0x45c   :  { %1450 = vmatpush.msrb.mxu3 %v1363_v13 }
 0x45d   :  { %v1083_v34 = vadd.f32 %v2709_v17, %v1082_v6  ;;  %v1096_v31 = vadd.f32 %v1095_v3, %v4885_v12  ;;  %v1360_v6 = vld [vmem:[#allocation13 + $0x80] sm:$0xff]  ;;  %v4029_v3 = vld [vmem:[#allocation14 + $0x18] sm:$0xff]  ;;  %v1357_v12 = vld [vmem:[#allocation13 + $0x68] sm:$0xff] }
 0x45e   :  { %1451 = vmatpush.msrb.mxu3 %v1360_v6 }
 0x45f   :  { %v1087_v27 = vsel %vm1086_vm14, %v2709_v17, %v1083_v34  ;;  %2710 = vtanh.f32 %v1096_v31  ;;  %v1370_v17 = vld [vmem:[#allocation13 + $0xd0] sm:$0xff] }
 0x460   :  { %v1092_v29 = vsel %vm1089_vm15, %v1091_v42, %v1087_v27  ;;  %v1358_v31 = vld [vmem:[#allocation13 + $0x70] sm:$0xff]  ;;  %v4031_v42 = vld [vmem:[#allocation14] sm:$0xff]  ;;  %1452 = vmatpush.msrb.mxu3 %v1357_v12 }
 0x461   :  { %v1098_v62 = vsub.f32 1.0, %v1092_v29  ;;  %v1100_v54 = vmul.f32 %v1092_v29, %v3943_v4  ;;  %4890 = vst [vmem:[#allocation38_spill] sm:$0xff] %v4031_v42  ;;  %v1354_v29 = vld [vmem:[#allocation13 + $0x50] sm:$0xff] }
 0x462   :  { %1453 = vmatpush.msrb.mxu3 %v1354_v29  ;;  %v4040_v12 = vld [vmem:[#allocation14 + $0x170] sm:$0xff]  ;;  %v4055_v29 = vld [vmem:[#allocation14 + $0x128] sm:$0xff] }
 0x465   :  { %v2711_v23 = vpop.eup %2710 }
 0x466   :  { %v1099_v20 = vmul.f32 %v2711_v23, %v1098_v62  ;;  %v1355_v62 = vld [vmem:[#allocation13 + $0x58] sm:$0xff] }
 0x467   :  { %v1351_v23 = vld [vmem:[#allocation13 + $0x38] sm:$0xff] }
 0x468   :  { %v3974_v22 = vadd.f32 %v1100_v54, %v1099_v20  ;;  %v1352_v20 = vld [vmem:[#allocation13 + $0x40] sm:$0xff]  ;;  %1454 = vmatpush.msrb.mxu3 %v1351_v23  ;;  %v4892_v23 = vmov 0.0  }
 0x46a   :  { %1126 = vmatmul.f32.vlgmr.msrb.gmra.mxu0 %v3974_v22  ;;  %1146 = vmatmul.f32.vlgmr.msra.gmra.mxu1 %v3974_v22 }
 0x46b   :  { %1166 = vmatmul.f32.vlgmr.msrb.gmra.mxu2 %v3974_v22  ;;  %1599 = vmatpush.msra.mxu1 %v3985_v40 }
 0x46c   :  { %1482 = vmatpush.msrb.mxu0 %v1391_v61  ;;  %v1349_v61 = vld [vmem:[#allocation13 + $0x28] sm:$0xff]  ;;  %1455 = vmatpush.msrb.mxu3 %v1348_v49 }
 0x46d   :  { %1600 = vmatpush.msra.mxu1 %v3988_v52  ;;  %v4076_v49 = vld [vmem:[#allocation14 + $0xc8] sm:$0xff] }
 0x46e   :  { %1483 = vmatpush.msrb.mxu0 %v1388_v8 }
 0x46f   :  { %1601 = vmatpush.msra.mxu1 %v3991_v10 }
 0x470   :  { %1484 = vmatpush.msrb.mxu0 %v1385_v46  ;;  %v1345_v46 = vld [vmem:[#allocation13 + $0x8] sm:$0xff] }
 0x471   :  { %1602 = vmatpush.msra.mxu1 %v3994_v24  ;;  %1456 = vmatpush.msrb.mxu3 %v1345_v46  ;;  %v4110_v46 = vld [vmem:[#allocation14 + $0x178] sm:$0xff] }
 0x472   :  { %1485 = vmatpush.msrb.mxu0 %v1382_v21  ;;  %1639 = vmatpush.msrb.mxu2 %v4110_v46 }
 0x473   :  { %1416 = vmatmul.f32.vlgmr.msra.gmra.mxu2 %v4886_v45  ;;  %1603 = vmatpush.msra.mxu1 %v3997_v39 }
 0x474   :  { %1486 = vmatpush.msrb.mxu0 %v1379_v44 }
 0x475   :  { %1604 = vmatpush.msra.mxu1 %v4000_v57 }
 0x476   :  { %1487 = vmatpush.msrb.mxu0 %v1376_v7 }
 0x477   :  { %1605 = vmatpush.msra.mxu1 %v4003_v43 }
 0x478   :  { %1488 = vmatpush.msrb.mxu0 %v1373_v55 }
 0x479   :  { %1606 = vmatpush.msra.mxu1 %v4006_v50 }
 0x47a   :  { %1489 = vmatpush.msrb.mxu0 %v1370_v17  ;;  %v4891_v17 = vld [vmem:[#allocation50_spill] sm:$0xff] }
 0x47b   :  { %1419 = vmatmul.f32.gmra.mxu2 %v4887_v37  ;;  %1607 = vmatpush.msra.mxu1 %v4009_v47 }
 0x47c   :  { %1490 = vmatpush.msrb.mxu0 %v1367_v14 }
 0x47d   :  { %1608 = vmatpush.msra.mxu1 %v4014_v9 }
 0x47e   :  { %1491 = vmatpush.msrb.mxu0 %v1364_v5 }
 0x47f   :  { %1609 = vmatpush.msra.mxu1 %v4017_v36 }
 0x480   :  { %1492 = vmatpush.msrb.mxu0 %v1361_v28 }
 0x481   :  { %1610 = vmatpush.msra.mxu1 %v4020_v1 }
 0x482   :  { %1493 = vmatpush.msrb.mxu0 %v1358_v31  ;;  %v4046_v31 = vld [vmem:[#allocation14 + $0x158] sm:$0xff] }
 0x483   :  { %1422 = vmatmul.f32.gmra.mxu2 %v3762_v38  ;;  %1611 = vmatpush.msra.mxu1 %v4023_v33 }
 0x484   :  { %1494 = vmatpush.msrb.mxu0 %v1355_v62  ;;  %v4060_v62 = vld [vmem:[#allocation14 + $0x110] sm:$0xff] }
 0x485   :  { %1612 = vmatpush.msra.mxu1 %v4026_v16 }
 0x486   :  { %1495 = vmatpush.msrb.mxu0 %v1352_v20  ;;  %v4067_v20 = vld [vmem:[#allocation14 + $0xf8] sm:$0xff] }
 0x487   :  { %1613 = vmatpush.msra.mxu1 %v4029_v3 }
 0x488   :  { %1496 = vmatpush.msrb.mxu0 %v1349_v61  ;;  %v4087_v61 = vld [vmem:[#allocation14 + $0x98] sm:$0xff] }
 0x489   :  { %1614 = vmatpush.msra.mxu1 %v4031_v42 }
 0x48a   :  { %1497 = vmatpush.msrb.mxu0 %v1346_v35  ;;  %v4115_v35 = vld [vmem:[#allocation14 + $0x20] sm:$0xff] }
 0x48b   :  { %1425 = vmatmul.f32.gmra.mxu2 %v3876_v26  ;;  %4893 = vst [vmem:[#allocation39_spill] sm:$0xff] %v4115_v35 }
 0x493   :  { %1428 = vmatmul.f32.gmra.mxu2 %v3943_v4 }
 0x49b   :  { %1431 = vmatmul.f32.gmra.mxu2 %v3974_v22 }
 0x4e7   :  { %v1127_v48 = vpop.f32.mrf.mxu0  ;;  %v1147_v53 = vpop.f32.mrf.mxu1 }
 0x4e8   :  { %v1170_v59 = vadd.f32 %v1127_v48, %v4888_v56  ;;  %v1190_v63 = vadd.f32 %v1147_v53, %v4889_v60 }
 0x4ea   :  { %v2600_v51 = vmul.f32 -1.442695, %v1170_v59  ;;  %v2601_v58 = vmul.f32 -1.442695, %v1190_v63 }
 0x4ec   :  { %2712 = vpow2.f32 %v2600_v51 }
 0x4ed   :  { %2714 = vpow2.f32 %v2601_v58 }
 0x4ee   :  { %v1167_v59 = vpop.f32.mrf.mxu2 }
 0x4ef   :  { %v1210_v7 = vadd.f32 %v3969_v15, %v1167_v59 }
 0x4f2   :  { %v2713_v11 = vpop.eup %2712 }
 0x4f3   :  { %v2715_v32 = vpop.eup %2714  ;;  %v1174_v34 = vadd.f32 1.0, %v2713_v11 }
 0x4f4   :  { %v1194_v27 = vadd.f32 1.0, %v2715_v32 }
 0x4f5   :  { %2716 = vrcp.f32 %v1174_v34  ;;  %v1186_v44 = vand.u32 2147483648, %v1174_v34  ;;  %v1184_v53 = vand.u32 2147483647, %v1174_v34  ;;  %vm1180_vm1 = vweird.f32 %v1174_v34 }
 0x4f6   :  { %2718 = vrcp.f32 %v1194_v27  ;;  %v1206_v18 = vand.u32 2147483648, %v1194_v27  ;;  %vm1200_vm5 = vweird.f32 %v1194_v27  ;;  %v1204_v19 = vand.u32 2147483647, %v1194_v27 }
 0x4f7   :  { %v1187_v63 = vor.u32 1.1754944e-38, %v1186_v44  ;;  %vm1185_vm3 = vcmp.eq.f32.partialorder %v1184_v53, 8.507059e+37  ;;  %v4173_v53 = vld [vmem:[#allocation14 + $0x130] sm:$0xff] }
 0x4f8   :  { %v1207_v13 = vor.u32 1.1754944e-38, %v1206_v18  ;;  %vm1205_vm7 = vcmp.eq.f32.partialorder %v1204_v19, 8.507059e+37 }
 0x4fb   :  { %v2717_v54 = vpop.eup %2716 }
 0x4fc   :  { %v2719_v25 = vpop.eup %2718  ;;  %v1176_v8 = vmul.f32 %v2717_v54, %v1174_v34  ;;  %vm1181_vm0 = vweird.f32 %v2717_v54 }
 0x4fd   :  { %v1196_v0 = vmul.f32 %v2719_v25, %v1194_v27  ;;  %vm1182_vm2 = vmor %vm1180_vm1, %vm1181_vm0  ;;  %vm1201_vm4 = vweird.f32 %v2719_v25  ;;  %v4050_v27 = vld [vmem:[#allocation14 + $0x140] sm:$0xff] }
 0x4fe   :  { %v1177_v21 = vsub.f32 1.0, %v1176_v8  ;;  %vm1202_vm6 = vmor %vm1200_vm5, %vm1201_vm4  ;;  %v4097_v8 = vld [vmem:[#allocation14 + $0x68] sm:$0xff] }
 0x4ff   :  { %v1197_v41 = vsub.f32 1.0, %v1196_v0  ;;  %v4108_v0 = vld [vmem:[#allocation14 + $0x38] sm:$0xff] }
 0x500   :  { %v1178_v48 = vmul.f32 %v2717_v54, %v1177_v21  ;;  %v4120_v21 = vld [vmem:[#allocation14 + $0x8] sm:$0xff] }
 0x501   :  { %v1198_v56 = vmul.f32 %v2719_v25, %v1197_v41  ;;  %4894 = vst [vmem:[#allocation34_spill] sm:$0xff] %v4120_v21 }
 0x502   :  { %v1179_v60 = vadd.f32 %v2717_v54, %v1178_v48 }
 0x503   :  { %v1199_v51 = vadd.f32 %v2719_v25, %v1198_v56  ;;  %v4175_v56 = vld [vmem:[#allocation14 + $0x118] sm:$0xff] }
 0x504   :  { %v1183_v2 = vsel %vm1182_vm2, %v2717_v54, %v1179_v60  ;;  %v4071_v54 = vld [vmem:[#allocation14 + $0xe0] sm:$0xff] }
 0x505   :  { %v1188_v58 = vsel %vm1185_vm3, %v1187_v63, %v1183_v2  ;;  %v1203_v14 = vsel %vm1202_vm6, %v2719_v25, %v1199_v51  ;;  %v4092_v25 = vld [vmem:[#allocation14 + $0x80] sm:$0xff]  ;;  %v4184_v63 = vld [vmem:[#allocation14 + $0xe8] sm:$0xff] }
 0x506   :  { %v1211_v55 = vmul.f32 %v1210_v7, %v1188_v58  ;;  %v1208_v5 = vsel %vm1205_vm7, %v1207_v13, %v1203_v14  ;;  %v4179_v60 = vld [vmem:[#allocation14 + $0x100] sm:$0xff]  ;;  %v4190_v58 = vld [vmem:[#allocation14 + $0xd0] sm:$0xff] }
 0x507   :  { %v1214_v11 = vsub.f32 1.0, %v1208_v5  ;;  %v1216_v32 = vmul.f32 %v1208_v5, %v3974_v22  ;;  %v4897_v7 = vld [vmem:[#allocation35_spill] sm:$0xff]  ;;  %v4211_v5 = vld [vmem:[#allocation14 + $0x88] sm:$0xff] }
 0x508   :  { %v1212_v30 = vadd.f32 %v1211_v55, %v4891_v17  ;;  %v4195_v55 = vld [vmem:[#allocation14 + $0xb8] sm:$0xff] }
 0x50a   :  { %2720 = vtanh.f32 %v1212_v30  ;;  %v4207_v30 = vld [vmem:[#allocation14 + $0xa0] sm:$0xff] }
 0x510   :  { %v2721_v6 = vpop.eup %2720 }
 0x511   :  { %v1215_v28 = vmul.f32 %v2721_v6, %v1214_v11  ;;  %v4216_v11 = vld [vmem:[#allocation14 + $0x70] sm:$0xff] }
 0x513   :  { %v4038_v34 = vadd.f32 %v1216_v32, %v1215_v28  ;;  %v4223_v28 = vld [vmem:[#allocation14 + $0x58] sm:$0xff] }
 0x514   :  { %4898 = vst [vmem:[#allocation41_spill] sm:$0xff] %v4223_v28 }
 0x515   :  { %1242 = vmatmul.f32.vlgmr.msra.gmra.mxu3 %v4038_v34  ;;  %1262 = vmatmul.f32.vlgmr.msra.gmra.mxu0 %v4038_v34 }
 0x516   :  { %1282 = vmatmul.f32.vlgmr.msrb.gmra.mxu1 %v4038_v34  ;;  %1434 = vmatmul.f32.gmra.mxu2 %v4038_v34 }
 0x517   :  { %1619 = vmatpush.msrb.mxu1 %v4040_v12  ;;  %1714 = vmatpush.msra.mxu3 %v3985_v40 }
 0x518   :  { %1734 = vmatpush.msra.mxu0 %v4040_v12 }
 0x519   :  { %1620 = vmatpush.msrb.mxu1 %v4046_v31  ;;  %1715 = vmatpush.msra.mxu3 %v3988_v52 }
 0x51a   :  { %1735 = vmatpush.msra.mxu0 %v4046_v31 }
 0x51b   :  { %1621 = vmatpush.msrb.mxu1 %v4050_v27  ;;  %1716 = vmatpush.msra.mxu3 %v3991_v10 }
 0x51c   :  { %1736 = vmatpush.msra.mxu0 %v4050_v27 }
 0x51d   :  { %1622 = vmatpush.msrb.mxu1 %v4055_v29  ;;  %1457 = vmatmul.f32.vlgmr.msrb.gmra.mxu3 %v4886_v45 }
 0x51e   :  { %1498 = vmatmul.f32.vlgmr.msrb.gmra.mxu0 %v4886_v45  ;;  %1615 = vmatmul.f32.vlgmr.msra.gmra.mxu1 %v4892_v23  ;;  %v4081_v45 = vld [vmem:[#allocation14 + $0xb0] sm:$0xff] }
 0x51f   :  { %1623 = vmatpush.msrb.mxu1 %v4060_v62  ;;  %1717 = vmatpush.msra.mxu3 %v3994_v24 }
 0x520   :  { %1737 = vmatpush.msra.mxu0 %v4055_v29 }
 0x521   :  { %1624 = vmatpush.msrb.mxu1 %v4067_v20  ;;  %1718 = vmatpush.msra.mxu3 %v3997_v39 }
 0x522   :  { %1738 = vmatpush.msra.mxu0 %v4060_v62 }
 0x523   :  { %1625 = vmatpush.msrb.mxu1 %v4071_v54  ;;  %1719 = vmatpush.msra.mxu3 %v4000_v57 }
 0x524   :  { %1739 = vmatpush.msra.mxu0 %v4067_v20 }
 0x525   :  { %1626 = vmatpush.msrb.mxu1 %v4076_v49  ;;  %1460 = vmatmul.f32.gmra.mxu3 %v4887_v37 }
 0x526   :  { %1501 = vmatmul.f32.gmra.mxu0 %v4887_v37  ;;  %1720 = vmatpush.msra.mxu3 %v4003_v43  ;;  %v4102_v37 = vld [vmem:[#allocation14 + $0x50] sm:$0xff] }
 0x527   :  { %1627 = vmatpush.msrb.mxu1 %v4081_v45  ;;  %1740 = vmatpush.msra.mxu0 %v4071_v54 }
 0x528   :  { %1721 = vmatpush.msra.mxu3 %v4006_v50 }
 0x529   :  { %1628 = vmatpush.msrb.mxu1 %v4087_v61  ;;  %1741 = vmatpush.msra.mxu0 %v4076_v49 }
 0x52a   :  { %1722 = vmatpush.msra.mxu3 %v4009_v47 }
 0x52b   :  { %1629 = vmatpush.msrb.mxu1 %v4092_v25  ;;  %1742 = vmatpush.msra.mxu0 %v4081_v45 }
 0x52c   :  { %1723 = vmatpush.msra.mxu3 %v4014_v9 }
 0x52d   :  { %1630 = vmatpush.msrb.mxu1 %v4097_v8  ;;  %1463 = vmatmul.f32.gmra.mxu3 %v3762_v38 }
 0x52e   :  { %1504 = vmatmul.f32.gmra.mxu0 %v3762_v38  ;;  %1724 = vmatpush.msra.mxu3 %v4017_v36  ;;  %v4161_v38 = vld [vmem:[#allocation14 + $0x160] sm:$0xff] }
 0x52f   :  { %1631 = vmatpush.msrb.mxu1 %v4102_v37  ;;  %1743 = vmatpush.msra.mxu0 %v4087_v61 }
 0x530   :  { %1725 = vmatpush.msra.mxu3 %v4020_v1  ;;  %1640 = vmatpush.msrb.mxu2 %v4161_v38 }
 0x531   :  { %1632 = vmatpush.msrb.mxu1 %v4108_v0  ;;  %1744 = vmatpush.msra.mxu0 %v4092_v25 }
 0x532   :  { %1726 = vmatpush.msra.mxu3 %v4023_v33 }
 0x533   :  { %1633 = vmatpush.msrb.mxu1 %v4115_v35  ;;  %1745 = vmatpush.msra.mxu0 %v4097_v8 }
 0x534   :  { %1727 = vmatpush.msra.mxu3 %v4026_v16 }
 0x535   :  { %1634 = vmatpush.msrb.mxu1 %v4120_v21  ;;  %1466 = vmatmul.f32.gmra.mxu3 %v3876_v26 }
 0x536   :  { %1635 = vmatmul.f32.vlgmr.msrb.gmra.mxu1 %v4892_v23  ;;  %1507 = vmatmul.f32.gmra.mxu0 %v3876_v26  ;;  %v4163_v26 = vld [vmem:[#allocation14 + $0x148] sm:$0xff] }
 0x537   :  { %1754 = vmatpush.msra.mxu1 %v4110_v46  ;;  %1728 = vmatpush.msra.mxu3 %v4029_v3 }
 0x538   :  { %1746 = vmatpush.msra.mxu0 %v4102_v37  ;;  %1641 = vmatpush.msrb.mxu2 %v4163_v26 }
 0x539   :  { %1729 = vmatpush.msra.mxu3 %v4031_v42  ;;  %1755 = vmatpush.msra.mxu1 %v4161_v38 }
 0x53a   :  { %1747 = vmatpush.msra.mxu0 %v4108_v0  ;;  %1642 = vmatpush.msrb.mxu2 %v4173_v53 }
 0x53b   :  { %1847 = vmatpush.msrb.mxu3 %v4040_v12  ;;  %1756 = vmatpush.msra.mxu1 %v4163_v26 }
 0x53c   :  { %1748 = vmatpush.msra.mxu0 %v4115_v35  ;;  %1643 = vmatpush.msrb.mxu2 %v4175_v56 }
 0x53d   :  { %1848 = vmatpush.msrb.mxu3 %v4046_v31  ;;  %1757 = vmatpush.msra.mxu1 %v4173_v53 }
 0x53e   :  { %1469 = vmatmul.f32.gmra.mxu3 %v3943_v4  ;;  %1510 = vmatmul.f32.gmra.mxu0 %v3943_v4  ;;  %v4895_v4 = vld [vmem:[#allocation37_spill] sm:$0xff] }
 0x53f   :  { %1849 = vmatpush.msrb.mxu3 %v4050_v27  ;;  %1749 = vmatpush.msra.mxu0 %v4120_v21 }
 0x540   :  { %1758 = vmatpush.msra.mxu1 %v4175_v56  ;;  %1644 = vmatpush.msrb.mxu2 %v4179_v60 }
 0x541   :  { %1867 = vmatpush.msrb.mxu0 %v4110_v46  ;;  %1850 = vmatpush.msrb.mxu3 %v4055_v29 }
 0x542   :  { %1759 = vmatpush.msra.mxu1 %v4179_v60  ;;  %1645 = vmatpush.msrb.mxu2 %v4184_v63 }
 0x543   :  { %1851 = vmatpush.msrb.mxu3 %v4060_v62  ;;  %1868 = vmatpush.msrb.mxu0 %v4161_v38 }
 0x544   :  { %1760 = vmatpush.msra.mxu1 %v4184_v63  ;;  %1646 = vmatpush.msrb.mxu2 %v4190_v58 }
 0x545   :  { %1852 = vmatpush.msrb.mxu3 %v4067_v20  ;;  %1869 = vmatpush.msrb.mxu0 %v4163_v26 }
 0x546   :  { %1472 = vmatmul.f32.gmra.mxu3 %v3974_v22  ;;  %1513 = vmatmul.f32.gmra.mxu0 %v3974_v22  ;;  %v4896_v22 = vld [vmem:[#allocation27_spill] sm:$0xff] }
 0x547   :  { %1853 = vmatpush.msrb.mxu3 %v4071_v54  ;;  %v290_v41 = vadd.f32 %v4896_v22, %v4895_v4  ;;  %1870 = vmatpush.msrb.mxu0 %v4173_v53  ;;  %v4230_v4 = vld [vmem:[#allocation14 + $0x40] sm:$0xff] }
 0x548   :  { %1761 = vmatpush.msra.mxu1 %v4190_v58  ;;  %1647 = vmatpush.msrb.mxu2 %v4195_v55  ;;  %4899 = vst [vmem:[#allocation42_spill] sm:$0xff] %v4230_v4 }
 0x549   :  { %1854 = vmatpush.msrb.mxu3 %v4076_v49  ;;  %1871 = vmatpush.msrb.mxu0 %v4175_v56 }
 0x54a   :  { %1762 = vmatpush.msra.mxu1 %v4195_v55  ;;  %1648 = vmatpush.msrb.mxu2 %v4207_v30 }
 0x54b   :  { %1855 = vmatpush.msrb.mxu3 %v4081_v45  ;;  %1872 = vmatpush.msrb.mxu0 %v4179_v60 }
 0x54c   :  { %1763 = vmatpush.msra.mxu1 %v4207_v30  ;;  %1649 = vmatpush.msrb.mxu2 %v4211_v5 }
 0x54d   :  { %1856 = vmatpush.msrb.mxu3 %v4087_v61  ;;  %1873 = vmatpush.msrb.mxu0 %v4184_v63 }
 0x54e   :  { %1475 = vmatmul.f32.gmra.mxu3 %v4038_v34  ;;  %1516 = vmatmul.f32.gmra.mxu0 %v4038_v34 }
 0x54f   :  { %1857 = vmatpush.msrb.mxu3 %v4092_v25  ;;  %1874 = vmatpush.msrb.mxu0 %v4190_v58 }
 0x550   :  { %1764 = vmatpush.msra.mxu1 %v4211_v5  ;;  %1650 = vmatpush.msrb.mxu2 %v4216_v11 }
 0x551   :  { %1858 = vmatpush.msrb.mxu3 %v4097_v8  ;;  %1875 = vmatpush.msrb.mxu0 %v4195_v55 }
 0x552   :  { %1765 = vmatpush.msra.mxu1 %v4216_v11  ;;  %1651 = vmatpush.msrb.mxu2 %v4223_v28 }
 0x553   :  { %1859 = vmatpush.msrb.mxu3 %v4102_v37  ;;  %1876 = vmatpush.msrb.mxu0 %v4207_v30 }
 0x554   :  { %1766 = vmatpush.msra.mxu1 %v4223_v28  ;;  %1652 = vmatpush.msrb.mxu2 %v4230_v4 }
 0x555   :  { %1860 = vmatpush.msrb.mxu3 %v4108_v0  ;;  %1877 = vmatpush.msrb.mxu0 %v4211_v5 }
 0x556   :  { %1767 = vmatpush.msra.mxu1 %v4230_v4 }
 0x557   :  { %1861 = vmatpush.msrb.mxu3 %v4115_v35  ;;  %1878 = vmatpush.msrb.mxu0 %v4216_v11 }
 0x559   :  { %1862 = vmatpush.msrb.mxu3 %v4120_v21  ;;  %1879 = vmatpush.msrb.mxu0 %v4223_v28 }
 0x55b   :  { %1880 = vmatpush.msrb.mxu0 %v4230_v4 }
 0x592   :  { %v1263_v44 = vpop.f32.mrf.mxu0 }
 0x593   :  { %v1306_v48 = vadd.f32 %v1263_v44, %v290_v41  ;;  %v4235_v41 = vld [vmem:[#allocation14 + $0x28] sm:$0xff]  ;;  %v4237_v44 = vld [vmem:[#allocation14 + $0x10] sm:$0xff] }
 0x594   :  { %4900 = vst [vmem:[#allocation36_spill] sm:$0xff] %v4235_v41  ;;  %1653 = vmatpush.msrb.mxu2 %v4235_v41  ;;  %1768 = vmatpush.msra.mxu1 %v4235_v41 }
 0x595   :  { %v2603_v59 = vmul.f32 -1.442695, %v1306_v48  ;;  %4901 = vst [vmem:[#allocation43_spill] sm:$0xff] %v4237_v44  ;;  %1881 = vmatpush.msrb.mxu0 %v4235_v41 }
 0x596   :  { %1654 = vmatpush.msrb.mxu2 %v4237_v44  ;;  %1769 = vmatpush.msra.mxu1 %v4237_v44 }
 0x597   :  { %2722 = vpow2.f32 %v2603_v59  ;;  %1882 = vmatpush.msrb.mxu0 %v4237_v44 }
 0x598   :  { %v1243_v2 = vpop.f32.mrf.mxu3  ;;  %1827 = vmatpush.msra.mxu2 %v3985_v40  ;;  %1940 = vmatpush.msrb.mxu1 %v3985_v40 }
 0x599   :  { %v1286_v51 = vadd.f32 %v1243_v2, %v4897_v7 }
 0x59a   :  { %1828 = vmatpush.msra.mxu2 %v3988_v52  ;;  %1941 = vmatpush.msrb.mxu1 %v3988_v52 }
 0x59b   :  { %v2602_v18 = vmul.f32 -1.442695, %v1286_v51 }
 0x59c   :  { %1829 = vmatpush.msra.mxu2 %v3991_v10  ;;  %1942 = vmatpush.msrb.mxu1 %v3991_v10 }
 0x59d   :  { %v2723_v19 = vpop.eup %2722  ;;  %2724 = vpow2.f32 %v2602_v18 }
 0x59e   :  { %v4201_v17 = vadd.f32 1.0, %v2723_v19  ;;  %v1283_v19 = vpop.f32.mrf.mxu1  ;;  %1830 = vmatpush.msra.mxu2 %v3994_v24  ;;  %1943 = vmatpush.msrb.mxu1 %v3994_v24 }
 0x59f   :  { %v1326_v44 = vadd.f32 %v3969_v15, %v1283_v19 }
 0x5a0   :  { %2726 = vrcp.f32 %v4201_v17  ;;  %vm1316_vm13 = vweird.f32 %v4201_v17  ;;  %v1320_v15 = vand.u32 2147483647, %v4201_v17  ;;  %1831 = vmatpush.msra.mxu2 %v3997_v39  ;;  %1944 = vmatpush.msrb.mxu1 %v3997_v39 }
 0x5a2   :  { %1832 = vmatpush.msra.mxu2 %v4000_v57  ;;  %1945 = vmatpush.msrb.mxu1 %v4000_v57  ;;  %vm1321_vm15 = vcmp.eq.f32.partialorder %v1320_v15, 8.507059e+37 }
 0x5a3   :  { %v2725_v14 = vpop.eup %2724 }
 0x5a4   :  { %v1290_v13 = vadd.f32 1.0, %v2725_v14  ;;  %1833 = vmatpush.msra.mxu2 %v4003_v43  ;;  %1946 = vmatpush.msrb.mxu1 %v4003_v43 }
 0x5a6   :  { %2728 = vrcp.f32 %v1290_v13  ;;  %v4219_v6 = vpop.eup %2726  ;;  %v1302_v7 = vand.u32 2147483648, %v1290_v13  ;;  %v1300_v18 = vand.u32 2147483647, %v1290_v13  ;;  %vm1296_vm9 = vweird.f32 %v1290_v13  ;;  %1834 = vmatpush.msra.mxu2 %v4006_v50  ;;  %1947 = vmatpush.msrb.mxu1 %v4006_v50 }
 0x5a7   :  { %v1312_v32 = vmul.f32 %v4219_v6, %v4201_v17  ;;  %vm1317_vm12 = vweird.f32 %v4219_v6 }
 0x5a8   :  { %vm1301_vm11 = vcmp.eq.f32.partialorder %v1300_v18, 8.507059e+37  ;;  %vm1318_vm14 = vmor %vm1316_vm13, %vm1317_vm12  ;;  %1835 = vmatpush.msra.mxu2 %v4009_v47  ;;  %1948 = vmatpush.msrb.mxu1 %v4009_v47 }
 0x5a9   :  { %v1313_v59 = vsub.f32 1.0, %v1312_v32 }
 0x5aa   :  { %1836 = vmatpush.msra.mxu2 %v4014_v9  ;;  %1949 = vmatpush.msrb.mxu1 %v4014_v9 }
 0x5ab   :  { %v1314_v14 = vmul.f32 %v4219_v6, %v1313_v59  ;;  %v4903_v59 = vld [vmem:[#allocation23_spill] sm:$0xff] }
 0x5ac   :  { %v2729_v22 = vpop.eup %2728  ;;  %1837 = vmatpush.msra.mxu2 %v4017_v36  ;;  %1950 = vmatpush.msrb.mxu1 %v4017_v36 }
 0x5ad   :  { %v1292_v48 = vmul.f32 %v2729_v22, %v1290_v13  ;;  %vm1297_vm8 = vweird.f32 %v2729_v22  ;;  %v1315_v4 = vadd.f32 %v4219_v6, %v1314_v14  ;;  %v4902_v13 = vld [vmem:[#allocation40_spill] sm:$0xff]  ;;  %v1392_v14 = vld [vmem:[%s4778_s7] sm:$0x7] }
 0x5ae   :  { %vm1298_vm10 = vmor %vm1296_vm9, %vm1297_vm8  ;;  %1838 = vmatpush.msra.mxu2 %v4020_v1  ;;  %1951 = vmatpush.msrb.mxu1 %v4020_v1 }
 0x5af   :  { %v1293_v2 = vsub.f32 1.0, %v1292_v48  ;;  %v1303_v48 = vor.u32 1.1754944e-38, %v1302_v7  ;;  %v1322_v7 = vand.u32 2147483648, %v4201_v17  ;;  %v1319_v18 = vsel %vm1318_vm14, %v4219_v6, %v1315_v4 }
 0x5b0   :  { %1839 = vmatpush.msra.mxu2 %v4023_v33  ;;  %1952 = vmatpush.msrb.mxu1 %v4023_v33 }
 0x5b1   :  { %v1294_v51 = vmul.f32 %v2729_v22, %v1293_v2  ;;  %v1323_v19 = vor.u32 1.1754944e-38, %v1322_v7  ;;  %v1458_v7 = vpop.f32.mrf.mxu3 }
 0x5b2   :  { %1840 = vmatpush.msra.mxu2 %v4026_v16  ;;  %1953 = vmatpush.msrb.mxu1 %v4026_v16 }
 0x5b3   :  { %v1295_v32 = vadd.f32 %v2729_v22, %v1294_v51  ;;  %v331_v51 = vadd.f32 %v4903_v59, %v4902_v13 }
 0x5b4   :  { %1841 = vmatpush.msra.mxu2 %v4029_v3  ;;  %1954 = vmatpush.msrb.mxu1 %v4029_v3 }
 0x5b5   :  { %v1299_v2 = vsel %vm1298_vm10, %v2729_v22, %v1295_v32 }
 0x5b6   :  { %v1304_v41 = vsel %vm1301_vm11, %v1303_v48, %v1299_v2  ;;  %1842 = vmatpush.msra.mxu2 %v4031_v42  ;;  %1955 = vmatpush.msrb.mxu1 %v4031_v42  ;;  %v4313_v48 = vperm.slane %v1392_v14, 0  ;;  %v1616_v2 = vpop.f32.mrf.mxu1 }
 0x5b7   :  { %v1327_v28 = vmul.f32 %v1326_v44, %v1304_v41  ;;  %v1324_v41 = vsel %vm1321_vm15, %v1323_v19, %v1319_v18 }
 0x5b8   :  { %v1330_v17 = vsub.f32 1.0, %v1324_v41  ;;  %v1332_v4 = vmul.f32 %v1324_v41, %v4038_v34  ;;  %v1417_v34 = vpop.f32.mrf.mxu2  ;;  %4906 = vst [vmem:[#allocation24_spill] sm:$0xff] %v4313_v48 }
 0x5b9   :  { %v1328_v22 = vadd.f32 %v1327_v28, %v331_v51  ;;  %v1418_v13 = vadd.f32 %v1417_v34, %v4313_v48  ;;  %v4316_v51 = vperm.slane %v1392_v14, 1 }
 0x5bb   :  { %2730 = vtanh.f32 %v1328_v22  ;;  %v1659_v59 = vadd.f32 %v1616_v2, %v1418_v13  ;;  %4907 = vst [vmem:[#allocation32_spill] sm:$0xff] %v4316_v51  ;;  %v1459_v19 = vadd.f32 %v1458_v7, %v4316_v51 }
 0x5bd   :  { %v2604_v22 = vmul.f32 -1.442695, %v1659_v59 }
 0x5be   :  { %v1636_v18 = vpop.f32.mrf.mxu1 }
 0x5bf   :  { %v1679_v41 = vadd.f32 %v1636_v18, %v1459_v19  ;;  %2732 = vpow2.f32 %v2604_v22 }
 0x5c1   :  { %v2731_v6 = vpop.eup %2730 }
 0x5c2   :  { %v1331_v28 = vmul.f32 %v2731_v6, %v1330_v17  ;;  %v2605_v17 = vmul.f32 -1.442695, %v1679_v41 }
 0x5c4   :  { %v1333_v44 = vadd.f32 %v1332_v4, %v1331_v28  ;;  %2734 = vpow2.f32 %v2605_v17 }
 0x5c5   :  { %v2733_v28 = vpop.eup %2732 }
 0x5c6   :  { %1437 = vmatmul.f32.gmra.mxu2 %v1333_v44  ;;  %1478 = vmatmul.f32.gmra.mxu3 %v1333_v44  ;;  %v1663_v4 = vadd.f32 1.0, %v2733_v28 }
 0x5c7   :  { %1519 = vmatmul.f32.gmra.mxu0 %v1333_v44 }
 0x5c8   :  { %2736 = vrcp.f32 %v1663_v4  ;;  %v1675_v17 = vand.u32 2147483648, %v1663_v4  ;;  %vm1669_vm1 = vweird.f32 %v1663_v4  ;;  %v1673_v28 = vand.u32 2147483647, %v1663_v4 }
 0x5ca   :  { %v2735_v44 = vpop.eup %2734  ;;  %v1676_v48 = vor.u32 1.1754944e-38, %v1675_v17  ;;  %vm1674_vm3 = vcmp.eq.f32.partialorder %v1673_v28, 8.507059e+37 }
 0x5cb   :  { %v1683_v2 = vadd.f32 1.0, %v2735_v44  ;;  %v4332_v44 = vld [vmem:[%s4779_s8] ss:$0 sm:$0xff] }
 0x5cd   :  { %2738 = vrcp.f32 %v1683_v2  ;;  %vm1689_vm5 = vweird.f32 %v1683_v2  ;;  %v1693_v42 = vand.u32 2147483647, %v1683_v2 }
 0x5ce   :  { %1655 = vmatmul.f32.vlgmr.msrb.gmra.mxu2 %v4892_v23  ;;  %v4306_v23 = vpop.f32.mrf.mxu2  ;;  %v2737_v13 = vpop.eup %2736 }
 0x5cf   :  { %1960 = vmatpush.msrb.mxu2 %v4040_v12  ;;  %4904 = vst [vmem:[#allocation28_spill] sm:$0xff] %v4306_v23  ;;  %vm1670_vm0 = vweird.f32 %v2737_v13  ;;  %v1499_v23 = vpop.f32.mrf.mxu0  ;;  %vm1694_vm7 = vcmp.eq.f32.partialorder %v1693_v42, 8.507059e+37 }
 0x5d0   :  { %vm1671_vm2 = vmor %vm1669_vm1, %vm1670_vm0 }
 0x5d1   :  { %1961 = vmatpush.msrb.mxu2 %v4046_v31 }
 0x5d3   :  { %1962 = vmatpush.msrb.mxu2 %v4050_v27 }
 0x5d5   :  { %1963 = vmatpush.msrb.mxu2 %v4055_v29 }
 0x5d6   :  { %v4311_v32 = vpop.f32.mrf.mxu2 }
 0x5d7   :  { %1964 = vmatpush.msrb.mxu2 %v4060_v62  ;;  %4905 = vst [vmem:[#allocation26_spill] sm:$0xff] %v4311_v32  ;;  %v2739_v32 = vpop.eup %2738 }
 0x5d8   :  { %v1685_v18 = vmul.f32 %v2739_v32, %v1683_v2  ;;  %vm1690_vm4 = vweird.f32 %v2739_v32 }
 0x5d9   :  { %1965 = vmatpush.msrb.mxu2 %v4067_v20  ;;  %vm1691_vm6 = vmor %vm1689_vm5, %vm1690_vm4 }
 0x5da   :  { %v1686_v41 = vsub.f32 1.0, %v1685_v18 }
 0x5db   :  { %1966 = vmatpush.msrb.mxu2 %v4071_v54 }
 0x5dd   :  { %1967 = vmatpush.msrb.mxu2 %v4076_v49 }
 0x5de   :  { %v4318_v15 = vpop.f32.mrf.mxu2 }
 0x5df   :  { %1968 = vmatpush.msrb.mxu2 %v4081_v45  ;;  %4908 = vst [vmem:[#allocation30_spill] sm:$0xff] %v4318_v15  ;;  %v1665_v15 = vmul.f32 %v2737_v13, %v1663_v4 }
 0x5e1   :  { %1969 = vmatpush.msrb.mxu2 %v4087_v61  ;;  %v1666_v7 = vsub.f32 1.0, %v1665_v15 }
 0x5e3   :  { %1970 = vmatpush.msrb.mxu2 %v4092_v25  ;;  %v1667_v22 = vmul.f32 %v2737_v13, %v1666_v7 }
 0x5e5   :  { %1971 = vmatpush.msrb.mxu2 %v4097_v8 }
 0x5e6   :  { %v4321_v6 = vpop.f32.mrf.mxu2 }
 0x5e7   :  { %1972 = vmatpush.msrb.mxu2 %v4102_v37  ;;  %4909 = vst [vmem:[#allocation29_spill] sm:$0xff] %v4321_v6  ;;  %v1668_v6 = vadd.f32 %v2737_v13, %v1667_v22 }
 0x5e9   :  { %1973 = vmatpush.msrb.mxu2 %v4108_v0  ;;  %v1672_v15 = vsel %vm1671_vm2, %v2737_v13, %v1668_v6 }
 0x5ea   :  { %v1677_v22 = vsel %vm1674_vm3, %v1676_v48, %v1672_v15 }
 0x5eb   :  { %1974 = vmatpush.msrb.mxu2 %v4115_v35 }
 0x5ed   :  { %1975 = vmatpush.msrb.mxu2 %v4120_v21  ;;  %v1695_v21 = vand.u32 2147483648, %v1683_v2 }
 0x5ee   :  { %v4323_v34 = vpop.f32.mrf.mxu2 }
 0x5ef   :  { %4910 = vst [vmem:[#allocation44_spill] sm:$0xff] %v4323_v34  ;;  %v1687_v34 = vmul.f32 %v2739_v32, %v1686_v41  ;;  %v1696_v6 = vor.u32 1.1754944e-38, %v1695_v21 }
 0x5f6   :  { %v4325_v59 = vpop.f32.mrf.mxu2 }
 0x5f7   :  { %4911 = vst [vmem:[#allocation45_spill] sm:$0xff] %v4325_v59  ;;  %v4334_v59 = vperm.slane %v1392_v14, 2 }
 0x5f9   :  { %v1500_v4 = vadd.f32 %v1499_v23, %v4334_v59 }
 0x649   :  { %v4327_v19 = vpop.f32.mrf.mxu2 }
 0x64a   :  { %4912 = vst [vmem:[#allocation31_spill] sm:$0xff] %v4327_v19  ;;  %v1688_v19 = vadd.f32 %v2739_v32, %v1687_v34  ;;  %v4927_v34 = vld [vmem:[#allocation32_spill] sm:$0xff] }
 0x64c   :  { %v1692_v14 = vsel %vm1691_vm6, %v2739_v32, %v1688_v19 }
 0x64d   :  { %v1697_v13 = vsel %vm1694_vm7, %v1696_v6, %v1692_v14 }
 0x64e   :  { %v1706_v17 = vsub.f32 1.0, %v1697_v13 }
 0x651   :  { %v1656_v7 = vpop.f32.mrf.mxu2 }
 0x652   :  { %v1702_v18 = vadd.f32 %v4332_v44, %v1656_v7  ;;  %v1708_v7 = vmul.f32 0.0, %v1697_v13 }
 0x654   :  { %v1703_v51 = vmul.f32 %v1702_v18, %v1677_v22  ;;  %v4928_v22 = vld [vmem:[#allocation24_spill] sm:$0xff] }
 0x656   :  { %v1704_v41 = vadd.f32 %v1703_v51, %v1500_v4  ;;  %v4929_v4 = vld [vmem:[#allocation28_spill] sm:$0xff] }
 0x658   :  { %2740 = vtanh.f32 %v1704_v41  ;;  %v1421_v41 = vadd.f32 %v4929_v4, %v4928_v22 }
 0x65e   :  { %v2741_v28 = vpop.eup %2740 }
 0x65f   :  { %v1707_v35 = vmul.f32 %v2741_v28, %v1706_v17 }
 0x661   :  { %v4338_v48 = vadd.f32 %v1708_v7, %v1707_v35 }
 0x663   :  { %1730 = vmatmul.f32.vlgmr.msra.gmra.mxu3 %v4338_v48  ;;  %1750 = vmatmul.f32.vlgmr.msra.gmra.mxu0 %v4338_v48 }
 0x664   :  { %1770 = vmatmul.f32.vlgmr.msra.gmra.mxu1 %v4338_v48  ;;  %1980 = vmatpush.msra.mxu3 %v4110_v46 }
 0x665   :  { %2053 = vmatpush.msra.mxu0 %v3985_v40  ;;  %2073 = vmatpush.msra.mxu1 %v4040_v12  ;;  %v4913_v40 = vld [vmem:[#allocation41_spill] sm:$0xff] }
 0x666   :  { %1981 = vmatpush.msra.mxu3 %v4161_v38 }
 0x667   :  { %2054 = vmatpush.msra.mxu0 %v3988_v52  ;;  %2074 = vmatpush.msra.mxu1 %v4046_v31  ;;  %v4914_v52 = vld [vmem:[#allocation42_spill] sm:$0xff] }
 0x668   :  { %1982 = vmatpush.msra.mxu3 %v4163_v26 }
 0x669   :  { %2055 = vmatpush.msra.mxu0 %v3991_v10  ;;  %2075 = vmatpush.msra.mxu1 %v4050_v27  ;;  %v4915_v10 = vld [vmem:[#allocation36_spill] sm:$0xff] }
 0x66a   :  { %1983 = vmatpush.msra.mxu3 %v4173_v53 }
 0x66b   :  { %2056 = vmatpush.msra.mxu0 %v3994_v24  ;;  %2076 = vmatpush.msra.mxu1 %v4055_v29  ;;  %v4916_v24 = vld [vmem:[#allocation39_spill] sm:$0xff] }
 0x66c   :  { %1984 = vmatpush.msra.mxu3 %v4175_v56 }
 0x66d   :  { %2057 = vmatpush.msra.mxu0 %v3997_v39  ;;  %2077 = vmatpush.msra.mxu1 %v4060_v62  ;;  %v4917_v39 = vld [vmem:[#allocation43_spill] sm:$0xff] }
 0x66e   :  { %1985 = vmatpush.msra.mxu3 %v4179_v60 }
 0x66f   :  { %2058 = vmatpush.msra.mxu0 %v4000_v57  ;;  %2078 = vmatpush.msra.mxu1 %v4067_v20  ;;  %v4918_v57 = vld [vmem:[#allocation38_spill] sm:$0xff] }
 0x670   :  { %1986 = vmatpush.msra.mxu3 %v4184_v63 }
 0x671   :  { %2059 = vmatpush.msra.mxu0 %v4003_v43  ;;  %2079 = vmatpush.msra.mxu1 %v4071_v54  ;;  %v4919_v43 = vld [vmem:[#allocation34_spill] sm:$0xff] }
 0x672   :  { %1987 = vmatpush.msra.mxu3 %v4190_v58 }
 0x673   :  { %2060 = vmatpush.msra.mxu0 %v4006_v50  ;;  %2080 = vmatpush.msra.mxu1 %v4076_v49  ;;  %v1502_v50 = vpop.f32.mrf.mxu0 }
 0x674   :  { %1988 = vmatpush.msra.mxu3 %v4195_v55 }
 0x675   :  { %2061 = vmatpush.msra.mxu0 %v4009_v47  ;;  %2081 = vmatpush.msra.mxu1 %v4081_v45  ;;  %v1461_v47 = vpop.f32.mrf.mxu3 }
 0x676   :  { %1989 = vmatpush.msra.mxu3 %v4207_v30  ;;  %v1462_v2 = vadd.f32 %v1461_v47, %v4927_v34 }
 0x677   :  { %2062 = vmatpush.msra.mxu0 %v4014_v9  ;;  %2082 = vmatpush.msra.mxu1 %v4087_v61 }
 0x678   :  { %1990 = vmatpush.msra.mxu3 %v4211_v5 }
 0x679   :  { %2063 = vmatpush.msra.mxu0 %v4017_v36  ;;  %2083 = vmatpush.msra.mxu1 %v4092_v25 }
 0x67a   :  { %1991 = vmatpush.msra.mxu3 %v4216_v11 }
 0x67b   :  { %2064 = vmatpush.msra.mxu0 %v4020_v1  ;;  %2084 = vmatpush.msra.mxu1 %v4097_v8  ;;  %v4391_v9 = vpop.f32.mrf.mxu0 }
 0x67c   :  { %1992 = vmatpush.msra.mxu3 %v4913_v40 }
 0x67d   :  { %2065 = vmatpush.msra.mxu0 %v4023_v33  ;;  %2085 = vmatpush.msra.mxu1 %v4102_v37  ;;  %v4393_v36 = vpop.f32.mrf.mxu3 }
 0x67e   :  { %1993 = vmatpush.msra.mxu3 %v4914_v52 }
 0x67f   :  { %2066 = vmatpush.msra.mxu0 %v4026_v16  ;;  %2086 = vmatpush.msra.mxu1 %v4108_v0 }
 0x680   :  { %1994 = vmatpush.msra.mxu3 %v4915_v10 }
 0x681   :  { %2067 = vmatpush.msra.mxu0 %v4029_v3  ;;  %2087 = vmatpush.msra.mxu1 %v4916_v24 }
 0x682   :  { %1995 = vmatpush.msra.mxu3 %v4917_v39 }
 0x683   :  { %2068 = vmatpush.msra.mxu0 %v4918_v57  ;;  %2088 = vmatpush.msra.mxu1 %v4919_v43  ;;  %v4395_v1 = vpop.f32.mrf.mxu0 }
 0x685   :  { %v4397_v33 = vpop.f32.mrf.mxu3 }
 0x68b   :  { %v4399_v16 = vpop.f32.mrf.mxu0 }
 0x68c   :  { %4920 = vst [vmem:[#allocation47_spill] sm:$0xff] %v4399_v16 }
 0x68d   :  { %v4401_v3 = vpop.f32.mrf.mxu3 }
 0x693   :  { %v4403_v42 = vpop.f32.mrf.mxu0 }
 0x694   :  { %4921 = vst [vmem:[#allocation48_spill] sm:$0xff] %v4403_v42 }
 0x695   :  { %v4405_v35 = vpop.f32.mrf.mxu3 }
 0x696   :  { %4922 = vst [vmem:[#allocation46_spill] sm:$0xff] %v4405_v35 }
 0x69b   :  { %v4407_v21 = vpop.f32.mrf.mxu0 }
 0x69c   :  { %4923 = vst [vmem:[#allocation25_spill] sm:$0xff] %v4407_v21 }
 0x69d   :  { %v4409_v23 = vpop.f32.mrf.mxu3 }
 0x69e   :  { %4924 = vst [vmem:[#allocation33_spill] sm:$0xff] %v4409_v23 }
 0x6a3   :  { %v4411_v32 = vpop.f32.mrf.mxu0 }
 0x6a4   :  { %4925 = vst [vmem:[#allocation49_spill] sm:$0xff] %v4411_v32 }
 0x6a5   :  { %v4413_v51 = vpop.f32.mrf.mxu3 }
 0x6a6   :  { %4926 = vst [vmem:[#allocation50_spill] sm:$0xff] %v4413_v51 }
 0x6e0   :  { %v1751_v19 = vpop.f32.mrf.mxu0 }
 0x6e1   :  { %v1794_v15 = vadd.f32 %v1751_v19, %v1462_v2 }
 0x6e3   :  { %v2607_v18 = vmul.f32 -1.442695, %v1794_v15 }
 0x6e5   :  { %2742 = vpow2.f32 %v2607_v18 }
 0x6e6   :  { %v1731_v14 = vpop.f32.mrf.mxu3 }
 0x6e7   :  { %v1774_v6 = vadd.f32 %v1731_v14, %v1421_v41  ;;  %v1771_v41 = vpop.f32.mrf.mxu1 }
 0x6e9   :  { %v2606_v13 = vmul.f32 -1.442695, %v1774_v6 }
 0x6eb   :  { %v2743_v17 = vpop.eup %2742  ;;  %2744 = vpow2.f32 %v2606_v13  ;;  %v1814_v13 = vadd.f32 %v4332_v44, %v1771_v41 }
 0x6ec   :  { %v1798_v28 = vadd.f32 1.0, %v2743_v17 }
 0x6ee   :  { %2746 = vrcp.f32 %v1798_v28  ;;  %vm1804_vm13 = vweird.f32 %v1798_v28 }
 0x6f1   :  { %v2745_v7 = vpop.eup %2744 }
 0x6f2   :  { %v1778_v57 = vadd.f32 1.0, %v2745_v7 }
 0x6f4   :  { %2748 = vrcp.f32 %v1778_v57  ;;  %v2747_v32 = vpop.eup %2746  ;;  %v1790_v15 = vand.u32 2147483648, %v1778_v57  ;;  %v1788_v18 = vand.u32 2147483647, %v1778_v57  ;;  %vm1784_vm9 = vweird.f32 %v1778_v57 }
 0x6f5   :  { %v1800_v51 = vmul.f32 %v2747_v32, %v1798_v28  ;;  %vm1805_vm12 = vweird.f32 %v2747_v32 }
 0x6f6   :  { %v1791_v6 = vor.u32 1.1754944e-38, %v1790_v15  ;;  %vm1789_vm11 = vcmp.eq.f32.partialorder %v1788_v18, 8.507059e+37  ;;  %vm1806_vm14 = vmor %vm1804_vm13, %vm1805_vm12 }
 0x6f7   :  { %v1801_v2 = vsub.f32 1.0, %v1800_v51  ;;  %v1503_v51 = vadd.f32 %v1502_v50, %v4334_v59  ;;  %v4427_v50 = vld [vmem:[#allocation14 + $0x168] sm:$0xff] }
 0x6f9   :  { %v1802_v4 = vmul.f32 %v2747_v32, %v1801_v2 }
 0x6fa   :  { %v2749_v47 = vpop.eup %2748 }
 0x6fb   :  { %v1780_v21 = vmul.f32 %v2749_v47, %v1778_v57  ;;  %vm1785_vm8 = vweird.f32 %v2749_v47  ;;  %v1803_v42 = vadd.f32 %v2747_v32, %v1802_v4 }
 0x6fc   :  { %vm1786_vm10 = vmor %vm1784_vm9, %vm1785_vm8 }
 0x6fd   :  { %v1781_v19 = vsub.f32 1.0, %v1780_v21  ;;  %v1810_v21 = vand.u32 2147483648, %v1798_v28  ;;  %v1807_v16 = vsel %vm1806_vm14, %v2747_v32, %v1803_v42 }
 0x6ff   :  { %v1782_v23 = vmul.f32 %v2749_v47, %v1781_v19  ;;  %v1808_v19 = vand.u32 2147483647, %v1798_v28 }
 0x701   :  { %v1783_v14 = vadd.f32 %v2749_v47, %v1782_v23  ;;  %v1811_v23 = vor.u32 1.1754944e-38, %v1810_v21  ;;  %vm1809_vm15 = vcmp.eq.f32.partialorder %v1808_v19, 8.507059e+37 }
 0x703   :  { %v1787_v17 = vsel %vm1786_vm10, %v2749_v47, %v1783_v14  ;;  %v1812_v57 = vsel %vm1809_vm15, %v1811_v23, %v1807_v16  ;;  %v4432_v16 = vld [vmem:[#allocation14 + $0x150] sm:$0xff] }
 0x704   :  { %v1792_v7 = vsel %vm1789_vm11, %v1791_v6, %v1787_v17  ;;  %v1818_v15 = vsub.f32 1.0, %v1812_v57  ;;  %v1820_v18 = vmul.f32 %v1812_v57, %v4338_v48  ;;  %v4437_v48 = vld [vmem:[#allocation14 + $0x138] sm:$0xff] }
 0x705   :  { %v1815_v35 = vmul.f32 %v1814_v13, %v1792_v7 }
 0x707   :  { %v1816_v2 = vadd.f32 %v1815_v35, %v1503_v51 }
 0x709   :  { %2750 = vtanh.f32 %v1816_v2 }
 0x70f   :  { %v2751_v41 = vpop.eup %2750 }
 0x710   :  { %v1819_v47 = vmul.f32 %v2751_v41, %v1818_v15 }
 0x712   :  { %v4421_v4 = vadd.f32 %v1820_v18, %v1819_v47 }
 0x714   :  { %1843 = vmatmul.f32.vlgmr.msra.gmra.mxu2 %v4421_v4  ;;  %1863 = vmatmul.f32.vlgmr.msrb.gmra.mxu3 %v4421_v4 }
 0x715   :  { %1883 = vmatmul.f32.vlgmr.msrb.gmra.mxu0 %v4421_v4  ;;  %2093 = vmatpush.msra.mxu2 %v4110_v46  ;;  %v4442_v46 = vld [vmem:[#allocation14 + $0x120] sm:$0xff] }
 0x716   :  { %2166 = vmatpush.msrb.mxu3 %v4427_v50  ;;  %2186 = vmatpush.msrb.mxu0 %v4040_v12  ;;  %v4447_v12 = vld [vmem:[#allocation14 + $0x108] sm:$0xff] }
 0x717   :  { %2094 = vmatpush.msra.mxu2 %v4161_v38 }
 0x718   :  { %2167 = vmatpush.msrb.mxu3 %v4432_v16  ;;  %2187 = vmatpush.msrb.mxu0 %v4046_v31  ;;  %v4452_v31 = vld [vmem:[#allocation14 + $0xf0] sm:$0xff] }
 0x719   :  { %2095 = vmatpush.msra.mxu2 %v4163_v26 }
 0x71a   :  { %2168 = vmatpush.msrb.mxu3 %v4437_v48  ;;  %2188 = vmatpush.msrb.mxu0 %v4050_v27  ;;  %v4457_v27 = vld [vmem:[#allocation14 + $0xd8] sm:$0xff] }
 0x71b   :  { %2096 = vmatpush.msra.mxu2 %v4173_v53 }
 0x71c   :  { %2169 = vmatpush.msrb.mxu3 %v4442_v46  ;;  %2189 = vmatpush.msrb.mxu0 %v4055_v29  ;;  %v4462_v29 = vld [vmem:[#allocation14 + $0xc0] sm:$0xff] }
 0x71d   :  { %2097 = vmatpush.msra.mxu2 %v4175_v56 }
 0x71e   :  { %2170 = vmatpush.msrb.mxu3 %v4447_v12  ;;  %2190 = vmatpush.msrb.mxu0 %v4060_v62  ;;  %v4467_v62 = vld [vmem:[#allocation14 + $0xa8] sm:$0xff] }
 0x71f   :  { %2098 = vmatpush.msra.mxu2 %v4179_v60 }
 0x720   :  { %2171 = vmatpush.msrb.mxu3 %v4452_v31  ;;  %2191 = vmatpush.msrb.mxu0 %v4067_v20  ;;  %v4472_v20 = vld [vmem:[#allocation14 + $0x90] sm:$0xff] }
 0x721   :  { %2099 = vmatpush.msra.mxu2 %v4184_v63 }
 0x722   :  { %2172 = vmatpush.msrb.mxu3 %v4457_v27  ;;  %2192 = vmatpush.msrb.mxu0 %v4071_v54  ;;  %v4477_v54 = vld [vmem:[#allocation14 + $0x78] sm:$0xff] }
 0x723   :  { %2100 = vmatpush.msra.mxu2 %v4190_v58 }
 0x724   :  { %2173 = vmatpush.msrb.mxu3 %v4462_v29  ;;  %2193 = vmatpush.msrb.mxu0 %v4076_v49  ;;  %v4482_v49 = vld [vmem:[#allocation14 + $0x60] sm:$0xff] }
 0x725   :  { %2101 = vmatpush.msra.mxu2 %v4195_v55 }
 0x726   :  { %2174 = vmatpush.msrb.mxu3 %v4467_v62  ;;  %2194 = vmatpush.msrb.mxu0 %v4081_v45  ;;  %v4487_v45 = vld [vmem:[#allocation14 + $0x48] sm:$0xff] }
 0x727   :  { %2102 = vmatpush.msra.mxu2 %v4207_v30 }
 0x728   :  { %2175 = vmatpush.msrb.mxu3 %v4472_v20  ;;  %2195 = vmatpush.msrb.mxu0 %v4087_v61  ;;  %v4492_v61 = vld [vmem:[#allocation14 + $0x30] sm:$0xff] }
 0x729   :  { %2103 = vmatpush.msra.mxu2 %v4211_v5 }
 0x72a   :  { %2176 = vmatpush.msrb.mxu3 %v4477_v54  ;;  %2196 = vmatpush.msrb.mxu0 %v4092_v25  ;;  %v4497_v25 = vld [vmem:[#allocation14 + $0x18] sm:$0xff] }
 0x72b   :  { %2104 = vmatpush.msra.mxu2 %v4216_v11 }
 0x72c   :  { %2177 = vmatpush.msrb.mxu3 %v4482_v49  ;;  %2197 = vmatpush.msrb.mxu0 %v4097_v8  ;;  %v4502_v8 = vld [vmem:[#allocation14] sm:$0xff] }
 0x72d   :  { %2105 = vmatpush.msra.mxu2 %v4913_v40 }
 0x72e   :  { %2178 = vmatpush.msrb.mxu3 %v4487_v45  ;;  %2198 = vmatpush.msrb.mxu0 %v4102_v37  ;;  %v4930_v37 = vld [vmem:[#allocation26_spill] sm:$0xff] }
 0x72f   :  { %2106 = vmatpush.msra.mxu2 %v4914_v52  ;;  %v1424_v42 = vadd.f32 %v4930_v37, %v4928_v22 }
 0x730   :  { %2179 = vmatpush.msrb.mxu3 %v4492_v61  ;;  %2199 = vmatpush.msrb.mxu0 %v4108_v0  ;;  %v1465_v0 = vadd.f32 %v4393_v36, %v4927_v34 }
 0x731   :  { %2107 = vmatpush.msra.mxu2 %v4915_v10 }
 0x732   :  { %2180 = vmatpush.msrb.mxu3 %v4497_v25  ;;  %2200 = vmatpush.msrb.mxu0 %v4916_v24 }
 0x733   :  { %2108 = vmatpush.msra.mxu2 %v4917_v39 }
 0x734   :  { %2181 = vmatpush.msrb.mxu3 %v4502_v8  ;;  %2201 = vmatpush.msrb.mxu0 %v4919_v43 }
 0x792   :  { %v1884_v47 = vpop.f32.mrf.mxu0 }
 0x797   :  { %v1844_v35 = vpop.f32.mrf.mxu2  ;;  %v1864_v32 = vpop.f32.mrf.mxu3 }
 0x798   :  { %v1887_v28 = vadd.f32 %v1844_v35, %v1424_v42  ;;  %v1907_v14 = vadd.f32 %v1864_v32, %v1465_v0  ;;  %v1927_v0 = vadd.f32 %v4332_v44, %v1884_v47 }
 0x79a   :  { %v2608_v6 = vmul.f32 -1.442695, %v1887_v28  ;;  %v2609_v24 = vmul.f32 -1.442695, %v1907_v14  ;;  %v1506_v14 = vadd.f32 %v4391_v9, %v4334_v59  ;;  %v4519_v9 = vld [vmem:[#allocation14 + $0x178] sm:$0xff] }
 0x79c   :  { %2752 = vpow2.f32 %v2608_v6 }
 0x79d   :  { %2754 = vpow2.f32 %v2609_v24 }
 0x7a2   :  { %v2753_v13 = vpop.eup %2752 }
 0x7a3   :  { %v2755_v17 = vpop.eup %2754  ;;  %v1891_v7 = vadd.f32 1.0, %v2753_v13 }
 0x7a4   :  { %v1911_v51 = vadd.f32 1.0, %v2755_v17 }
 0x7a5   :  { %2756 = vrcp.f32 %v1891_v7  ;;  %v1903_v36 = vand.u32 2147483648, %v1891_v7  ;;  %v1901_v41 = vand.u32 2147483647, %v1891_v7  ;;  %vm1897_vm1 = vweird.f32 %v1891_v7 }
 0x7a6   :  { %2758 = vrcp.f32 %v1911_v51  ;;  %v1923_v6 = vand.u32 2147483648, %v1911_v51  ;;  %vm1917_vm5 = vweird.f32 %v1911_v51  ;;  %v1921_v13 = vand.u32 2147483647, %v1911_v51 }
 0x7a7   :  { %v1904_v42 = vor.u32 1.1754944e-38, %v1903_v36  ;;  %vm1902_vm3 = vcmp.eq.f32.partialorder %v1901_v41, 8.507059e+37  ;;  %v4538_v41 = vld [vmem:[#allocation14 + $0x128] sm:$0xff] }
 0x7a8   :  { %vm1922_vm7 = vcmp.eq.f32.partialorder %v1921_v13, 8.507059e+37 }
 0x7ab   :  { %v2757_v43 = vpop.eup %2756 }
 0x7ac   :  { %v2759_v21 = vpop.eup %2758  ;;  %v1893_v19 = vmul.f32 %v2757_v43, %v1891_v7  ;;  %vm1898_vm0 = vweird.f32 %v2757_v43  ;;  %v1924_v7 = vor.u32 1.1754944e-38, %v1923_v6 }
 0x7ad   :  { %v1913_v2 = vmul.f32 %v2759_v21, %v1911_v51  ;;  %vm1899_vm2 = vmor %vm1897_vm1, %vm1898_vm0  ;;  %vm1918_vm4 = vweird.f32 %v2759_v21  ;;  %v4523_v51 = vld [vmem:[#allocation14 + $0x170] sm:$0xff] }
 0x7ae   :  { %v1894_v23 = vsub.f32 1.0, %v1893_v19  ;;  %vm1919_vm6 = vmor %vm1917_vm5, %vm1918_vm4 }
 0x7af   :  { %v1914_v57 = vsub.f32 1.0, %v1913_v2 }
 0x7b0   :  { %v1895_v15 = vmul.f32 %v2757_v43, %v1894_v23 }
 0x7b1   :  { %v1915_v18 = vmul.f32 %v2759_v21, %v1914_v57 }
 0x7b2   :  { %v1896_v37 = vadd.f32 %v2757_v43, %v1895_v15 }
 0x7b3   :  { %v1916_v28 = vadd.f32 %v2759_v21, %v1915_v18 }
 0x7b4   :  { %v1900_v35 = vsel %vm1899_vm2, %v2757_v43, %v1896_v37 }
 0x7b5   :  { %v1905_v32 = vsel %vm1902_vm3, %v1904_v42, %v1900_v35  ;;  %v1920_v19 = vsel %vm1919_vm6, %v2759_v21, %v1916_v28  ;;  %v4533_v21 = vld [vmem:[#allocation14 + $0x140] sm:$0xff]  ;;  %v1468_v42 = vadd.f32 %v4397_v33, %v4927_v34 }
 0x7b6   :  { %v1928_v24 = vmul.f32 %v1927_v0, %v1905_v32  ;;  %v1925_v2 = vsel %vm1922_vm7, %v1924_v7, %v1920_v19 }
 0x7b7   :  { %v1931_v23 = vsub.f32 1.0, %v1925_v2  ;;  %v1933_v57 = vmul.f32 %v1925_v2, %v4421_v4  ;;  %v4528_v4 = vld [vmem:[#allocation14 + $0x158] sm:$0xff] }
 0x7b8   :  { %v1929_v17 = vadd.f32 %v1928_v24, %v1506_v14 }
 0x7ba   :  { %2760 = vtanh.f32 %v1929_v17 }
 0x7c0   :  { %v2761_v43 = vpop.eup %2760 }
 0x7c1   :  { %v1932_v36 = vmul.f32 %v2761_v43, %v1931_v23 }
 0x7c3   :  { %v4514_v15 = vadd.f32 %v1933_v57, %v1932_v36 }
 0x7c5   :  { %1956 = vmatmul.f32.vlgmr.msrb.gmra.mxu1 %v4514_v15  ;;  %1976 = vmatmul.f32.vlgmr.msrb.gmra.mxu2 %v4514_v15 }
 0x7c6   :  { %1996 = vmatmul.f32.vlgmr.msra.gmra.mxu3 %v4514_v15  ;;  %2206 = vmatpush.msrb.mxu1 %v4519_v9 }
 0x7c7   :  { %2279 = vmatpush.msrb.mxu2 %v4427_v50  ;;  %2299 = vmatpush.msra.mxu3 %v4523_v51 }
 0x7c8   :  { %2207 = vmatpush.msrb.mxu1 %v4161_v38  ;;  %v4543_v38 = vld [vmem:[#allocation14 + $0x110] sm:$0xff] }
 0x7c9   :  { %2280 = vmatpush.msrb.mxu2 %v4432_v16  ;;  %2300 = vmatpush.msra.mxu3 %v4528_v4 }
 0x7ca   :  { %2208 = vmatpush.msrb.mxu1 %v4163_v26  ;;  %v4548_v26 = vld [vmem:[#allocation14 + $0xf8] sm:$0xff] }
 0x7cb   :  { %2281 = vmatpush.msrb.mxu2 %v4437_v48  ;;  %2301 = vmatpush.msra.mxu3 %v4533_v21 }
 0x7cc   :  { %2209 = vmatpush.msrb.mxu1 %v4173_v53  ;;  %v4553_v53 = vld [vmem:[#allocation14 + $0xe0] sm:$0xff] }
 0x7cd   :  { %2282 = vmatpush.msrb.mxu2 %v4442_v46  ;;  %2302 = vmatpush.msra.mxu3 %v4538_v41 }
 0x7ce   :  { %2210 = vmatpush.msrb.mxu1 %v4175_v56  ;;  %v4558_v56 = vld [vmem:[#allocation14 + $0xc8] sm:$0xff] }
 0x7cf   :  { %2283 = vmatpush.msrb.mxu2 %v4447_v12  ;;  %2303 = vmatpush.msra.mxu3 %v4543_v38 }
 0x7d0   :  { %2211 = vmatpush.msrb.mxu1 %v4179_v60  ;;  %v4563_v60 = vld [vmem:[#allocation14 + $0xb0] sm:$0xff] }
 0x7d1   :  { %2284 = vmatpush.msrb.mxu2 %v4452_v31  ;;  %2304 = vmatpush.msra.mxu3 %v4548_v26 }
 0x7d2   :  { %2212 = vmatpush.msrb.mxu1 %v4184_v63  ;;  %v4568_v63 = vld [vmem:[#allocation14 + $0x98] sm:$0xff] }
 0x7d3   :  { %2285 = vmatpush.msrb.mxu2 %v4457_v27  ;;  %2305 = vmatpush.msra.mxu3 %v4553_v53 }
 0x7d4   :  { %2213 = vmatpush.msrb.mxu1 %v4190_v58  ;;  %v4573_v58 = vld [vmem:[#allocation14 + $0x80] sm:$0xff] }
 0x7d5   :  { %2286 = vmatpush.msrb.mxu2 %v4462_v29  ;;  %2306 = vmatpush.msra.mxu3 %v4558_v56 }
 0x7d6   :  { %2214 = vmatpush.msrb.mxu1 %v4195_v55  ;;  %v4578_v55 = vld [vmem:[#allocation14 + $0x68] sm:$0xff] }
 0x7d7   :  { %2287 = vmatpush.msrb.mxu2 %v4467_v62  ;;  %2307 = vmatpush.msra.mxu3 %v4563_v60 }
 0x7d8   :  { %2215 = vmatpush.msrb.mxu1 %v4207_v30  ;;  %v4583_v30 = vld [vmem:[#allocation14 + $0x50] sm:$0xff] }
 0x7d9   :  { %2288 = vmatpush.msrb.mxu2 %v4472_v20  ;;  %2308 = vmatpush.msra.mxu3 %v4568_v63 }
 0x7da   :  { %2216 = vmatpush.msrb.mxu1 %v4211_v5  ;;  %v4588_v5 = vld [vmem:[#allocation14 + $0x38] sm:$0xff] }
 0x7db   :  { %2289 = vmatpush.msrb.mxu2 %v4477_v54  ;;  %2309 = vmatpush.msra.mxu3 %v4573_v58 }
 0x7dc   :  { %2217 = vmatpush.msrb.mxu1 %v4216_v11  ;;  %v4593_v11 = vld [vmem:[#allocation14 + $0x20] sm:$0xff] }
 0x7dd   :  { %2290 = vmatpush.msrb.mxu2 %v4482_v49  ;;  %2310 = vmatpush.msra.mxu3 %v4578_v55 }
 0x7de   :  { %2218 = vmatpush.msrb.mxu1 %v4913_v40  ;;  %v4598_v40 = vld [vmem:[#allocation14 + $0x8] sm:$0xff] }
 0x7df   :  { %2291 = vmatpush.msrb.mxu2 %v4487_v45  ;;  %2311 = vmatpush.msra.mxu3 %v4583_v30 }
 0x7e0   :  { %2219 = vmatpush.msrb.mxu1 %v4914_v52  ;;  %v4931_v52 = vld [vmem:[#allocation30_spill] sm:$0xff] }
 0x7e1   :  { %2292 = vmatpush.msrb.mxu2 %v4492_v61  ;;  %2312 = vmatpush.msra.mxu3 %v4588_v5  ;;  %v1427_v47 = vadd.f32 %v4931_v52, %v4928_v22 }
 0x7e2   :  { %2220 = vmatpush.msrb.mxu1 %v4915_v10 }
 0x7e3   :  { %2293 = vmatpush.msrb.mxu2 %v4497_v25  ;;  %2313 = vmatpush.msra.mxu3 %v4593_v11 }
 0x7e4   :  { %2221 = vmatpush.msrb.mxu1 %v4917_v39 }
 0x7e5   :  { %2294 = vmatpush.msrb.mxu2 %v4502_v8  ;;  %2314 = vmatpush.msra.mxu3 %v4598_v40 }
 0x842   :  { %v1957_v18 = vpop.f32.mrf.mxu1 }
 0x843   :  { %v2000_v37 = vadd.f32 %v1957_v18, %v1427_v47 }
 0x845   :  { %v2610_v10 = vmul.f32 -1.442695, %v2000_v37  ;;  %v1509_v37 = vadd.f32 %v4395_v1, %v4334_v59 }
 0x847   :  { %2762 = vpow2.f32 %v2610_v10 }
 0x848   :  { %v1977_v0 = vpop.f32.mrf.mxu2 }
 0x849   :  { %v2020_v35 = vadd.f32 %v1977_v0, %v1468_v42  ;;  %v1997_v33 = vpop.f32.mrf.mxu3 }
 0x84a   :  { %v2040_v18 = vadd.f32 %v4332_v44, %v1997_v33 }
 0x84b   :  { %v2611_v32 = vmul.f32 -1.442695, %v2020_v35 }
 0x84d   :  { %v2763_v39 = vpop.eup %2762  ;;  %2764 = vpow2.f32 %v2611_v32 }
 0x84e   :  { %v2004_v28 = vadd.f32 1.0, %v2763_v39 }
 0x850   :  { %2766 = vrcp.f32 %v2004_v28  ;;  %v2016_v19 = vand.u32 2147483648, %v2004_v28  ;;  %v2014_v2 = vand.u32 2147483647, %v2004_v28  ;;  %vm2010_vm9 = vweird.f32 %v2004_v28 }
 0x852   :  { %v2017_v57 = vor.u32 1.1754944e-38, %v2016_v19  ;;  %vm2015_vm11 = vcmp.eq.f32.partialorder %v2014_v2, 8.507059e+37 }
 0x853   :  { %v2765_v14 = vpop.eup %2764 }
 0x854   :  { %v2024_v6 = vadd.f32 1.0, %v2765_v14 }
 0x856   :  { %v2767_v24 = vpop.eup %2766  ;;  %2768 = vrcp.f32 %v2024_v6  ;;  %v2036_v35 = vand.u32 2147483648, %v2024_v6  ;;  %v2034_v32 = vand.u32 2147483647, %v2024_v6  ;;  %vm2030_vm13 = vweird.f32 %v2024_v6 }
 0x857   :  { %v2006_v13 = vmul.f32 %v2767_v24, %v2004_v28  ;;  %vm2011_vm8 = vweird.f32 %v2767_v24 }
 0x858   :  { %vm2012_vm10 = vmor %vm2010_vm9, %vm2011_vm8  ;;  %vm2035_vm15 = vcmp.eq.f32.partialorder %v2034_v32, 8.507059e+37 }
 0x859   :  { %v2007_v17 = vsub.f32 1.0, %v2006_v13  ;;  %v2037_v13 = vor.u32 1.1754944e-38, %v2036_v35 }
 0x85b   :  { %v2008_v7 = vmul.f32 %v2767_v24, %v2007_v17 }
 0x85c   :  { %v2769_v23 = vpop.eup %2768 }
 0x85d   :  { %v2026_v43 = vmul.f32 %v2769_v23, %v2024_v6  ;;  %v2009_v36 = vadd.f32 %v2767_v24, %v2008_v7  ;;  %vm2031_vm12 = vweird.f32 %v2769_v23  ;;  %v4617_v6 = vld [vmem:[#allocation14 + $0x160] sm:$0xff] }
 0x85e   :  { %vm2032_vm14 = vmor %vm2030_vm13, %vm2031_vm12 }
 0x85f   :  { %v2027_v52 = vsub.f32 1.0, %v2026_v43  ;;  %v2013_v47 = vsel %vm2012_vm10, %v2767_v24, %v2009_v36 }
 0x860   :  { %v2018_v10 = vsel %vm2015_vm11, %v2017_v57, %v2013_v47 }
 0x861   :  { %v2028_v42 = vmul.f32 %v2769_v23, %v2027_v52  ;;  %v2041_v0 = vmul.f32 %v2040_v18, %v2018_v10 }
 0x863   :  { %v2042_v39 = vadd.f32 %v2041_v0, %v1509_v37  ;;  %v2029_v14 = vadd.f32 %v2769_v23, %v2028_v42  ;;  %v4933_v42 = vld [vmem:[#allocation47_spill] sm:$0xff] }
 0x864   :  { %v1512_v0 = vadd.f32 %v4933_v42, %v4334_v59 }
 0x865   :  { %2770 = vtanh.f32 %v2042_v39  ;;  %v2033_v28 = vsel %vm2032_vm14, %v2769_v23, %v2029_v14  ;;  %v4627_v23 = vld [vmem:[#allocation14 + $0x130] sm:$0xff] }
 0x866   :  { %v2038_v24 = vsel %vm2035_vm15, %v2037_v13, %v2033_v28 }
 0x867   :  { %v2044_v17 = vsub.f32 1.0, %v2038_v24  ;;  %v2046_v1 = vmul.f32 %v2038_v24, %v4514_v15  ;;  %v4622_v15 = vld [vmem:[#allocation14 + $0x148] sm:$0xff] }
 0x86b   :  { %v2771_v19 = vpop.eup %2770 }
 0x86c   :  { %v2045_v7 = vmul.f32 %v2771_v19, %v2044_v17 }
 0x86e   :  { %v4609_v2 = vadd.f32 %v2046_v1, %v2045_v7 }
 0x870   :  { %2069 = vmatmul.f32.vlgmr.msra.gmra.mxu0 %v4609_v2  ;;  %2089 = vmatmul.f32.vlgmr.msra.gmra.mxu1 %v4609_v2 }
 0x871   :  { %2109 = vmatmul.f32.vlgmr.msra.gmra.mxu2 %v4609_v2  ;;  %2319 = vmatpush.msra.mxu0 %v4519_v9 }
 0x872   :  { %2392 = vmatpush.msra.mxu1 %v4427_v50  ;;  %2412 = vmatpush.msra.mxu2 %v4523_v51  ;;  %v4632_v50 = vld [vmem:[#allocation14 + $0x118] sm:$0xff]  ;;  %v1471_v51 = vadd.f32 %v4401_v3, %v4927_v34 }
 0x873   :  { %2320 = vmatpush.msra.mxu0 %v4617_v6 }
 0x874   :  { %2393 = vmatpush.msra.mxu1 %v4432_v16  ;;  %2413 = vmatpush.msra.mxu2 %v4528_v4  ;;  %v4637_v16 = vld [vmem:[#allocation14 + $0x100] sm:$0xff] }
 0x875   :  { %2321 = vmatpush.msra.mxu0 %v4622_v15 }
 0x876   :  { %2394 = vmatpush.msra.mxu1 %v4437_v48  ;;  %2414 = vmatpush.msra.mxu2 %v4533_v21  ;;  %v4642_v48 = vld [vmem:[#allocation14 + $0xe8] sm:$0xff] }
 0x877   :  { %2322 = vmatpush.msra.mxu0 %v4627_v23 }
 0x878   :  { %2395 = vmatpush.msra.mxu1 %v4442_v46  ;;  %2415 = vmatpush.msra.mxu2 %v4538_v41  ;;  %v4647_v46 = vld [vmem:[#allocation14 + $0xd0] sm:$0xff] }
 0x879   :  { %2323 = vmatpush.msra.mxu0 %v4632_v50 }
 0x87a   :  { %2396 = vmatpush.msra.mxu1 %v4447_v12  ;;  %2416 = vmatpush.msra.mxu2 %v4543_v38  ;;  %v4652_v12 = vld [vmem:[#allocation14 + $0xb8] sm:$0xff] }
 0x87b   :  { %2324 = vmatpush.msra.mxu0 %v4637_v16 }
 0x87c   :  { %2397 = vmatpush.msra.mxu1 %v4452_v31  ;;  %2417 = vmatpush.msra.mxu2 %v4548_v26  ;;  %v4657_v31 = vld [vmem:[#allocation14 + $0xa0] sm:$0xff] }
 0x87d   :  { %2325 = vmatpush.msra.mxu0 %v4642_v48 }
 0x87e   :  { %2398 = vmatpush.msra.mxu1 %v4457_v27  ;;  %2418 = vmatpush.msra.mxu2 %v4553_v53  ;;  %v4662_v27 = vld [vmem:[#allocation14 + $0x88] sm:$0xff] }
 0x87f   :  { %2326 = vmatpush.msra.mxu0 %v4647_v46 }
 0x880   :  { %2399 = vmatpush.msra.mxu1 %v4462_v29  ;;  %2419 = vmatpush.msra.mxu2 %v4558_v56  ;;  %v4667_v29 = vld [vmem:[#allocation14 + $0x70] sm:$0xff] }
 0x881   :  { %2327 = vmatpush.msra.mxu0 %v4652_v12 }
 0x882   :  { %2400 = vmatpush.msra.mxu1 %v4467_v62  ;;  %2420 = vmatpush.msra.mxu2 %v4563_v60  ;;  %v4672_v62 = vld [vmem:[#allocation14 + $0x58] sm:$0xff] }
 0x883   :  { %2328 = vmatpush.msra.mxu0 %v4657_v31 }
 0x884   :  { %2401 = vmatpush.msra.mxu1 %v4472_v20  ;;  %2421 = vmatpush.msra.mxu2 %v4568_v63  ;;  %v4677_v20 = vld [vmem:[#allocation14 + $0x40] sm:$0xff] }
 0x885   :  { %2329 = vmatpush.msra.mxu0 %v4662_v27 }
 0x886   :  { %2402 = vmatpush.msra.mxu1 %v4477_v54  ;;  %2422 = vmatpush.msra.mxu2 %v4573_v58  ;;  %v4682_v54 = vld [vmem:[#allocation14 + $0x28] sm:$0xff] }
 0x887   :  { %2330 = vmatpush.msra.mxu0 %v4667_v29 }
 0x888   :  { %2403 = vmatpush.msra.mxu1 %v4482_v49  ;;  %2423 = vmatpush.msra.mxu2 %v4578_v55  ;;  %v4687_v49 = vld [vmem:[#allocation14 + $0x10] sm:$0xff] }
 0x889   :  { %2331 = vmatpush.msra.mxu0 %v4672_v62 }
 0x88a   :  { %2404 = vmatpush.msra.mxu1 %v4487_v45  ;;  %2424 = vmatpush.msra.mxu2 %v4583_v30  ;;  %v4932_v45 = vld [vmem:[#allocation29_spill] sm:$0xff] }
 0x88b   :  { %2332 = vmatpush.msra.mxu0 %v4677_v20 }
 0x88c   :  { %2405 = vmatpush.msra.mxu1 %v4492_v61  ;;  %2425 = vmatpush.msra.mxu2 %v4588_v5  ;;  %v1430_v61 = vadd.f32 %v4932_v45, %v4928_v22 }
 0x88d   :  { %2333 = vmatpush.msra.mxu0 %v4682_v54 }
 0x88e   :  { %2406 = vmatpush.msra.mxu1 %v4497_v25  ;;  %2426 = vmatpush.msra.mxu2 %v4593_v11 }
 0x88f   :  { %2334 = vmatpush.msra.mxu0 %v4687_v49 }
 0x890   :  { %2407 = vmatpush.msra.mxu1 %v4502_v8  ;;  %2427 = vmatpush.msra.mxu2 %v4598_v40 }
 0x8ed   :  { %v2070_v4 = vpop.f32.mrf.mxu0  ;;  %v2090_v21 = vpop.f32.mrf.mxu1 }
 0x8ee   :  { %v2113_v41 = vadd.f32 %v2070_v4, %v1430_v61  ;;  %v2133_v25 = vadd.f32 %v2090_v21, %v1471_v51  ;;  %v2514_v61 = vld [vmem:[#allocation16 + $0x40] sm:$0xff]  ;;  %v2513_v4 = vld [vmem:[#allocation16 + $0x38] sm:$0xff]  ;;  %v2512_v21 = vld [vmem:[#allocation16 + $0x30] sm:$0xff] }
 0x8f0   :  { %v2612_v38 = vmul.f32 -1.442695, %v2113_v41  ;;  %v2613_v26 = vmul.f32 -1.442695, %v2133_v25  ;;  %v2511_v25 = vld [vmem:[#allocation16 + $0x28] sm:$0xff] }
 0x8f2   :  { %2772 = vpow2.f32 %v2612_v38 }
 0x8f3   :  { %2774 = vpow2.f32 %v2613_v26  ;;  %v2510_v26 = vld [vmem:[#allocation16 + $0x20] sm:$0xff] }
 0x8f4   :  { %v2110_v36 = vpop.f32.mrf.mxu2 }
 0x8f5   :  { %v2153_v18 = vadd.f32 %v4332_v44, %v2110_v36 }
 0x8f8   :  { %v2773_v53 = vpop.eup %2772 }
 0x8f9   :  { %v2775_v56 = vpop.eup %2774  ;;  %v2117_v60 = vadd.f32 1.0, %v2773_v53 }
 0x8fa   :  { %v2137_v8 = vadd.f32 1.0, %v2775_v56  ;;  %v2509_v56 = vld [vmem:[#allocation16 + $0x18] sm:$0xff] }
 0x8fb   :  { %2776 = vrcp.f32 %v2117_v60  ;;  %v2129_v11 = vand.u32 2147483648, %v2117_v60  ;;  %v2127_v33 = vand.u32 2147483647, %v2117_v60  ;;  %vm2123_vm1 = vweird.f32 %v2117_v60 }
 0x8fc   :  { %2778 = vrcp.f32 %v2137_v8  ;;  %v2149_v35 = vand.u32 2147483648, %v2137_v8  ;;  %vm2143_vm5 = vweird.f32 %v2137_v8  ;;  %v2147_v39 = vand.u32 2147483647, %v2137_v8 }
 0x8fd   :  { %v2130_v52 = vor.u32 1.1754944e-38, %v2129_v11  ;;  %vm2128_vm3 = vcmp.eq.f32.partialorder %v2127_v33, 8.507059e+37 }
 0x8fe   :  { %v2150_v13 = vor.u32 1.1754944e-38, %v2149_v35  ;;  %vm2148_vm7 = vcmp.eq.f32.partialorder %v2147_v39, 8.507059e+37 }
 0x901   :  { %v2777_v63 = vpop.eup %2776 }
 0x902   :  { %v2779_v58 = vpop.eup %2778  ;;  %v2119_v55 = vmul.f32 %v2777_v63, %v2117_v60  ;;  %vm2124_vm0 = vweird.f32 %v2777_v63  ;;  %v2508_v60 = vld [vmem:[#allocation16 + $0x10] sm:$0xff] }
 0x903   :  { %v2139_v30 = vmul.f32 %v2779_v58, %v2137_v8  ;;  %vm2125_vm2 = vmor %vm2123_vm1, %vm2124_vm0  ;;  %vm2144_vm4 = vweird.f32 %v2779_v58 }
 0x904   :  { %v2120_v5 = vsub.f32 1.0, %v2119_v55  ;;  %vm2145_vm6 = vmor %vm2143_vm5, %vm2144_vm4 }
 0x905   :  { %v2140_v3 = vsub.f32 1.0, %v2139_v30  ;;  %v2506_v30 = vld [vmem:[#allocation16] sm:$0xff] }
 0x906   :  { %v2121_v40 = vmul.f32 %v2777_v63, %v2120_v5 }
 0x907   :  { %v2141_v43 = vmul.f32 %v2779_v58, %v2140_v3 }
 0x908   :  { %v2122_v57 = vadd.f32 %v2777_v63, %v2121_v40 }
 0x909   :  { %v2142_v37 = vadd.f32 %v2779_v58, %v2141_v43 }
 0x90a   :  { %v2126_v47 = vsel %vm2125_vm2, %v2777_v63, %v2122_v57  ;;  %v2507_v63 = vld [vmem:[#allocation16 + $0x8] sm:$0xff] }
 0x90b   :  { %v2131_v10 = vsel %vm2128_vm3, %v2130_v52, %v2126_v47  ;;  %v2146_v28 = vsel %vm2145_vm6, %v2779_v58, %v2142_v37  ;;  %v4728_v47 = vld [vmem:[%s4779_s8] ss:$0 sm:$0xff] }
 0x90c   :  { %v2154_v32 = vmul.f32 %v2153_v18, %v2131_v10  ;;  %v2151_v24 = vsel %vm2148_vm7, %v2150_v13, %v2146_v28 }
 0x90d   :  { %v2157_v17 = vsub.f32 1.0, %v2151_v24  ;;  %v2159_v7 = vmul.f32 %v2151_v24, %v4609_v2 }
 0x90e   :  { %v2155_v14 = vadd.f32 %v2154_v32, %v1512_v0  ;;  %v4936_v0 = vld [vmem:[#allocation48_spill] sm:$0xff] }
 0x90f   :  { %v1515_v35 = vadd.f32 %v4936_v0, %v4334_v59 }
 0x910   :  { %2780 = vtanh.f32 %v2155_v14 }
 0x916   :  { %v2781_v19 = vpop.eup %2780 }
 0x917   :  { %v2158_v44 = vmul.f32 %v2781_v19, %v2157_v17 }
 0x919   :  { %v4700_v1 = vadd.f32 %v2159_v7, %v2158_v44 }
 0x91b   :  { %2182 = vmatmul.f32.vlgmr.msrb.gmra.mxu3 %v4700_v1  ;;  %2202 = vmatmul.f32.vlgmr.msrb.gmra.mxu0 %v4700_v1 }
 0x91c   :  { %2222 = vmatmul.f32.vlgmr.msrb.gmra.mxu1 %v4700_v1  ;;  %2432 = vmatpush.msrb.mxu3 %v4519_v9  ;;  %v4934_v9 = vld [vmem:[#allocation46_spill] sm:$0xff] }
 0x91d   :  { %v1474_v2 = vadd.f32 %v4934_v9, %v4927_v34 }
 0x91e   :  { %2433 = vmatpush.msrb.mxu3 %v4617_v6  ;;  %v2521_v6 = vld [vmem:[#allocation16 + $0x78] sm:$0xff] }
 0x91f   :  { %2526 = vmatpush.msrb.mxu0 %v2521_v6 }
 0x920   :  { %2434 = vmatpush.msrb.mxu3 %v4622_v15 }
 0x922   :  { %2435 = vmatpush.msrb.mxu3 %v4627_v23 }
 0x924   :  { %2436 = vmatpush.msrb.mxu3 %v4632_v50  ;;  %v2520_v50 = vld [vmem:[#allocation16 + $0x70] sm:$0xff] }
 0x925   :  { %2527 = vmatpush.msrb.mxu0 %v2520_v50  ;;  %v4938_v50 = vld [vmem:[#allocation33_spill] sm:$0xff] }
 0x926   :  { %2437 = vmatpush.msrb.mxu3 %v4637_v16 }
 0x928   :  { %2438 = vmatpush.msrb.mxu3 %v4642_v48  ;;  %v2519_v48 = vld [vmem:[#allocation16 + $0x68] sm:$0xff] }
 0x929   :  { %2528 = vmatpush.msrb.mxu0 %v2519_v48 }
 0x92a   :  { %2439 = vmatpush.msrb.mxu3 %v4647_v46  ;;  %v4935_v46 = vld [vmem:[#allocation44_spill] sm:$0xff] }
 0x92c   :  { %2440 = vmatpush.msrb.mxu3 %v4652_v12  ;;  %v1433_v12 = vadd.f32 %v4935_v46, %v4928_v22 }
 0x92e   :  { %2441 = vmatpush.msrb.mxu3 %v4657_v31  ;;  %v2518_v31 = vld [vmem:[#allocation16 + $0x60] sm:$0xff] }
 0x92f   :  { %2529 = vmatpush.msrb.mxu0 %v2518_v31 }
 0x930   :  { %2442 = vmatpush.msrb.mxu3 %v4662_v27  ;;  %v2517_v27 = vld [vmem:[#allocation16 + $0x58] sm:$0xff] }
 0x931   :  { %2530 = vmatpush.msrb.mxu0 %v2517_v27 }
 0x932   :  { %2443 = vmatpush.msrb.mxu3 %v4667_v29 }
 0x934   :  { %2444 = vmatpush.msrb.mxu3 %v4672_v62 }
 0x936   :  { %2445 = vmatpush.msrb.mxu3 %v4677_v20  ;;  %v2516_v20 = vld [vmem:[#allocation16 + $0x50] sm:$0xff] }
 0x937   :  { %2531 = vmatpush.msrb.mxu0 %v2516_v20 }
 0x938   :  { %2446 = vmatpush.msrb.mxu3 %v4682_v54 }
 0x93a   :  { %2447 = vmatpush.msrb.mxu3 %v4687_v49  ;;  %v2515_v49 = vld [vmem:[#allocation16 + $0x48] sm:$0xff] }
 0x93b   :  { %2532 = vmatpush.msrb.mxu0 %v2515_v49 }
 0x93d   :  { %2533 = vmatpush.msrb.mxu0 %v2514_v61 }
 0x93f   :  { %2534 = vmatpush.msrb.mxu0 %v2513_v4 }
 0x941   :  { %2535 = vmatpush.msrb.mxu0 %v2512_v21 }
 0x943   :  { %2536 = vmatpush.msrb.mxu0 %v2511_v25 }
 0x945   :  { %2537 = vmatpush.msrb.mxu0 %v2510_v26 }
 0x947   :  { %2538 = vmatpush.msrb.mxu0 %v2509_v56 }
 0x949   :  { %2539 = vmatpush.msrb.mxu0 %v2508_v60 }
 0x94b   :  { %2540 = vmatpush.msrb.mxu0 %v2507_v63 }
 0x94d   :  { %2541 = vmatpush.msrb.mxu0 %v2506_v30 }
 0x998   :  { %v2203_v15 = vpop.f32.mrf.mxu0 }
 0x999   :  { %v2246_v23 = vadd.f32 %v2203_v15, %v1474_v2  ;;  %v2223_v36 = vpop.f32.mrf.mxu1  ;;  %v4937_v15 = vld [vmem:[#allocation45_spill] sm:$0xff] }
 0x99a   :  { %v2266_v18 = vadd.f32 %v4728_v47, %v2223_v36 }
 0x99b   :  { %v2615_v16 = vmul.f32 -1.442695, %v2246_v23  ;;  %v1436_v23 = vadd.f32 %v4937_v15, %v4928_v22 }
 0x99d   :  { %2782 = vpow2.f32 %v2615_v16  ;;  %v1477_v16 = vadd.f32 %v4938_v50, %v4927_v34 }
 0x99e   :  { %v2183_v29 = vpop.f32.mrf.mxu3 }
 0x99f   :  { %v2226_v62 = vadd.f32 %v2183_v29, %v1433_v12  ;;  %v4748_v12 = vld [vmem:[%s4781_s10] ss:$0 sm:$0xff]  ;;  %s3124_s10 = smov [#allocation17]  }
 0x9a0   :  { %s2563_s19 = sshll.u32 %s3124_s10, 4  ;;  %s2564_s19 = int_to_ptr.vmem [resolvable:$true] %s2563_s19 }
 0x9a1   :  { %v2614_v54 = vmul.f32 -1.442695, %v2226_v62 }
 0x9a3   :  { %v2783_v45 = vpop.eup %2782  ;;  %2784 = vpow2.f32 %v2614_v54 }
 0x9a4   :  { %v2250_v51 = vadd.f32 1.0, %v2783_v45 }
 0x9a6   :  { %2786 = vrcp.f32 %v2250_v51  ;;  %v2262_v32 = vand.u32 2147483648, %v2250_v51  ;;  %vm2256_vm13 = vweird.f32 %v2250_v51  ;;  %v2260_v14 = vand.u32 2147483647, %v2250_v51 }
 0x9a8   :  { %v2263_v24 = vor.u32 1.1754944e-38, %v2262_v32  ;;  %vm2261_vm15 = vcmp.eq.f32.partialorder %v2260_v14, 8.507059e+37  ;;  %v4940_v14 = vld [vmem:[#allocation31_spill] sm:$0xff] }
 0x9a9   :  { %v2785_v41 = vpop.eup %2784 }
 0x9aa   :  { %v2230_v38 = vadd.f32 1.0, %v2785_v41 }
 0x9ac   :  { %2788 = vrcp.f32 %v2230_v38  ;;  %v2787_v53 = vpop.eup %2786  ;;  %v2242_v11 = vand.u32 2147483648, %v2230_v38  ;;  %v2240_v33 = vand.u32 2147483647, %v2230_v38  ;;  %vm2236_vm9 = vweird.f32 %v2230_v38 }
 0x9ad   :  { %v2252_v8 = vmul.f32 %v2787_v53, %v2250_v51  ;;  %vm2257_vm12 = vweird.f32 %v2787_v53 }
 0x9ae   :  { %v2243_v52 = vor.u32 1.1754944e-38, %v2242_v11  ;;  %vm2241_vm11 = vcmp.eq.f32.partialorder %v2240_v33, 8.507059e+37  ;;  %vm2258_vm14 = vmor %vm2256_vm13, %vm2257_vm12 }
 0x9af   :  { %v2253_v5 = vsub.f32 1.0, %v2252_v8 }
 0x9b1   :  { %v2254_v43 = vmul.f32 %v2787_v53, %v2253_v5 }
 0x9b2   :  { %v2789_v58 = vpop.eup %2788 }
 0x9b3   :  { %v2232_v55 = vmul.f32 %v2789_v58, %v2230_v38  ;;  %vm2237_vm8 = vweird.f32 %v2789_v58  ;;  %v2255_v10 = vadd.f32 %v2787_v53, %v2254_v43 }
 0x9b4   :  { %vm2238_vm10 = vmor %vm2236_vm9, %vm2237_vm8 }
 0x9b5   :  { %v2233_v3 = vsub.f32 1.0, %v2232_v55  ;;  %v2259_v13 = vsel %vm2258_vm14, %v2787_v53, %v2255_v10 }
 0x9b6   :  { %v2264_v17 = vsel %vm2261_vm15, %v2263_v24, %v2259_v13 }
 0x9b7   :  { %v2234_v40 = vmul.f32 %v2789_v58, %v2233_v3  ;;  %v2270_v19 = vsub.f32 1.0, %v2264_v17  ;;  %v2272_v9 = vmul.f32 %v2264_v17, %v4700_v1 }
 0x9b9   :  { %v2235_v57 = vadd.f32 %v2789_v58, %v2234_v40  ;;  %v4939_v40 = vld [vmem:[#allocation25_spill] sm:$0xff] }
 0x9ba   :  { %v1518_v33 = vadd.f32 %v4939_v40, %v4334_v59 }
 0x9bb   :  { %v2239_v37 = vsel %vm2238_vm10, %v2789_v58, %v2235_v57 }
 0x9bc   :  { %v2244_v42 = vsel %vm2241_vm11, %v2243_v52, %v2239_v37 }
 0x9bd   :  { %v2267_v39 = vmul.f32 %v2266_v18, %v2244_v42 }
 0x9bf   :  { %v2268_v28 = vadd.f32 %v2267_v39, %v1515_v35 }
 0x9c1   :  { %2790 = vtanh.f32 %v2268_v28  ;;  %v1439_v28 = vadd.f32 %v4940_v14, %v4928_v22 }
 0x9c7   :  { %v2791_v44 = vpop.eup %2790 }
 0x9c8   :  { %v2271_v7 = vmul.f32 %v2791_v44, %v2270_v19 }
 0x9ca   :  { %v4734_v2 = vadd.f32 %v2272_v9, %v2271_v7  ;;  %v4941_v7 = vld [vmem:[#allocation50_spill] sm:$0xff] }
 0x9cb   :  { %v1480_v9 = vadd.f32 %v4941_v7, %v4927_v34 }
 0x9cc   :  { %2295 = vmatmul.f32.vlgmr.msrb.gmra.mxu2 %v4734_v2  ;;  %2315 = vmatmul.f32.vlgmr.msra.gmra.mxu3 %v4734_v2 }
 0x9cd   :  { %2335 = vmatmul.f32.vlgmr.msra.gmra.mxu0 %v4734_v2 }
 0x9d5   :  { %2542 = vmatmul.f32.vlgmr.msrb.gmra.mxu0 %v4700_v1 }
 0x9dd   :  { %2545 = vmatmul.f32.gmra.mxu0 %v4734_v2 }
 0xa4a   :  { %v2336_v6 = vpop.f32.mrf.mxu0 }
 0xa4b   :  { %v2379_v30 = vadd.f32 %v4728_v47, %v2336_v6 }
 0xa4f   :  { %v2296_v48 = vpop.f32.mrf.mxu2  ;;  %v2316_v46 = vpop.f32.mrf.mxu3 }
 0xa50   :  { %v2339_v31 = vadd.f32 %v2296_v48, %v1436_v23  ;;  %v2359_v27 = vadd.f32 %v2316_v46, %v1477_v16 }
 0xa52   :  { %v2616_v29 = vmul.f32 -1.442695, %v2339_v31  ;;  %v2617_v1 = vmul.f32 -1.442695, %v2359_v27  ;;  %v2543_v62 = vpop.f32.mrf.mxu0 }
 0xa53   :  { %v2544_v20 = vadd.f32 %v4748_v12, %v2543_v62 }
 0xa54   :  { %2792 = vpow2.f32 %v2616_v29 }
 0xa55   :  { %2794 = vpow2.f32 %v2617_v1  ;;  %2555 = vst [vmem:[#allocation17] sm:$0xff] %v2544_v20 }
 0xa5a   :  { %v2793_v54 = vpop.eup %2792  ;;  %v2546_v49 = vpop.f32.mrf.mxu0 }
 0xa5b   :  { %v2795_v45 = vpop.eup %2794  ;;  %v2343_v61 = vadd.f32 1.0, %v2793_v54  ;;  %v2547_v51 = vadd.f32 %v4748_v12, %v2546_v49 }
 0xa5c   :  { %v2363_v4 = vadd.f32 1.0, %v2795_v45 }
 0xa5d   :  { %2796 = vrcp.f32 %v2343_v61  ;;  %2556 = vst [vmem:[#allocation17 + $0x8] sm:$0xff] %v2547_v51  ;;  %v2355_v53 = vand.u32 2147483648, %v2343_v61  ;;  %v2353_v8 = vand.u32 2147483647, %v2343_v61  ;;  %vm2349_vm1 = vweird.f32 %v2343_v61 }
 0xa5e   :  { %2798 = vrcp.f32 %v2363_v4  ;;  %v2375_v36 = vand.u32 2147483648, %v2363_v4  ;;  %vm2369_vm5 = vweird.f32 %v2363_v4  ;;  %v2373_v57 = vand.u32 2147483647, %v2363_v4 }
 0xa5f   :  { %v2356_v55 = vor.u32 1.1754944e-38, %v2355_v53  ;;  %vm2354_vm3 = vcmp.eq.f32.partialorder %v2353_v8, 8.507059e+37 }
 0xa60   :  { %v2376_v37 = vor.u32 1.1754944e-38, %v2375_v36  ;;  %vm2374_vm7 = vcmp.eq.f32.partialorder %v2373_v57, 8.507059e+37 }
 0xa63   :  { %v2797_v21 = vpop.eup %2796 }
 0xa64   :  { %v2799_v41 = vpop.eup %2798  ;;  %v2345_v25 = vmul.f32 %v2797_v21, %v2343_v61  ;;  %vm2350_vm0 = vweird.f32 %v2797_v21 }
 0xa65   :  { %v2365_v38 = vmul.f32 %v2799_v41, %v2363_v4  ;;  %vm2351_vm2 = vmor %vm2349_vm1, %vm2350_vm0  ;;  %vm2370_vm4 = vweird.f32 %v2799_v41  ;;  %v4942_v4 = vld [vmem:[#allocation49_spill] sm:$0xff] }
 0xa66   :  { %v2346_v26 = vsub.f32 1.0, %v2345_v25  ;;  %vm2371_vm6 = vmor %vm2369_vm5, %vm2370_vm4 }
 0xa67   :  { %v2366_v56 = vsub.f32 1.0, %v2365_v38 }
 0xa68   :  { %v2347_v60 = vmul.f32 %v2797_v21, %v2346_v26 }
 0xa69   :  { %v2367_v63 = vmul.f32 %v2799_v41, %v2366_v56 }
 0xa6a   :  { %v2348_v58 = vadd.f32 %v2797_v21, %v2347_v60 }
 0xa6b   :  { %v2368_v11 = vadd.f32 %v2799_v41, %v2367_v63 }
 0xa6c   :  { %v2352_v5 = vsel %vm2351_vm2, %v2797_v21, %v2348_v58  ;;  %v1521_v21 = vadd.f32 %v4942_v4, %v4334_v59 }
 0xa6d   :  { %v2357_v3 = vsel %vm2354_vm3, %v2356_v55, %v2352_v5  ;;  %v2372_v18 = vsel %vm2371_vm6, %v2799_v41, %v2368_v11 }
 0xa6e   :  { %v2380_v43 = vmul.f32 %v2379_v30, %v2357_v3  ;;  %v2377_v10 = vsel %vm2374_vm7, %v2376_v37, %v2372_v18 }
 0xa6f   :  { %v2383_v42 = vsub.f32 1.0, %v2377_v10  ;;  %v2385_v32 = vmul.f32 %v2377_v10, %v4734_v2 }
 0xa70   :  { %v2381_v52 = vadd.f32 %v2380_v43, %v1518_v33 }
 0xa72   :  { %2800 = vtanh.f32 %v2381_v52 }
 0xa78   :  { %v2801_v0 = vpop.eup %2800 }
 0xa79   :  { %v2384_v35 = vmul.f32 %v2801_v0, %v2383_v42 }
 0xa7b   :  { %v2386_v39 = vadd.f32 %v2385_v32, %v2384_v35 }
 0xa7d   :  { %2408 = vmatmul.f32.vlgmr.msra.gmra.mxu1 %v2386_v39  ;;  %2428 = vmatmul.f32.vlgmr.msra.gmra.mxu2 %v2386_v39 }
 0xa7e   :  { %2448 = vmatmul.f32.vlgmr.msrb.gmra.mxu3 %v2386_v39  ;;  %2548 = vmatmul.f32.gmra.mxu0 %v2386_v39 }
 0xafa   :  { %v2409_v13 = vpop.f32.mrf.mxu1 }
 0xafb   :  { %v2452_v24 = vadd.f32 %v2409_v13, %v1439_v28  ;;  %v2549_v17 = vpop.f32.mrf.mxu0 }
 0xafc   :  { %v2550_v19 = vadd.f32 %v4748_v12, %v2549_v17 }
 0xafd   :  { %v2618_v44 = vmul.f32 -1.442695, %v2452_v24 }
 0xafe   :  { %2557 = vst [vmem:[#allocation17 + $0x10] sm:$0xff] %v2550_v19 }
 0xaff   :  { %2802 = vpow2.f32 %v2618_v44 }
 0xb00   :  { %v2429_v2 = vpop.f32.mrf.mxu2 }
 0xb01   :  { %v2472_v6 = vadd.f32 %v2429_v2, %v1480_v9  ;;  %v2449_v34 = vpop.f32.mrf.mxu3 }
 0xb02   :  { %v2492_v51 = vadd.f32 %v4728_v47, %v2449_v34 }
 0xb03   :  { %v2619_v15 = vmul.f32 -1.442695, %v2472_v6 }
 0xb05   :  { %v2803_v23 = vpop.eup %2802  ;;  %2804 = vpow2.f32 %v2619_v15 }
 0xb06   :  { %v2456_v50 = vadd.f32 1.0, %v2803_v23 }
 0xb08   :  { %2806 = vrcp.f32 %v2456_v50  ;;  %v2468_v27 = vand.u32 2147483648, %v2456_v50  ;;  %v2466_v1 = vand.u32 2147483647, %v2456_v50  ;;  %vm2462_vm9 = vweird.f32 %v2456_v50 }
 0xb0a   :  { %v2469_v49 = vor.u32 1.1754944e-38, %v2468_v27  ;;  %vm2467_vm11 = vcmp.eq.f32.partialorder %v2466_v1, 8.507059e+37 }
 0xb0b   :  { %v2805_v16 = vpop.eup %2804 }
 0xb0c   :  { %v2476_v22 = vadd.f32 1.0, %v2805_v16 }
 0xb0e   :  { %v2807_v48 = vpop.eup %2806  ;;  %2808 = vrcp.f32 %v2476_v22  ;;  %v2488_v26 = vand.u32 2147483648, %v2476_v22  ;;  %v2486_v53 = vand.u32 2147483647, %v2476_v22  ;;  %vm2482_vm13 = vweird.f32 %v2476_v22 }
 0xb0f   :  { %v2458_v46 = vmul.f32 %v2807_v48, %v2456_v50  ;;  %vm2463_vm8 = vweird.f32 %v2807_v48 }
 0xb10   :  { %vm2464_vm10 = vmor %vm2462_vm9, %vm2463_vm8  ;;  %v2489_v63 = vor.u32 1.1754944e-38, %v2488_v26  ;;  %vm2487_vm15 = vcmp.eq.f32.partialorder %v2486_v53, 8.507059e+37 }
 0xb11   :  { %v2459_v31 = vsub.f32 1.0, %v2458_v46 }
 0xb13   :  { %v2460_v29 = vmul.f32 %v2807_v48, %v2459_v31 }
 0xb14   :  { %v2809_v62 = vpop.eup %2808 }
 0xb15   :  { %v2478_v20 = vmul.f32 %v2809_v62, %v2476_v22  ;;  %v2461_v54 = vadd.f32 %v2807_v48, %v2460_v29  ;;  %vm2483_vm12 = vweird.f32 %v2809_v62 }
 0xb16   :  { %vm2484_vm14 = vmor %vm2482_vm13, %vm2483_vm12 }
 0xb17   :  { %v2479_v45 = vsub.f32 1.0, %v2478_v20  ;;  %v2465_v61 = vsel %vm2464_vm10, %v2807_v48, %v2461_v54 }
 0xb18   :  { %v2470_v41 = vsel %vm2467_vm11, %v2469_v49, %v2465_v61 }
 0xb19   :  { %v2493_v25 = vmul.f32 %v2492_v51, %v2470_v41  ;;  %v2480_v38 = vmul.f32 %v2809_v62, %v2479_v45 }
 0xb1b   :  { %v2494_v56 = vadd.f32 %v2493_v25, %v1521_v21  ;;  %v2481_v60 = vadd.f32 %v2809_v62, %v2480_v38 }
 0xb1d   :  { %2810 = vtanh.f32 %v2494_v56  ;;  %v2485_v8 = vsel %vm2484_vm14, %v2809_v62, %v2481_v60 }
 0xb1e   :  { %v2490_v58 = vsel %vm2487_vm15, %v2489_v63, %v2485_v8 }
 0xb1f   :  { %v2496_v55 = vsub.f32 1.0, %v2490_v58  ;;  %v2498_v5 = vmul.f32 %v2490_v58, %v2386_v39 }
 0xb23   :  { %v2811_v47 = vpop.eup %2810 }
 0xb24   :  { %v2497_v30 = vmul.f32 %v2811_v47, %v2496_v55 }
 0xb26   :  { %v2499_v59 = vadd.f32 %v2498_v5, %v2497_v30 }
 0xb28   :  { %2551 = vmatmul.f32.gmra.mxu0 %v2499_v59 }
 0xba5   :  { %v2552_v3 = vpop.f32.mrf.mxu0 }
 0xba6   :  { %v2553_v11 = vadd.f32 %v4748_v12, %v2552_v3 }
 0xba8   :  { %2558 = vst [vmem:[#allocation17 + $0x18] sm:$0xff] %v2553_v11 }
 0xba9   :  { %2571 = dma.vmem_to_hbm [thread:$0]  %s2564_s19, 512, %s2566_s21, [#allocation7], %s3118_s18, %s3118_s18, %s3119_s6  }
 0xbaa   :  { %3110 = dma.done.wait [#allocation7], 512  }
 0xbab   :  { %3111 = vsyncadd [#allocation7], 4294966784 }
 0xbac   :  { %2576 = vsyncpa [#allocation6], 1 }
 0xbad   :  { %2577 = vsyncpa [#allocation9], 1 }
 0xbae   :  { %2578 = vsyncpa [#allocation12], 1 }
 0xbaf   :  { %2579 = vsyncpa [#allocation15], 1 }
 0xbb0   :  { %2580 = vsyncpa [#allocation7], 1 }

</bundles_post_ra>
